<compile_context>
chip_gen: v5e
topology: v5e:2x2
jax: 0.10.0
libtpu: 0.0.40
codegen_flags: <defaults>
</compile_context>

<pallas_src>
import functools

import jax
import jax.numpy as jnp
from jax.experimental import pallas as pl
from jax.experimental.pallas import tpu as pltpu


EXPANSION = 4
BN_EPS = 1e-5


# ----------------------------------------------------------------------------
# Fused bottleneck kernel
# ----------------------------------------------------------------------------
def _bottleneck_kernel(
    x_ref,                  # (1, H+2, W, Cin)  bf16  whole H-padded image (auto-pipelined)
    w1_ref,                 # (Cin, C1)         bf16  VMEM-resident
    s1_ref, b1_ref,         # (1, C1)           f32
    w2_ref,                 # (3, 3, C1, C1)    bf16
    s2_ref, b2_ref,         # (1, C1)           f32
    w3_ref,                 # (C1, Cout)        bf16
    s3_ref, b3_ref,         # (1, Cout)         f32
    o_ref,                  # (1, TH, W, Cout)  f32 output block
    h1_ref,                 # (TH+2, W+2, C1)   f32 VMEM scratch (zero-padded conv1 out)
    *, H, W, TH):
    t = pl.program_id(1)
    row0 = pl.multiple_of(t * TH, TH)        # first padded-frame row of this tile

    Cin = x_ref.shape[-1]
    C1 = w1_ref.shape[1]
    Cout = w3_ref.shape[1]
    M1 = (TH + 2) * W
    M2 = TH * W

    # Row slab: TH output rows + a 1-row halo on each side.  Border halo rows
    # are genuine zeros (wrapper pre-pads H), so no conditional DMA and no
    # stale-VMEM dependence.
    xb = x_ref[0, pl.ds(row0, TH + 2)]                          # (TH+2, W, Cin) bf16

    # ---- conv1 (1x1) + bn1 + relu: spatial flattened into M for the MXU -----
    y1 = jnp.dot(xb.reshape(M1, Cin), w1_ref[...],
                 preferred_element_type=jnp.float32)            # (M1, C1) f32
    h1 = jnp.maximum(y1 * s1_ref[...] + b1_ref[...], 0.0).reshape(TH + 2, W, C1)

    # conv2 zero-pads its *input*: slab rows outside the image (padded rows 0
    # and H+1) came in as zeros but picked up bn1's bias above -> force to 0.
    pidx = jax.lax.broadcasted_iota(jnp.int32, (TH + 2, 1, 1), 0) + row0
    h1 = jnp.where(jnp.logical_and(pidx >= 1, pidx <= H), h1, 0.0)

    zcol = jnp.zeros((TH + 2, 1, C1), jnp.float32)
    h1_ref[:, 0:1, :] = zcol                                    # left zero column
    h1_ref[:, W + 1:W + 2, :] = zcol                            # right zero column
    h1_ref[:, 1:W + 1, :] = h1

    # ---- conv2 (3x3, stride 1, pad 1) + bn2 + relu ---------------------------
    # dx (width/sublane) shift hoisted: 3 shifted loads + casts; dy shifts are
    # cheap leading-dim slices.  Each tap is a (TH*W, C1) x (C1, C1) MXU matmul
    # accumulated in f32.
    acc = jnp.zeros((M2, C1), jnp.float32)
    for dx in range(3):
        shifted = h1_ref[:, dx:dx + W, :].astype(jnp.bfloat16)  # (TH+2, W, C1)
        for dy in range(3):
            patch = shifted[dy:dy + TH].reshape(M2, C1)
            acc = acc + jnp.dot(patch, w2_ref[dy, dx],
                                preferred_element_type=jnp.float32)
    h2 = jnp.maximum(acc * s2_ref[...] + b2_ref[...], 0.0)      # (M2, C1) f32

    # ---- conv3 (1x1) + bn3 + residual add + relu -----------------------------
    y3 = jnp.dot(h2.astype(jnp.bfloat16), w3_ref[...],
                 preferred_element_type=jnp.float32)            # (M2, Cout) f32
    res = xb[1:TH + 1].reshape(M2, Cin).astype(jnp.float32)     # residual in f32
    y3 = y3 * s3_ref[...] + b3_ref[...] + res
    o_ref[0] = jnp.maximum(y3, 0.0).reshape(TH, W, Cout).astype(o_ref.dtype)


# ----------------------------------------------------------------------------
# Wrapper helpers
# ----------------------------------------------------------------------------
@functools.lru_cache(maxsize=None)
def _vmem_limit_bytes():
    """Per-generation VMEM limit (v5e/v6e 128 MiB, v7x 64 MiB) with headroom."""
    try:
        phys = int(pltpu.get_tpu_info().vmem_capacity_bytes)
    except Exception:
        phys = 64 * 1024 * 1024                       # v7x-safe fallback
    return max(32 * 1024 * 1024,
               min(phys - 16 * 1024 * 1024, 100 * 1024 * 1024))


def _pick_row_tile(H, W, cin, c1, cout, vmem_limit):
    """Largest divisor of H (up to H itself) whose fused-tile footprint fits.

    Accounts for the double-buffered input/weight pipeline blocks and the f32
    temporaries, not just the scratch/output tiles."""
    fixed = 2 * (H + 2) * W * cin * 2                            # x image block (bf16, x2 bufs)
    fixed += 2 * (cin * c1 + 9 * c1 * c1 + c1 * cout) * 2        # weights (bf16, x2 bufs)
    fixed += 2 * 6 * max(c1, cout) * 4                           # bn scale/bias (f32)
    budget = int(0.85 * vmem_limit) - fixed

    def tile_bytes(th):
        h1b = (th + 2) * (W + 2) * c1 * 4                        # f32 padded conv1 scratch
        outb = 2 * th * W * cout * 4                             # f32 output block (x2 bufs)
        tmp = (th + 2) * W * (cin * 2 + c1 * 10)                 # xb + y1/h1 + shifted
        tmp += th * W * (c1 * 8 + cout * 8)                      # acc/h2 + y3/res
        return h1b + outb + int(1.25 * tmp)

    best = 1
    for th in range(1, H + 1):
        if H % th == 0 and tile_bytes(th) <= budget:
            best = th
    return best


def _fold_bn(gamma, beta, mean, var):
    scale = gamma / jnp.sqrt(var + BN_EPS)
    bias = beta - mean * scale
    return (scale.reshape(1, -1).astype(jnp.float32),
            bias.reshape(1, -1).astype(jnp.float32))


def init_bottleneck_params(key, inplanes, planes):
    ks = jax.random.split(key, 15)
    out_planes = planes * EXPANSION

    def conv_w(k, cin, cout, kh=1, kw=1):
        std = (2.0 / (cin * kh * kw)) ** 0.5
        return jax.random.normal(k, (kh, kw, cin, cout), jnp.float32) * std

    def bn_params(k0, k1, k2, k3, c):
        gamma = 0.5 + jax.random.uniform(k0, (c,), jnp.float32)
        beta = 0.1 * jax.random.normal(k1, (c,), jnp.float32)
        mean = 0.1 * jax.random.normal(k2, (c,), jnp.float32)
        var = 0.5 + jax.random.uniform(k3, (c,), jnp.float32)
        return gamma, beta, mean, var

    p = {}
    p["w1"] = conv_w(ks[0], inplanes, planes)[0, 0]          # (inplanes, planes)
    p["bn1"] = _fold_bn(*bn_params(ks[1], ks[2], ks[3], ks[4], planes))
    p["w2"] = conv_w(ks[5], planes, planes, 3, 3)            # (3, 3, planes, planes)
    p["bn2"] = _fold_bn(*bn_params(ks[6], ks[7], ks[8], ks[9], planes))
    p["w3"] = conv_w(ks[10], planes, out_planes)[0, 0]       # (planes, planes*4)
    p["bn3"] = _fold_bn(*bn_params(ks[11], ks[12], ks[13], ks[14], out_planes))
    return p


# ----------------------------------------------------------------------------
# Forward
# ----------------------------------------------------------------------------
@jax.jit
def bottleneck_forward(x_nchw, params):
    # x_nchw: (N, C, H, W) f32, C == planes * EXPANSION (downsample=None path).
    # TODO(synk): in a full ResNet keep activations NHWC/bf16 end-to-end and
    #             hoist the transpose + H-pad out of the per-block path.
    x = jnp.transpose(x_nchw, (0, 2, 3, 1)).astype(jnp.bfloat16)   # NHWC bf16
    N, H, W, Cin = x.shape
    C1 = params["w1"].shape[1]
    Cout = params["w3"].shape[1]
    assert Cin == Cout, "identity path requires inplanes == planes * EXPANSION"

    # Zero-pad H by one row top/bottom so every tile's halo exists in HBM.
    xp = jnp.pad(x, ((0, 0), (1, 1), (0, 0), (0, 0)))              # (N, H+2, W, Cin)

    s1, b1 = params["bn1"]
    s2, b2 = params["bn2"]
    s3, b3 = params["bn3"]
    w1 = params["w1"].astype(jnp.bfloat16)
    w2 = params["w2"].astype(jnp.bfloat16)
    w3 = params["w3"].astype(jnp.bfloat16)

    vmem_limit = _vmem_limit_bytes()
    TH = _pick_row_tile(H, W, Cin, C1, Cout, vmem_limit)
    grid = (N, H // TH)

    kernel = functools.partial(_bottleneck_kernel, H=H, W=W, TH=TH)

    out = pl.pallas_call(
        kernel,
        out_shape=jax.ShapeDtypeStruct((N, H, W, Cout), jnp.float32),
        grid=grid,
        in_specs=[
            pl.BlockSpec((1, H + 2, W, Cin), lambda n, t: (n, 0, 0, 0)),   # x (padded image)
            pl.BlockSpec((Cin, C1), lambda n, t: (0, 0)),                  # w1
            pl.BlockSpec((1, C1), lambda n, t: (0, 0)),                    # bn1 scale
            pl.BlockSpec((1, C1), lambda n, t: (0, 0)),                    # bn1 bias
            pl.BlockSpec((3, 3, C1, C1), lambda n, t: (0, 0, 0, 0)),       # w2
            pl.BlockSpec((1, C1), lambda n, t: (0, 0)),                    # bn2 scale
            pl.BlockSpec((1, C1), lambda n, t: (0, 0)),                    # bn2 bias
            pl.BlockSpec((C1, Cout), lambda n, t: (0, 0)),                 # w3
            pl.BlockSpec((1, Cout), lambda n, t: (0, 0)),                  # bn3 scale
            pl.BlockSpec((1, Cout), lambda n, t: (0, 0)),                  # bn3 bias
        ],
        out_specs=pl.BlockSpec((1, TH, W, Cout), lambda n, t: (n, t, 0, 0)),
        scratch_shapes=[
            pltpu.VMEM((TH + 2, W + 2, C1), jnp.float32),    # padded conv1 output
        ],
        compiler_params=pltpu.CompilerParams(
            dimension_semantics=("parallel", "parallel"),
            vmem_limit_bytes=vmem_limit),
    )(xp, w1, s1, b1, w2, s2, b2, w3, s3, b3)

    return jnp.transpose(out, (0, 3, 1, 2))                  # back to NCHW


# ----------------------------------------------------------------------------
# Reference (pure JAX, f32) for a sanity check
# ----------------------------------------------------------------------------
def _ref_forward(x_nchw, params):
    x = jnp.transpose(x_nchw, (0, 2, 3, 1))
    s1, b1 = params["bn1"]
    s2, b2 = params["bn2"]
    s3, b3 = params["bn3"]

    out = jnp.maximum(jnp.einsum("nhwc,cd->nhwd", x, params["w1"]) * s1[0] + b1[0], 0.0)
    out = jax.lax.conv_general_dilated(
        out, params["w2"], window_strides=(1, 1), padding="SAME",
        dimension_numbers=("NHWC", "HWIO", "NHWC"))
    out = jnp.maximum(out * s2[0] + b2[0], 0.0)
    out = jnp.einsum("nhwc,cd->nhwd", out, params["w3"]) * s3[0] + b3[0]
    out = jnp.maximum(out + x, 0.0)
    return jnp.transpose(out, (0, 3, 1, 2))


if __name__ == "__main__":
    key = jax.random.PRNGKey(0)
    k_x, k_p = jax.random.split(key)

    planes = 16
    inplanes = planes * EXPANSION      # 64, so the identity add works (downsample=None)
    N, H, W = 2, 16, 16

    x = jax.random.normal(k_x, (N, inplanes, H, W), jnp.float32)
    params = init_bottleneck_params(k_p, inplanes, planes)

    y = bottleneck_forward(x, params)
    y = jax.block_until_ready(y)

    y_ref = _ref_forward(x, params)
    assert y.shape == (N, inplanes, H, W)
    # bf16 activations + bf16 MXU matmuls (f32 accumulate) vs f32 reference
    # -> loosened tolerance (the bf16 residual path adds ~1e-3 abs rounding).
    assert jnp.allclose(y, y_ref, atol=5e-2, rtol=5e-2), "mismatch vs JAX reference"

    print("KERNEL_OK")
</pallas_src>

<mosaic_0001>
module attributes {stable_mosaic.version = 11 : i64} {
  func.func @_bottleneck_kernel(%arg0: i32, %arg1: i32, %arg2: memref<1x18x16x64xbf16, #tpu.memory_space<vmem>>, %arg3: memref<64x16xbf16, #tpu.memory_space<vmem>>, %arg4: memref<1x16xf32, #tpu.memory_space<vmem>>, %arg5: memref<1x16xf32, #tpu.memory_space<vmem>>, %arg6: memref<3x3x16x16xbf16, #tpu.memory_space<vmem>>, %arg7: memref<1x16xf32, #tpu.memory_space<vmem>>, %arg8: memref<1x16xf32, #tpu.memory_space<vmem>>, %arg9: memref<16x64xbf16, #tpu.memory_space<vmem>>, %arg10: memref<1x64xf32, #tpu.memory_space<vmem>>, %arg11: memref<1x64xf32, #tpu.memory_space<vmem>>, %arg12: memref<1x16x16x64xf32, #tpu.memory_space<vmem>>, %arg13: memref<18x18x16xf32, #tpu.memory_space<vmem>>) attributes {dimension_semantics = [#tpu.dimension_semantics<parallel>, #tpu.dimension_semantics<parallel>], iteration_bounds = array<i64: 2, 1>, scalar_prefetch = 0 : i64, scratch_operands = 1 : i64, tpu.core_type = #tpu.core_type<tc>, window_params = [{transform_indices = @transform_0, window_bounds = array<i64: 1, 18, 16, 64>}, {pipeline_mode = #tpu.pipeline_mode<synchronous>, transform_indices = @transform_1, window_bounds = array<i64: 64, 16>}, {pipeline_mode = #tpu.pipeline_mode<synchronous>, transform_indices = @transform_2, window_bounds = array<i64: 1, 16>}, {pipeline_mode = #tpu.pipeline_mode<synchronous>, transform_indices = @transform_3, window_bounds = array<i64: 1, 16>}, {pipeline_mode = #tpu.pipeline_mode<synchronous>, transform_indices = @transform_4, window_bounds = array<i64: 3, 3, 16, 16>}, {pipeline_mode = #tpu.pipeline_mode<synchronous>, transform_indices = @transform_5, window_bounds = array<i64: 1, 16>}, {pipeline_mode = #tpu.pipeline_mode<synchronous>, transform_indices = @transform_6, window_bounds = array<i64: 1, 16>}, {pipeline_mode = #tpu.pipeline_mode<synchronous>, transform_indices = @transform_7, window_bounds = array<i64: 16, 64>}, {pipeline_mode = #tpu.pipeline_mode<synchronous>, transform_indices = @transform_8, window_bounds = array<i64: 1, 64>}, {pipeline_mode = #tpu.pipeline_mode<synchronous>, transform_indices = @transform_9, window_bounds = array<i64: 1, 64>}, {transform_indices = @transform_10, window_bounds = array<i64: 1, 16, 16, 64>}]} {
    %c16_i32 = arith.constant 16 : i32
    %0 = arith.muli %arg1, %c16_i32 : i32
    %1 = tpu.assume_multiple %0, 16 : i32
    %c0 = arith.constant 0 : index
    %2 = arith.index_cast %1 : i32 to index
    %c0_0 = arith.constant 0 : index
    %c0_1 = arith.constant 0 : index
    %3 = vector.load %arg2[%c0, %2, %c0_0, %c0_1] : memref<1x18x16x64xbf16, #tpu.memory_space<vmem>>, vector<1x18x16x64xbf16>
    %4 = vector.shape_cast %3 : vector<1x18x16x64xbf16> to vector<18x16x64xbf16>
    %5 = vector.shape_cast %4 : vector<18x16x64xbf16> to vector<288x64xbf16>
    %c0_2 = arith.constant 0 : index
    %c0_3 = arith.constant 0 : index
    %6 = vector.load %arg3[%c0_2, %c0_3] : memref<64x16xbf16, #tpu.memory_space<vmem>>, vector<64x16xbf16>
    %cst = arith.constant dense<0.000000e+00> : vector<288x16xf32>
    %7 = tpu.matmul %5, %6, %cst {dimension_numbers = #tpu.dot_dimension_numbers<[1], [0], [0], [1], [0, 0, 1, 1], [], []>} : vector<288x64xbf16>, vector<64x16xbf16>, vector<288x16xf32> -> vector<288x16xf32>
    %c0_4 = arith.constant 0 : index
    %c0_5 = arith.constant 0 : index
    %8 = vector.load %arg4[%c0_4, %c0_5] : memref<1x16xf32, #tpu.memory_space<vmem>>, vector<1x16xf32>
    %9 = vector.broadcast %8 : vector<1x16xf32> to vector<288x16xf32>
    %10 = arith.mulf %7, %9 : vector<288x16xf32>
    %c0_6 = arith.constant 0 : index
    %c0_7 = arith.constant 0 : index
    %11 = vector.load %arg5[%c0_6, %c0_7] : memref<1x16xf32, #tpu.memory_space<vmem>>, vector<1x16xf32>
    %12 = vector.broadcast %11 : vector<1x16xf32> to vector<288x16xf32>
    %13 = arith.addf %10, %12 : vector<288x16xf32>
    %cst_8 = arith.constant 0.000000e+00 : f32
    %14 = vector.broadcast %cst_8 : f32 to vector<288x16xf32>
    %15 = arith.maximumf %13, %14 : vector<288x16xf32>
    %16 = vector.shape_cast %15 : vector<288x16xf32> to vector<18x16x16xf32>
    %17 = tpu.iota {dimensions = array<i32: 0>} : vector<18x1x1xi32>
    %18 = vector.broadcast %1 : i32 to vector<18x1x1xi32>
    %19 = arith.addi %17, %18 : vector<18x1x1xi32>
    %c1_i32 = arith.constant 1 : i32
    %20 = vector.broadcast %c1_i32 : i32 to vector<18x1x1xi32>
    %21 = arith.cmpi sge, %19, %20 : vector<18x1x1xi32>
    %c16_i32_9 = arith.constant 16 : i32
    %22 = vector.broadcast %c16_i32_9 : i32 to vector<18x1x1xi32>
    %23 = arith.cmpi sle, %19, %22 : vector<18x1x1xi32>
    %24 = arith.andi %21, %23 : vector<18x1x1xi1>
    %cst_10 = arith.constant 0.000000e+00 : f32
    %25 = vector.shape_cast %24 : vector<18x1x1xi1> to vector<18x1x1xi1>
    %26 = vector.broadcast %25 : vector<18x1x1xi1> to vector<18x16x16xi1>
    %27 = vector.broadcast %cst_10 : f32 to vector<18x16x16xf32>
    %28 = arith.select %26, %16, %27 : vector<18x16x16xi1>, vector<18x16x16xf32>
    %cst_11 = arith.constant 0.000000e+00 : f32
    %29 = vector.broadcast %cst_11 : f32 to vector<18x1x16xf32>
    %c0_12 = arith.constant 0 : index
    %c0_13 = arith.constant 0 : index
    %c0_14 = arith.constant 0 : index
    %30 = vector.load %arg13[%c0_12, %c0_13, %c0_14] : memref<18x18x16xf32, #tpu.memory_space<vmem>>, vector<18x1x16xf32>
    tpu.vector_store %arg13[%c0_12, %c0_13, %c0_14], %29 {strides = array<i32>} : memref<18x18x16xf32, #tpu.memory_space<vmem>>, vector<18x1x16xf32>,
    %c0_15 = arith.constant 0 : index
    %c17 = arith.constant 17 : index
    %c0_16 = arith.constant 0 : index
    %31 = vector.load %arg13[%c0_15, %c17, %c0_16] : memref<18x18x16xf32, #tpu.memory_space<vmem>>, vector<18x1x16xf32>
    tpu.vector_store %arg13[%c0_15, %c17, %c0_16], %29 {strides = array<i32>} : memref<18x18x16xf32, #tpu.memory_space<vmem>>, vector<18x1x16xf32>,
    %c0_17 = arith.constant 0 : index
    %c1 = arith.constant 1 : index
    %c0_18 = arith.constant 0 : index
    %32 = vector.load %arg13[%c0_17, %c1, %c0_18] : memref<18x18x16xf32, #tpu.memory_space<vmem>>, vector<18x16x16xf32>
    tpu.vector_store %arg13[%c0_17, %c1, %c0_18], %28 {strides = array<i32>} : memref<18x18x16xf32, #tpu.memory_space<vmem>>, vector<18x16x16xf32>,
    %cst_19 = arith.constant 0.000000e+00 : f32
    %33 = vector.broadcast %cst_19 : f32 to vector<256x16xf32>
    %c0_20 = arith.constant 0 : index
    %c0_21 = arith.constant 0 : index
    %c0_22 = arith.constant 0 : index
    %34 = vector.load %arg13[%c0_20, %c0_21, %c0_22] : memref<18x18x16xf32, #tpu.memory_space<vmem>>, vector<18x16x16xf32>
    %35 = arith.truncf %34 : vector<18x16x16xf32> to vector<18x16x16xbf16>
    %36 = vector.extract_strided_slice %35 {offsets = [0, 0, 0], sizes = [16, 16, 16], strides = [1, 1, 1]} : vector<18x16x16xbf16> to vector<16x16x16xbf16>
    %37 = vector.shape_cast %36 : vector<16x16x16xbf16> to vector<256x16xbf16>
    %c0_23 = arith.constant 0 : index
    %c0_24 = arith.constant 0 : index
    %c0_25 = arith.constant 0 : index
    %c0_26 = arith.constant 0 : index
    %38 = vector.load %arg6[%c0_23, %c0_24, %c0_25, %c0_26] : memref<3x3x16x16xbf16, #tpu.memory_space<vmem>>, vector<1x1x16x16xbf16>
    %39 = vector.shape_cast %38 : vector<1x1x16x16xbf16> to vector<16x16xbf16>
    %cst_27 = arith.constant dense<0.000000e+00> : vector<256x16xf32>
    %40 = tpu.matmul %37, %39, %cst_27 {dimension_numbers = #tpu.dot_dimension_numbers<[1], [0], [0], [1], [0, 0, 1, 1], [], []>} : vector<256x16xbf16>, vector<16x16xbf16>, vector<256x16xf32> -> vector<256x16xf32>
    %41 = arith.addf %33, %40 : vector<256x16xf32>
    %42 = vector.extract_strided_slice %35 {offsets = [1, 0, 0], sizes = [16, 16, 16], strides = [1, 1, 1]} : vector<18x16x16xbf16> to vector<16x16x16xbf16>
    %43 = vector.shape_cast %42 : vector<16x16x16xbf16> to vector<256x16xbf16>
    %c1_28 = arith.constant 1 : index
    %c0_29 = arith.constant 0 : index
    %c0_30 = arith.constant 0 : index
    %c0_31 = arith.constant 0 : index
    %44 = vector.load %arg6[%c1_28, %c0_29, %c0_30, %c0_31] : memref<3x3x16x16xbf16, #tpu.memory_space<vmem>>, vector<1x1x16x16xbf16>
    %45 = vector.shape_cast %44 : vector<1x1x16x16xbf16> to vector<16x16xbf16>
    %cst_32 = arith.constant dense<0.000000e+00> : vector<256x16xf32>
    %46 = tpu.matmul %43, %45, %cst_32 {dimension_numbers = #tpu.dot_dimension_numbers<[1], [0], [0], [1], [0, 0, 1, 1], [], []>} : vector<256x16xbf16>, vector<16x16xbf16>, vector<256x16xf32> -> vector<256x16xf32>
    %47 = arith.addf %41, %46 : vector<256x16xf32>
    %48 = vector.extract_strided_slice %35 {offsets = [2, 0, 0], sizes = [16, 16, 16], strides = [1, 1, 1]} : vector<18x16x16xbf16> to vector<16x16x16xbf16>
    %49 = vector.shape_cast %48 : vector<16x16x16xbf16> to vector<256x16xbf16>
    %c2 = arith.constant 2 : index
    %c0_33 = arith.constant 0 : index
    %c0_34 = arith.constant 0 : index
    %c0_35 = arith.constant 0 : index
    %50 = vector.load %arg6[%c2, %c0_33, %c0_34, %c0_35] : memref<3x3x16x16xbf16, #tpu.memory_space<vmem>>, vector<1x1x16x16xbf16>
    %51 = vector.shape_cast %50 : vector<1x1x16x16xbf16> to vector<16x16xbf16>
    %cst_36 = arith.constant dense<0.000000e+00> : vector<256x16xf32>
    %52 = tpu.matmul %49, %51, %cst_36 {dimension_numbers = #tpu.dot_dimension_numbers<[1], [0], [0], [1], [0, 0, 1, 1], [], []>} : vector<256x16xbf16>, vector<16x16xbf16>, vector<256x16xf32> -> vector<256x16xf32>
    %53 = arith.addf %47, %52 : vector<256x16xf32>
    %c0_37 = arith.constant 0 : index
    %c1_38 = arith.constant 1 : index
    %c0_39 = arith.constant 0 : index
    %54 = vector.load %arg13[%c0_37, %c1_38, %c0_39] : memref<18x18x16xf32, #tpu.memory_space<vmem>>, vector<18x16x16xf32>
    %55 = arith.truncf %54 : vector<18x16x16xf32> to vector<18x16x16xbf16>
    %56 = vector.extract_strided_slice %55 {offsets = [0, 0, 0], sizes = [16, 16, 16], strides = [1, 1, 1]} : vector<18x16x16xbf16> to vector<16x16x16xbf16>
    %57 = vector.shape_cast %56 : vector<16x16x16xbf16> to vector<256x16xbf16>
    %c0_40 = arith.constant 0 : index
    %c1_41 = arith.constant 1 : index
    %c0_42 = arith.constant 0 : index
    %c0_43 = arith.constant 0 : index
    %58 = vector.load %arg6[%c0_40, %c1_41, %c0_42, %c0_43] : memref<3x3x16x16xbf16, #tpu.memory_space<vmem>>, vector<1x1x16x16xbf16>
    %59 = vector.shape_cast %58 : vector<1x1x16x16xbf16> to vector<16x16xbf16>
    %cst_44 = arith.constant dense<0.000000e+00> : vector<256x16xf32>
    %60 = tpu.matmul %57, %59, %cst_44 {dimension_numbers = #tpu.dot_dimension_numbers<[1], [0], [0], [1], [0, 0, 1, 1], [], []>} : vector<256x16xbf16>, vector<16x16xbf16>, vector<256x16xf32> -> vector<256x16xf32>
    %61 = arith.addf %53, %60 : vector<256x16xf32>
    %62 = vector.extract_strided_slice %55 {offsets = [1, 0, 0], sizes = [16, 16, 16], strides = [1, 1, 1]} : vector<18x16x16xbf16> to vector<16x16x16xbf16>
    %63 = vector.shape_cast %62 : vector<16x16x16xbf16> to vector<256x16xbf16>
    %c1_45 = arith.constant 1 : index
    %c1_46 = arith.constant 1 : index
    %c0_47 = arith.constant 0 : index
    %c0_48 = arith.constant 0 : index
    %64 = vector.load %arg6[%c1_45, %c1_46, %c0_47, %c0_48] : memref<3x3x16x16xbf16, #tpu.memory_space<vmem>>, vector<1x1x16x16xbf16>
    %65 = vector.shape_cast %64 : vector<1x1x16x16xbf16> to vector<16x16xbf16>
    %cst_49 = arith.constant dense<0.000000e+00> : vector<256x16xf32>
    %66 = tpu.matmul %63, %65, %cst_49 {dimension_numbers = #tpu.dot_dimension_numbers<[1], [0], [0], [1], [0, 0, 1, 1], [], []>} : vector<256x16xbf16>, vector<16x16xbf16>, vector<256x16xf32> -> vector<256x16xf32>
    %67 = arith.addf %61, %66 : vector<256x16xf32>
    %68 = vector.extract_strided_slice %55 {offsets = [2, 0, 0], sizes = [16, 16, 16], strides = [1, 1, 1]} : vector<18x16x16xbf16> to vector<16x16x16xbf16>
    %69 = vector.shape_cast %68 : vector<16x16x16xbf16> to vector<256x16xbf16>
    %c2_50 = arith.constant 2 : index
    %c1_51 = arith.constant 1 : index
    %c0_52 = arith.constant 0 : index
    %c0_53 = arith.constant 0 : index
    %70 = vector.load %arg6[%c2_50, %c1_51, %c0_52, %c0_53] : memref<3x3x16x16xbf16, #tpu.memory_space<vmem>>, vector<1x1x16x16xbf16>
    %71 = vector.shape_cast %70 : vector<1x1x16x16xbf16> to vector<16x16xbf16>
    %cst_54 = arith.constant dense<0.000000e+00> : vector<256x16xf32>
    %72 = tpu.matmul %69, %71, %cst_54 {dimension_numbers = #tpu.dot_dimension_numbers<[1], [0], [0], [1], [0, 0, 1, 1], [], []>} : vector<256x16xbf16>, vector<16x16xbf16>, vector<256x16xf32> -> vector<256x16xf32>
    %73 = arith.addf %67, %72 : vector<256x16xf32>
    %c0_55 = arith.constant 0 : index
    %c2_56 = arith.constant 2 : index
    %c0_57 = arith.constant 0 : index
    %74 = vector.load %arg13[%c0_55, %c2_56, %c0_57] : memref<18x18x16xf32, #tpu.memory_space<vmem>>, vector<18x16x16xf32>
    %75 = arith.truncf %74 : vector<18x16x16xf32> to vector<18x16x16xbf16>
    %76 = vector.extract_strided_slice %75 {offsets = [0, 0, 0], sizes = [16, 16, 16], strides = [1, 1, 1]} : vector<18x16x16xbf16> to vector<16x16x16xbf16>
    %77 = vector.shape_cast %76 : vector<16x16x16xbf16> to vector<256x16xbf16>
    %c0_58 = arith.constant 0 : index
    %c2_59 = arith.constant 2 : index
    %c0_60 = arith.constant 0 : index
    %c0_61 = arith.constant 0 : index
    %78 = vector.load %arg6[%c0_58, %c2_59, %c0_60, %c0_61] : memref<3x3x16x16xbf16, #tpu.memory_space<vmem>>, vector<1x1x16x16xbf16>
    %79 = vector.shape_cast %78 : vector<1x1x16x16xbf16> to vector<16x16xbf16>
    %cst_62 = arith.constant dense<0.000000e+00> : vector<256x16xf32>
    %80 = tpu.matmul %77, %79, %cst_62 {dimension_numbers = #tpu.dot_dimension_numbers<[1], [0], [0], [1], [0, 0, 1, 1], [], []>} : vector<256x16xbf16>, vector<16x16xbf16>, vector<256x16xf32> -> vector<256x16xf32>
    %81 = arith.addf %73, %80 : vector<256x16xf32>
    %82 = vector.extract_strided_slice %75 {offsets = [1, 0, 0], sizes = [16, 16, 16], strides = [1, 1, 1]} : vector<18x16x16xbf16> to vector<16x16x16xbf16>
    %83 = vector.shape_cast %82 : vector<16x16x16xbf16> to vector<256x16xbf16>
    %c1_63 = arith.constant 1 : index
    %c2_64 = arith.constant 2 : index
    %c0_65 = arith.constant 0 : index
    %c0_66 = arith.constant 0 : index
    %84 = vector.load %arg6[%c1_63, %c2_64, %c0_65, %c0_66] : memref<3x3x16x16xbf16, #tpu.memory_space<vmem>>, vector<1x1x16x16xbf16>
    %85 = vector.shape_cast %84 : vector<1x1x16x16xbf16> to vector<16x16xbf16>
    %cst_67 = arith.constant dense<0.000000e+00> : vector<256x16xf32>
    %86 = tpu.matmul %83, %85, %cst_67 {dimension_numbers = #tpu.dot_dimension_numbers<[1], [0], [0], [1], [0, 0, 1, 1], [], []>} : vector<256x16xbf16>, vector<16x16xbf16>, vector<256x16xf32> -> vector<256x16xf32>
    %87 = arith.addf %81, %86 : vector<256x16xf32>
    %88 = vector.extract_strided_slice %75 {offsets = [2, 0, 0], sizes = [16, 16, 16], strides = [1, 1, 1]} : vector<18x16x16xbf16> to vector<16x16x16xbf16>
    %89 = vector.shape_cast %88 : vector<16x16x16xbf16> to vector<256x16xbf16>
    %c2_68 = arith.constant 2 : index
    %c2_69 = arith.constant 2 : index
    %c0_70 = arith.constant 0 : index
    %c0_71 = arith.constant 0 : index
    %90 = vector.load %arg6[%c2_68, %c2_69, %c0_70, %c0_71] : memref<3x3x16x16xbf16, #tpu.memory_space<vmem>>, vector<1x1x16x16xbf16>
    %91 = vector.shape_cast %90 : vector<1x1x16x16xbf16> to vector<16x16xbf16>
    %cst_72 = arith.constant dense<0.000000e+00> : vector<256x16xf32>
    %92 = tpu.matmul %89, %91, %cst_72 {dimension_numbers = #tpu.dot_dimension_numbers<[1], [0], [0], [1], [0, 0, 1, 1], [], []>} : vector<256x16xbf16>, vector<16x16xbf16>, vector<256x16xf32> -> vector<256x16xf32>
    %93 = arith.addf %87, %92 : vector<256x16xf32>
    %c0_73 = arith.constant 0 : index
    %c0_74 = arith.constant 0 : index
    %94 = vector.load %arg7[%c0_73, %c0_74] : memref<1x16xf32, #tpu.memory_space<vmem>>, vector<1x16xf32>
    %95 = vector.broadcast %94 : vector<1x16xf32> to vector<256x16xf32>
    %96 = arith.mulf %93, %95 : vector<256x16xf32>
    %c0_75 = arith.constant 0 : index
    %c0_76 = arith.constant 0 : index
    %97 = vector.load %arg8[%c0_75, %c0_76] : memref<1x16xf32, #tpu.memory_space<vmem>>, vector<1x16xf32>
    %98 = vector.broadcast %97 : vector<1x16xf32> to vector<256x16xf32>
    %99 = arith.addf %96, %98 : vector<256x16xf32>
    %cst_77 = arith.constant 0.000000e+00 : f32
    %100 = vector.broadcast %cst_77 : f32 to vector<256x16xf32>
    %101 = arith.maximumf %99, %100 : vector<256x16xf32>
    %102 = arith.truncf %101 : vector<256x16xf32> to vector<256x16xbf16>
    %c0_78 = arith.constant 0 : index
    %c0_79 = arith.constant 0 : index
    %103 = vector.load %arg9[%c0_78, %c0_79] : memref<16x64xbf16, #tpu.memory_space<vmem>>, vector<16x64xbf16>
    %cst_80 = arith.constant dense<0.000000e+00> : vector<256x64xf32>
    %104 = tpu.matmul %102, %103, %cst_80 {dimension_numbers = #tpu.dot_dimension_numbers<[1], [0], [0], [1], [0, 0, 1, 1], [], []>} : vector<256x16xbf16>, vector<16x64xbf16>, vector<256x64xf32> -> vector<256x64xf32>
    %105 = vector.extract_strided_slice %4 {offsets = [1, 0, 0], sizes = [16, 16, 64], strides = [1, 1, 1]} : vector<18x16x64xbf16> to vector<16x16x64xbf16>
    %106 = vector.shape_cast %105 : vector<16x16x64xbf16> to vector<256x64xbf16>
    %107 = arith.extf %106 : vector<256x64xbf16> to vector<256x64xf32>
    %c0_81 = arith.constant 0 : index
    %c0_82 = arith.constant 0 : index
    %108 = vector.load %arg10[%c0_81, %c0_82] : memref<1x64xf32, #tpu.memory_space<vmem>>, vector<1x64xf32>
    %109 = vector.broadcast %108 : vector<1x64xf32> to vector<256x64xf32>
    %110 = arith.mulf %104, %109 : vector<256x64xf32>
    %c0_83 = arith.constant 0 : index
    %c0_84 = arith.constant 0 : index
    %111 = vector.load %arg11[%c0_83, %c0_84] : memref<1x64xf32, #tpu.memory_space<vmem>>, vector<1x64xf32>
    %112 = vector.broadcast %111 : vector<1x64xf32> to vector<256x64xf32>
    %113 = arith.addf %110, %112 : vector<256x64xf32>
    %114 = arith.addf %113, %107 : vector<256x64xf32>
    %cst_85 = arith.constant 0.000000e+00 : f32
    %115 = vector.broadcast %cst_85 : f32 to vector<256x64xf32>
    %116 = arith.maximumf %114, %115 : vector<256x64xf32>
    %117 = vector.shape_cast %116 : vector<256x64xf32> to vector<16x16x64xf32>
    %c0_86 = arith.constant 0 : index
    %c0_87 = arith.constant 0 : index
    %c0_88 = arith.constant 0 : index
    %c0_89 = arith.constant 0 : index
    %118 = vector.load %arg12[%c0_86, %c0_87, %c0_88, %c0_89] : memref<1x16x16x64xf32, #tpu.memory_space<vmem>>, vector<1x16x16x64xf32>
    %119 = vector.shape_cast %118 : vector<1x16x16x64xf32> to vector<16x16x64xf32>
    %120 = vector.shape_cast %117 : vector<16x16x64xf32> to vector<1x16x16x64xf32>
    tpu.vector_store %arg12[%c0_86, %c0_87, %c0_88, %c0_89], %120 {strides = array<i32>} : memref<1x16x16x64xf32, #tpu.memory_space<vmem>>, vector<1x16x16x64xf32>,
    return
  }
  func.func @transform_0(%arg0: i32, %arg1: i32) -> (i32, i32, i32, i32) {
    %c0_i32 = arith.constant 0 : i32
    %c0_i32_0 = arith.constant 0 : i32
    %c0_i32_1 = arith.constant 0 : i32
    %c0_i32_2 = arith.constant 0 : i32
    return %arg0, %c0_i32, %c0_i32_0, %c0_i32_1 : i32, i32, i32, i32
  }
  func.func @transform_1(%arg0: i32, %arg1: i32) -> (i32, i32) {
    %c0_i32 = arith.constant 0 : i32
    %c0_i32_0 = arith.constant 0 : i32
    %c0_i32_1 = arith.constant 0 : i32
    return %c0_i32, %c0_i32_0 : i32, i32
  }
  func.func @transform_2(%arg0: i32, %arg1: i32) -> (i32, i32) {
    %c0_i32 = arith.constant 0 : i32
    %c0_i32_0 = arith.constant 0 : i32
    %c0_i32_1 = arith.constant 0 : i32
    return %c0_i32, %c0_i32_0 : i32, i32
  }
  func.func @transform_3(%arg0: i32, %arg1: i32) -> (i32, i32) {
    %c0_i32 = arith.constant 0 : i32
    %c0_i32_0 = arith.constant 0 : i32
    %c0_i32_1 = arith.constant 0 : i32
    return %c0_i32, %c0_i32_0 : i32, i32
  }
  func.func @transform_4(%arg0: i32, %arg1: i32) -> (i32, i32, i32, i32) {
    %c0_i32 = arith.constant 0 : i32
    %c0_i32_0 = arith.constant 0 : i32
    %c0_i32_1 = arith.constant 0 : i32
    %c0_i32_2 = arith.constant 0 : i32
    %c0_i32_3 = arith.constant 0 : i32
    return %c0_i32, %c0_i32_0, %c0_i32_1, %c0_i32_2 : i32, i32, i32, i32
  }
  func.func @transform_5(%arg0: i32, %arg1: i32) -> (i32, i32) {
    %c0_i32 = arith.constant 0 : i32
    %c0_i32_0 = arith.constant 0 : i32
    %c0_i32_1 = arith.constant 0 : i32
    return %c0_i32, %c0_i32_0 : i32, i32
  }
  func.func @transform_6(%arg0: i32, %arg1: i32) -> (i32, i32) {
    %c0_i32 = arith.constant 0 : i32
    %c0_i32_0 = arith.constant 0 : i32
    %c0_i32_1 = arith.constant 0 : i32
    return %c0_i32, %c0_i32_0 : i32, i32
  }
  func.func @transform_7(%arg0: i32, %arg1: i32) -> (i32, i32) {
    %c0_i32 = arith.constant 0 : i32
    %c0_i32_0 = arith.constant 0 : i32
    %c0_i32_1 = arith.constant 0 : i32
    return %c0_i32, %c0_i32_0 : i32, i32
  }
  func.func @transform_8(%arg0: i32, %arg1: i32) -> (i32, i32) {
    %c0_i32 = arith.constant 0 : i32
    %c0_i32_0 = arith.constant 0 : i32
    %c0_i32_1 = arith.constant 0 : i32
    return %c0_i32, %c0_i32_0 : i32, i32
  }
  func.func @transform_9(%arg0: i32, %arg1: i32) -> (i32, i32) {
    %c0_i32 = arith.constant 0 : i32
    %c0_i32_0 = arith.constant 0 : i32
    %c0_i32_1 = arith.constant 0 : i32
    return %c0_i32, %c0_i32_0 : i32, i32
  }
  func.func @transform_10(%arg0: i32, %arg1: i32) -> (i32, i32, i32, i32) {
    %c0_i32 = arith.constant 0 : i32
    %c0_i32_0 = arith.constant 0 : i32
    %c0_i32_1 = arith.constant 0 : i32
    return %arg0, %arg1, %c0_i32, %c0_i32_0 : i32, i32, i32, i32
  }
}

</mosaic_0001>

<bundles_post_ra>
// kernel: bottleneck_forward.1
= control target key start
LH: loop header
LB: loop body
LE: loop exit
PB: predicated region body
PF: predicated region fallthrough
CT: control target
= control target key end

     0   :  { %15 = vsyncpa [#allocation4], 0  ;;  %s5064_s0 = inlined_call_operand.vmem [shape: bf16[2,18,16,64], index: 0, kind: input, shape index: {}]   ;;  %s5065_s1 = inlined_call_operand.vmem [shape: bf16[64,16], index: 1, kind: input, shape index: {}]   ;;  %s5066_s2 = inlined_call_operand.vmem [shape: f32[1,16], index: 2, kind: input, shape index: {}]   ;;  %s5067_s3 = inlined_call_operand.vmem [shape: f32[1,16], index: 3, kind: input, shape index: {}]   ;;  %s5068_s4 = inlined_call_operand.vmem [shape: bf16[3,3,16,16], index: 4, kind: input, shape index: {}]   ;;  %s5069_s5 = inlined_call_operand.vmem [shape: f32[1,16], index: 5, kind: input, shape index: {}]   ;;  %s5070_s6 = inlined_call_operand.vmem [shape: f32[1,16], index: 6, kind: input, shape index: {}]   ;;  %s5071_s7 = inlined_call_operand.vmem [shape: bf16[16,64], index: 7, kind: input, shape index: {}]   ;;  %s5072_s8 = inlined_call_operand.vmem [shape: f32[1,64], index: 8, kind: input, shape index: {}]   ;;  %s5073_s9 = inlined_call_operand.vmem [shape: f32[1,64], index: 9, kind: input, shape index: {}]   ;;  %s5074_s10 = inlined_call_operand.hbm [shape: f32[2,16,16,64], index: 10, kind: output, shape index: {}]  }
   0x1   :  { %17 = vsyncpa [#allocation4 + $0x1], 0  ;;  %s3909_s13 = smov 0   ;;  %s3911_s14 = smov 0  }
   0x2   :  { %s3913_s15 = smov 0   ;;  %s3915_s16 = smov 0  }
   0x3   :  { %s3917_s17 = smov 0   ;;  %s3919_s18 = smov 0  }
   0x4 LB: > { %s3336_s19 = sadd.s32 4294967295, %s3849_s18   ;;  %s3337_s20 = sadd.s32 4294967294, %s3849_s18   ;;  %s3849_s18 = sphi %s3919_s18, %s23_s18   ;;  %s3845_s17 = sphi %s3917_s17, %s5094_s17   ;;  %s3841_s16 = sphi %s3915_s16, %s5093_s16   ;;  %s3837_s15 = sphi %s3913_s15, %s5092_s15   ;;  %s3833_s14 = sphi %s3911_s14, %s5091_s14   ;;  %s3829_s13 = sphi %s3909_s13, %s5090_s13  }
   0x5   : > { %s35_s21 = sadd.s32 1, %s3845_s17  ;;  %s259_s22 = sadd.s32 1, %s3837_s15 }
   0x6   : > { %p37_p0 = scmp.ge.s32.totalorder %s35_s21, 2  ;;  %p269_p1 = scmp.ne.s32.totalorder %s3837_s15, %s3833_s14 }
   0x7   : > { %p270_p2 = scmp.eq.s32.totalorder %s3336_s19, 1  ;;  %p275_p3 = scmp.ne.s32.totalorder %s3833_s14, %s3829_s13 }
   0x8   : > { %s5096_s21 = smov (%p37_p0, %s35_s21), 0  ;;  %p276_p5 = scmp.eq.s32.totalorder %s3337_s20, 1 }
   0x9   : > { %5076 = sst [smem:[#allocation6_spill]] %s5096_s21  ;;  %p3949_p4 = por %p270_p2, %p269_p1 }
   0xa   : > { %s254_s24 = ssub.s32 %s3845_s17, %s5096_s21  ;;  %p3340_p6 = scmp.ge.s32.totalorder %s3849_s18, 1 }
   0xb   : > { %p257_p7 = scmp.eq.s32.totalorder %s254_s24, 0  ;;  %p3956_p8 = por %p276_p5, %p275_p3 }
   0xc   : > { %p329_p9 = scmp.lt.s32.totalorder %s3849_s18, 3 }
   0xd   : > { %s3962_s26 = scalar_select %p257_p7, %s3837_s15, %s259_s22  }
   0xe   : > { %p330_p10 = pnand %p3340_p6, %p329_p9 }
  0x10   : > { %333 = sbr.rel (%p330_p10) target bundleno = 1257 (0x4e9), region = 60 }
  0x15   : > { %v3691_v0 = vld [vmem:[%s5065_s1 + $0x18] sm:$0xff]  ;;  %p367_p11 = scmp.lt.s32.totalorder %s3841_s16, 1  ;;  %v3690_v1 = vld [vmem:[%s5065_s1 + $0x10] sm:$0xff]  ;;  %v3689_v2 = vld [vmem:[%s5065_s1 + $0x8] sm:$0xff]  ;;  %vm536_vm0 = vcmask 523264   ;;  %vm950_vm1 = vcmask 122880  }
  0x16   : > { %595 = vmatpush.bf16.msra.mxu0 %v3691_v0  ;;  %v3688_v3 = vld [vmem:[%s5065_s1] sm:$0xff]  ;;  %v3851_v12 = vmov 0.0   ;;  %vm987_vm2 = vcmask 130048   ;;  %v3693_v43 = vld [vmem:[%s5068_s4 + $0x18] sm:$0xff]  ;;  %v3695_v49 = vld [vmem:[%s5068_s4 + $0x8] sm:$0xff]  ;;  %s3791_s22 = scalar_lea.hbm %s5074_s10, 512 }
  0x17   : > { %s368_s11 = scalar_select %p367_p11, %s3841_s16, 1  ;;  %954 = vst.msk [vmem:[#allocation2 + $0x48] sm:$0x1] %vm950_vm1, %v3851_v12  ;;  %v4026_v16 = vld [vmem:[%s5066_s2] ss:$0 sm:$0xff]  ;;  %3703 = vmatpush.bf16.msra.mxu1 %v3693_v43  ;;  %v4095_v59 = vld [vmem:[%s5068_s4 + $0x30] sm:$0xff] }
  0x18   : > { %951 = vst.msk [vmem:[#allocation2] sm:$0x1] %vm950_vm1, %v3851_v12  ;;  %v4033_v17 = vld [vmem:[%s5067_s3] ss:$0 sm:$0xff]  ;;  %3705 = vmatpush.bf16.msra.mxu3 %v4095_v59 }
  0x19   : > { %s3706_s20 = smul.u32 144, %s368_s11  ;;  %952 = vst.msk [vmem:[#allocation2 + $0x18] sm:$0x1] %vm950_vm1, %v3851_v12  ;;  %v3692_v33 = vld [vmem:[%s5068_s4] sm:$0xff]  ;;  %s364_s11 = sand.u32 1, %s3833_s14  }
  0x1a   : > { %596 = vmatpush.bf16.msra.mxu0 %v3690_v1  ;;  %953 = vst.msk [vmem:[#allocation2 + $0x30] sm:$0x1] %vm950_vm1, %v3851_v12  ;;  %3704 = vmatpush.bf16.msra.mxu2 %v3692_v33  ;;  %v3696_v48 = vld [vmem:[%s5068_s4 + $0x20] sm:$0xff]  ;;  %s3341_s12 = sshll.u32 %s364_s11, 8 }
  0x1b   : > { %s3981_s21 = scalar_lea.vmem %s5064_s0, %s3706_s20  ;;  %955 = vst.msk [vmem:[#allocation2 + $0x60] sm:$0x1] %vm950_vm1, %v3851_v12  ;;  %1781 = vmatpush.bf16.msrb.mxu1 %v3695_v49  ;;  %s4834_s19 = scalar_lea.vmem [#allocation3], %s3341_s12 }
  0x1c   : > { %v3670_v4 = vld [vmem:[%s3981_s21] sm:$0xff]  ;;  %v3671_v5 = vld [vmem:[%s3981_s21 + $0x8] sm:$0xff]  ;;  %v3672_v6 = vld [vmem:[%s3981_s21 + $0x10] sm:$0xff]  ;;  %956 = vst.msk [vmem:[#allocation2 + $0x78] sm:$0x1] %vm950_vm1, %v3851_v12  ;;  %s3702_s20 = sshll.u32 %s3841_s16, 8 }
  0x1d   : > { %v3673_v7 = vld [vmem:[%s3981_s21 + $0x18] sm:$0xff]  ;;  %v3674_v8 = vld [vmem:[%s3981_s21 + $0x20] sm:$0xff]  ;;  %v3675_v9 = vld [vmem:[%s3981_s21 + $0x28] sm:$0xff]  ;;  %957 = vst.msk [vmem:[#allocation2 + $0x90] sm:$0x1] %vm950_vm1, %v3851_v12  ;;  %s3258_s27 = sshll.u32 %s4834_s19, 4  ;;  %s3259_s27 = int_to_ptr.vmem [resolvable:$true] %s3258_s27 }
  0x1e   : > { %597 = vmatpush.bf16.msra.mxu0 %v3689_v2  ;;  %v3676_v10 = vld [vmem:[%s3981_s21 + $0x30] sm:$0xff]  ;;  %v3677_v11 = vld [vmem:[%s3981_s21 + $0x38] sm:$0xff]  ;;  %958 = vst.msk [vmem:[#allocation2 + $0xa8] sm:$0x1] %vm950_vm1, %v3851_v12  ;;  %v3678_v13 = vld [vmem:[%s3981_s21 + $0x40] sm:$0xff]  ;;  %1919 = vmatpush.bf16.msrb.mxu2 %v3696_v48  ;;  %s3243_s16 = scalar_lea.sflag [#allocation4], %s364_s11 }
  0x1f   : > { %959 = vst.msk [vmem:[#allocation2 + $0xc0] sm:$0x1] %vm950_vm1, %v3851_v12  ;;  %v3679_v18 = vld [vmem:[%s3981_s21 + $0x48] sm:$0xff]  ;;  %v3680_v27 = vld [vmem:[%s3981_s21 + $0x50] sm:$0xff]  ;;  %v3681_v37 = vld [vmem:[%s3981_s21 + $0x58] sm:$0xff] }
  0x20   : > { %960 = vst.msk [vmem:[#allocation2 + $0xd8] sm:$0x1] %vm950_vm1, %v3851_v12  ;;  %v3682_v47 = vld [vmem:[%s3981_s21 + $0x60] sm:$0xff]  ;;  %v3683_v2 = vld [vmem:[%s3981_s21 + $0x68] sm:$0xff] }
  0x21   : > { %961 = vst.msk [vmem:[#allocation2 + $0xf0] sm:$0x1] %vm950_vm1, %v3851_v12 }
  0x22   : > { %598 = vmatpush.bf16.msra.mxu0 %v3688_v3  ;;  %962 = vst.msk [vmem:[#allocation2 + $0x108] sm:$0x1] %vm950_vm1, %v3851_v12 }
  0x23   : > { %963 = vst.msk [vmem:[#allocation2 + $0x120] sm:$0x1] %vm950_vm1, %v3851_v12 }
  0x24   : > { %964 = vst.msk [vmem:[#allocation2 + $0x138] sm:$0x1] %vm950_vm1, %v3851_v12 }
  0x25   : > { %3431 = vmatmul.msk.bf16.vlgmr.msra.gmra.mxu0 %vm536_vm0, %v3670_v4  ;;  %965 = vst.msk [vmem:[#allocation2 + $0x150] sm:$0x1] %vm950_vm1, %v3851_v12 }
  0x26   : > { %966 = vst.msk [vmem:[#allocation2 + $0x168] sm:$0x1] %vm950_vm1, %v3851_v12  ;;  %1242 = vmatpush.bf16.msrb.mxu0 %v3693_v43 }
  0x27   : > { %967 = vst.msk [vmem:[#allocation2 + $0x180] sm:$0x1] %vm950_vm1, %v3851_v12 }
  0x28   : > { %968 = vst.msk [vmem:[#allocation2 + $0x198] sm:$0x1] %vm950_vm1, %v3851_v12 }
  0x29   : > { %969 = vst.msk [vmem:[#allocation2 + $0x11] sm:$0x1] %vm950_vm1, %v3851_v12 }
  0x2a   : > { %970 = vst.msk [vmem:[#allocation2 + $0x29] sm:$0x1] %vm950_vm1, %v3851_v12  ;;  %1345 = vmatpush.bf16.msra.mxu0 %v3692_v33 }
  0x2b   : > { %971 = vst.msk [vmem:[#allocation2 + $0x41] sm:$0x1] %vm950_vm1, %v3851_v12 }
  0x2c   : > { %972 = vst.msk [vmem:[#allocation2 + $0x59] sm:$0x1] %vm950_vm1, %v3851_v12 }
  0x2d   : > { %973 = vst.msk [vmem:[#allocation2 + $0x71] sm:$0x1] %vm950_vm1, %v3851_v12 }
  0x2e   : > { %974 = vst.msk [vmem:[#allocation2 + $0x89] sm:$0x1] %vm950_vm1, %v3851_v12 }
  0x2f   : > { %975 = vst.msk [vmem:[#allocation2 + $0xa1] sm:$0x1] %vm950_vm1, %v3851_v12 }
  0x30   : > { %976 = vst.msk [vmem:[#allocation2 + $0xb9] sm:$0x1] %vm950_vm1, %v3851_v12 }
  0x31   : > { %977 = vst.msk [vmem:[#allocation2 + $0xd1] sm:$0x1] %vm950_vm1, %v3851_v12 }
  0x32   : > { %978 = vst.msk [vmem:[#allocation2 + $0xe9] sm:$0x1] %vm950_vm1, %v3851_v12 }
  0x33   : > { %979 = vst.msk [vmem:[#allocation2 + $0x101] sm:$0x1] %vm950_vm1, %v3851_v12 }
  0x34   : > { %980 = vst.msk [vmem:[#allocation2 + $0x119] sm:$0x1] %vm950_vm1, %v3851_v12 }
  0x35   : > { %3432 = vmatmul.msk.bf16.gmra.mxu0 %vm536_vm0, %v3671_v5  ;;  %981 = vst.msk [vmem:[#allocation2 + $0x131] sm:$0x1] %vm950_vm1, %v3851_v12 }
  0x36   : > { %982 = vst.msk [vmem:[#allocation2 + $0x149] sm:$0x1] %vm950_vm1, %v3851_v12 }
  0x37   : > { %983 = vst.msk [vmem:[#allocation2 + $0x161] sm:$0x1] %vm950_vm1, %v3851_v12 }
  0x38   : > { %984 = vst.msk [vmem:[#allocation2 + $0x179] sm:$0x1] %vm950_vm1, %v3851_v12 }
  0x39   : > { %985 = vst.msk [vmem:[#allocation2 + $0x191] sm:$0x1] %vm950_vm1, %v3851_v12 }
  0x3a   : > { %986 = vst.msk [vmem:[#allocation2 + $0x1a9] sm:$0x1] %vm950_vm1, %v3851_v12 }
  0x3b   : > { %988 = vst.msk [vmem:[#allocation2 + $0x1] sm:$0xff] %vm987_vm2, %v3851_v12 }
  0x3c   : > { %989 = vst.msk [vmem:[#allocation2 + $0x9] sm:$0xff] %vm987_vm2, %v3851_v12 }
  0x3d   : > { %1022 = vst.msk [vmem:[#allocation2 + $0x199] sm:$0xff] %vm987_vm2, %v3851_v12 }
  0x3e   : > { %1023 = vst.msk [vmem:[#allocation2 + $0x1a1] sm:$0xff] %vm987_vm2, %v3851_v12 }
  0x45   : > { %3433 = vmatmul.msk.bf16.gmra.mxu0 %vm536_vm0, %v3672_v6 }
  0x55   : > { %3434 = vmatmul.msk.bf16.gmra.mxu0 %vm536_vm0, %v3673_v7 }
  0x65   : > { %3435 = vmatmul.msk.bf16.gmra.mxu0 %vm536_vm0, %v3674_v8 }
  0x75   : > { %3436 = vmatmul.msk.bf16.gmra.mxu0 %vm536_vm0, %v3675_v9 }
  0x85   : > { %3437 = vmatmul.msk.bf16.gmra.mxu0 %vm536_vm0, %v3676_v10 }
  0x95   : > { %3438 = vmatmul.msk.bf16.gmra.mxu0 %vm536_vm0, %v3677_v11 }
  0xa2   : > { %v600_v14 = vpop.f32.mrf.mxu0 }
  0xa5   : > { %3439 = vmatmul.msk.bf16.gmra.mxu0 %vm536_vm0, %v3678_v13 }
  0xaa   : > { %v602_v15 = vpop.f32.mrf.mxu0 }
  0xb2   : > { %v605_v19 = vpop.f32.mrf.mxu0 }
  0xb3   : > { %v696_v20 = vmul.f32 %v4026_v16, %v605_v19 }
  0xb5   : > { %v736_v21 = vadd.f32 %v4033_v17, %v696_v20  ;;  %3440 = vmatmul.msk.bf16.gmra.mxu0 %vm536_vm0, %v3679_v18  ;;  %v3684_v20 = vld [vmem:[%s3981_s21 + $0x70] sm:$0xff] }
  0xb7   : > { %v772_v22 = vmax.f32 %v736_v21, 0.0 }
  0xb9   : > { %990 = vst.msk [vmem:[#allocation2 + $0x19] sm:$0xff] %vm987_vm2, %v772_v22 }
  0xba   : > { %v607_v23 = vpop.f32.mrf.mxu0 }
  0xbb   : > { %v697_v24 = vmul.f32 %v4026_v16, %v607_v23 }
  0xbd   : > { %v737_v25 = vadd.f32 %v4033_v17, %v697_v24 }
  0xbf   : > { %v773_v26 = vmax.f32 %v737_v25, 0.0 }
  0xc1   : > { %991 = vst.msk [vmem:[#allocation2 + $0x21] sm:$0xff] %vm987_vm2, %v773_v26 }
  0xc2   : > { %v610_v28 = vpop.f32.mrf.mxu0 }
  0xc3   : > { %v698_v29 = vmul.f32 %v4026_v16, %v610_v28 }
  0xc5   : > { %v738_v30 = vadd.f32 %v4033_v17, %v698_v29  ;;  %3441 = vmatmul.msk.bf16.gmra.mxu0 %vm536_vm0, %v3680_v27 }
  0xc7   : > { %v774_v31 = vmax.f32 %v738_v30, 0.0 }
  0xc9   : > { %992 = vst.msk [vmem:[#allocation2 + $0x31] sm:$0xff] %vm987_vm2, %v774_v31 }
  0xca   : > { %v612_v32 = vpop.f32.mrf.mxu0 }
  0xcb   : > { %v699_v34 = vmul.f32 %v4026_v16, %v612_v32 }
  0xcd   : > { %v739_v35 = vadd.f32 %v4033_v17, %v699_v34 }
  0xcf   : > { %v775_v36 = vmax.f32 %v739_v35, 0.0 }
  0xd1   : > { %993 = vst.msk [vmem:[#allocation2 + $0x39] sm:$0xff] %vm987_vm2, %v775_v36  ;;  %v3685_v36 = vld [vmem:[%s3981_s21 + $0x78] sm:$0xff] }
  0xd2   : > { %v615_v38 = vpop.f32.mrf.mxu0 }
  0xd3   : > { %v700_v39 = vmul.f32 %v4026_v16, %v615_v38 }
  0xd5   : > { %v740_v40 = vadd.f32 %v4033_v17, %v700_v39  ;;  %3442 = vmatmul.msk.bf16.gmra.mxu0 %vm536_vm0, %v3681_v37 }
  0xd7   : > { %v776_v41 = vmax.f32 %v740_v40, 0.0 }
  0xd9   : > { %994 = vst.msk [vmem:[#allocation2 + $0x49] sm:$0xff] %vm987_vm2, %v776_v41 }
  0xda   : > { %v617_v42 = vpop.f32.mrf.mxu0 }
  0xdb   : > { %v701_v44 = vmul.f32 %v4026_v16, %v617_v42 }
  0xdd   : > { %v741_v45 = vadd.f32 %v4033_v17, %v701_v44 }
  0xdf   : > { %v777_v46 = vmax.f32 %v741_v45, 0.0 }
  0xe0   : > { %v1030_v52 = vld [vmem:[#allocation2 + $0x48] sm:$0xff] }
  0xe1   : > { %995 = vst.msk [vmem:[#allocation2 + $0x51] sm:$0xff] %vm987_vm2, %v777_v46  ;;  %v1066_v55 = vpack.c.bf16 %v1030_v52, %v1030_v52  ;;  %v3686_v52 = vld [vmem:[%s3981_s21 + $0x80] sm:$0xff] }
  0xe2   : > { %v620_v50 = vpop.f32.mrf.mxu0 }
  0xe3   : > { %v702_v51 = vmul.f32 %v4026_v16, %v620_v50  ;;  %v1137_v61 = vunpack.c.l.b16 %v1066_v55 }
  0xe5   : > { %v742_v53 = vadd.f32 %v4033_v17, %v702_v51  ;;  %3443 = vmatmul.msk.bf16.gmra.mxu0 %vm536_vm0, %v3682_v47 }
  0xe7   : > { %v778_v54 = vmax.f32 %v742_v53, 0.0 }
  0xe8   : > { %v1031_v56 = vld [vmem:[#allocation2 + $0x50] sm:$0xff] }
  0xe9   : > { %996 = vst.msk [vmem:[#allocation2 + $0x61] sm:$0xff] %vm987_vm2, %v778_v54  ;;  %v1067_v57 = vpack.c.bf16 %v1031_v56, %v1031_v56 }
  0xea   : > { %v622_v58 = vpop.f32.mrf.mxu0 }
  0xeb   : > { %v703_v60 = vmul.f32 %v4026_v16, %v622_v58  ;;  %v1138_v62 = vunpack.c.l.b16 %v1067_v57 }
  0xed   : > { %v743_v63 = vadd.f32 %v4033_v17, %v703_v60  ;;  %v4100_v0 = vpack.c.b16 %v1138_v62, %v1137_v61 }
  0xef   : > { %v779_v1 = vmax.f32 %v743_v63, 0.0  ;;  %3478 = vmatmul.msk.bf16.vlgmr.msra.gmra.mxu2 %vm987_vm2, %v4100_v0 }
  0xf0   : > { %v1032_v5 = vld [vmem:[#allocation2 + $0x60] sm:$0xff] }
  0xf1   : > { %997 = vst.msk [vmem:[#allocation2 + $0x69] sm:$0xff] %vm987_vm2, %v779_v1  ;;  %v1068_v8 = vpack.c.bf16 %v1032_v5, %v1032_v5 }
  0xf2   : > { %v625_v3 = vpop.f32.mrf.mxu0 }
  0xf3   : > { %v704_v4 = vmul.f32 %v4026_v16, %v625_v3  ;;  %v1139_v13 = vunpack.c.l.b16 %v1068_v8 }
  0xf5   : > { %v744_v6 = vadd.f32 %v4033_v17, %v704_v4  ;;  %3444 = vmatmul.msk.bf16.gmra.mxu0 %vm536_vm0, %v3683_v2 }
  0xf7   : > { %v780_v7 = vmax.f32 %v744_v6, 0.0  ;;  %v3687_v6 = vld [vmem:[%s3981_s21 + $0x88] sm:$0xff] }
  0xf8   : > { %v1033_v9 = vld [vmem:[#allocation2 + $0x68] sm:$0xff] }
  0xf9   : > { %998 = vst.msk [vmem:[#allocation2 + $0x79] sm:$0xff] %vm987_vm2, %v780_v7  ;;  %v1069_v10 = vpack.c.bf16 %v1033_v9, %v1033_v9 }
  0xfa   : > { %v627_v11 = vpop.f32.mrf.mxu0 }
  0xfb   : > { %v705_v12 = vmul.f32 %v4026_v16, %v627_v11  ;;  %v1140_v14 = vunpack.c.l.b16 %v1069_v10 }
  0xfd   : > { %v745_v15 = vadd.f32 %v4033_v17, %v705_v12  ;;  %v4112_v18 = vpack.c.b16 %v1140_v14, %v1139_v13  ;;  %v1027_v14 = vld [vmem:[#allocation2 + $0x20] sm:$0xff] }
  0xff   : > { %v781_v19 = vmax.f32 %v745_v15, 0.0  ;;  %3458 = vmatmul.msk.bf16.vlgmr.msra.gmra.mxu1 %vm987_vm2, %v4112_v18  ;;  %3479 = vmatmul.msk.bf16.gmra.mxu2 %vm987_vm2, %v4112_v18 }
 0x100   : > { %v1034_v23 = vld [vmem:[#allocation2 + $0x78] sm:$0xff] }
 0x101   : > { %999 = vst.msk [vmem:[#allocation2 + $0x81] sm:$0xff] %vm987_vm2, %v781_v19  ;;  %v1070_v26 = vpack.c.bf16 %v1034_v23, %v1034_v23 }
 0x102   : > { %v630_v21 = vpop.f32.mrf.mxu0 }
 0x103   : > { %v706_v22 = vmul.f32 %v4026_v16, %v630_v21  ;;  %v1141_v31 = vunpack.c.l.b16 %v1070_v26 }
 0x105   : > { %v746_v24 = vadd.f32 %v4033_v17, %v706_v22  ;;  %3445 = vmatmul.msk.bf16.gmra.mxu0 %vm536_vm0, %v3684_v20  ;;  %v1026_v20 = vld [vmem:[#allocation2 + $0x18] sm:$0xff] }
 0x107   : > { %v782_v25 = vmax.f32 %v746_v24, 0.0  ;;  %v1063_v24 = vpack.c.bf16 %v1027_v14, %v1027_v14 }
 0x108   : > { %v1035_v27 = vld [vmem:[#allocation2 + $0x80] sm:$0xff] }
 0x109   : > { %1000 = vst.msk [vmem:[#allocation2 + $0x91] sm:$0xff] %vm987_vm2, %v782_v25  ;;  %v1071_v28 = vpack.c.bf16 %v1035_v27, %v1035_v27  ;;  %v1062_v27 = vpack.c.bf16 %v1026_v20, %v1026_v20 }
 0x10a   : > { %v632_v29 = vpop.f32.mrf.mxu0 }
 0x10b   : > { %v707_v30 = vmul.f32 %v4026_v16, %v632_v29  ;;  %v1142_v32 = vunpack.c.l.b16 %v1071_v28  ;;  %v1134_v29 = vunpack.c.l.b16 %v1063_v24 }
 0x10d   : > { %v747_v33 = vadd.f32 %v4033_v17, %v707_v30  ;;  %v1169_v34 = vpack.c.b16 %v1142_v32, %v1141_v31  ;;  %v1133_v30 = vunpack.c.l.b16 %v1062_v27 }
 0x10f   : > { %v783_v35 = vmax.f32 %v747_v33, 0.0  ;;  %3459 = vmatmul.msk.bf16.gmra.mxu1 %vm987_vm2, %v1169_v34  ;;  %3480 = vmatmul.msk.bf16.gmra.mxu2 %vm987_vm2, %v1169_v34  ;;  %v4164_v33 = vpack.c.b16 %v1134_v29, %v1133_v30 }
 0x110   : > { %3500 = vmatmul.msk.bf16.vlgmr.msra.gmra.mxu3 %vm987_vm2, %v1169_v34  ;;  %v1036_v39 = vld [vmem:[#allocation2 + $0x90] sm:$0xff] }
 0x111   : > { %1001 = vst.msk [vmem:[#allocation2 + $0x99] sm:$0xff] %vm987_vm2, %v783_v35  ;;  %v1072_v42 = vpack.c.bf16 %v1036_v39, %v1036_v39  ;;  %v1029_v39 = vld [vmem:[#allocation2 + $0x38] sm:$0xff] }
 0x112   : > { %v635_v37 = vpop.f32.mrf.mxu0 }
 0x113   : > { %v708_v38 = vmul.f32 %v4026_v16, %v635_v37  ;;  %v1143_v47 = vunpack.c.l.b16 %v1072_v42  ;;  %v1028_v42 = vld [vmem:[#allocation2 + $0x30] sm:$0xff] }
 0x115   : > { %v748_v40 = vadd.f32 %v4033_v17, %v708_v38  ;;  %3446 = vmatmul.msk.bf16.gmra.mxu0 %vm536_vm0, %v3685_v36 }
 0x117   : > { %v784_v41 = vmax.f32 %v748_v40, 0.0 }
 0x118   : > { %v1037_v43 = vld [vmem:[#allocation2 + $0x98] sm:$0xff] }
 0x119   : > { %1002 = vst.msk [vmem:[#allocation2 + $0xa9] sm:$0xff] %vm987_vm2, %v784_v41  ;;  %v1073_v44 = vpack.c.bf16 %v1037_v43, %v1037_v43 }
 0x11a   : > { %v637_v45 = vpop.f32.mrf.mxu0 }
 0x11b   : > { %v709_v46 = vmul.f32 %v4026_v16, %v637_v45  ;;  %v1144_v48 = vunpack.c.l.b16 %v1073_v44 }
 0x11d   : > { %v749_v49 = vadd.f32 %v4033_v17, %v709_v46  ;;  %v1170_v50 = vpack.c.b16 %v1144_v48, %v1143_v47  ;;  %v1065_v46 = vpack.c.bf16 %v1029_v39, %v1029_v39 }
 0x11f   : > { %v785_v51 = vmax.f32 %v749_v49, 0.0  ;;  %3460 = vmatmul.msk.bf16.gmra.mxu1 %vm987_vm2, %v1170_v50  ;;  %3481 = vmatmul.msk.bf16.gmra.mxu2 %vm987_vm2, %v1170_v50  ;;  %v1064_v49 = vpack.c.bf16 %v1028_v42, %v1028_v42 }
 0x120   : > { %3501 = vmatmul.msk.bf16.gmra.mxu3 %vm987_vm2, %v1170_v50  ;;  %v1038_v55 = vld [vmem:[#allocation2 + $0xa8] sm:$0xff] }
 0x121   : > { %1003 = vst.msk [vmem:[#allocation2 + $0xb1] sm:$0xff] %vm987_vm2, %v785_v51  ;;  %v1074_v58 = vpack.c.bf16 %v1038_v55, %v1038_v55  ;;  %v1135_v51 = vunpack.c.l.b16 %v1064_v49 }
 0x122   : > { %v640_v53 = vpop.f32.mrf.mxu0 }
 0x123   : > { %v710_v54 = vmul.f32 %v4026_v16, %v640_v53  ;;  %v1145_v1 = vunpack.c.l.b16 %v1074_v58 }
 0x125   : > { %v750_v56 = vadd.f32 %v4033_v17, %v710_v54  ;;  %3447 = vmatmul.msk.bf16.gmra.mxu0 %vm536_vm0, %v3686_v52 }
 0x127   : > { %v786_v57 = vmax.f32 %v750_v56, 0.0 }
 0x128   : > { %v1039_v60 = vld [vmem:[#allocation2 + $0xb0] sm:$0xff] }
 0x129   : > { %1004 = vst.msk [vmem:[#allocation2 + $0xc1] sm:$0xff] %vm987_vm2, %v786_v57  ;;  %v1075_v61 = vpack.c.bf16 %v1039_v60, %v1039_v60 }
 0x12a   : > { %v642_v62 = vpop.f32.mrf.mxu0 }
 0x12b   : > { %v711_v63 = vmul.f32 %v4026_v16, %v642_v62  ;;  %v1146_v2 = vunpack.c.l.b16 %v1075_v61 }
 0x12d   : > { %v751_v3 = vadd.f32 %v4033_v17, %v711_v63  ;;  %v1171_v4 = vpack.c.b16 %v1146_v2, %v1145_v1 }
 0x12f   : > { %v787_v5 = vmax.f32 %v751_v3, 0.0  ;;  %3461 = vmatmul.msk.bf16.gmra.mxu1 %vm987_vm2, %v1171_v4  ;;  %3482 = vmatmul.msk.bf16.gmra.mxu2 %vm987_vm2, %v1171_v4 }
 0x130   : > { %3502 = vmatmul.msk.bf16.gmra.mxu3 %vm987_vm2, %v1171_v4  ;;  %v1040_v9 = vld [vmem:[#allocation2 + $0xc0] sm:$0xff] }
 0x131   : > { %1005 = vst.msk [vmem:[#allocation2 + $0xc9] sm:$0xff] %vm987_vm2, %v787_v5  ;;  %v1076_v12 = vpack.c.bf16 %v1040_v9, %v1040_v9 }
 0x132   : > { %v645_v7 = vpop.f32.mrf.mxu0 }
 0x133   : > { %v712_v8 = vmul.f32 %v4026_v16, %v645_v7  ;;  %v1147_v22 = vunpack.c.l.b16 %v1076_v12 }
 0x135   : > { %v752_v10 = vadd.f32 %v4033_v17, %v712_v8  ;;  %3448 = vmatmul.msk.bf16.gmra.mxu0 %vm536_vm0, %v3687_v6 }
 0x137   : > { %v788_v11 = vmax.f32 %v752_v10, 0.0  ;;  %v1024_v10 = vld [vmem:[#allocation2] sm:$0xff] }
 0x138   : > { %v1041_v13 = vld [vmem:[#allocation2 + $0xc8] sm:$0xff] }
 0x139   : > { %1006 = vst.msk [vmem:[#allocation2 + $0xd9] sm:$0xff] %vm987_vm2, %v788_v11  ;;  %v1077_v15 = vpack.c.bf16 %v1041_v13, %v1041_v13  ;;  %v1025_v11 = vld [vmem:[#allocation2 + $0x8] sm:$0xff] }
 0x13a   : > { %v647_v19 = vpop.f32.mrf.mxu0  ;;  %v1061_v20 = vpack.c.bf16 %v1025_v11, %v1025_v11 }
 0x13b   : > { %v713_v21 = vmul.f32 %v4026_v16, %v647_v19  ;;  %v1148_v23 = vunpack.c.l.b16 %v1077_v15  ;;  %v1060_v19 = vpack.c.bf16 %v1024_v10, %v1024_v10 }
 0x13d   : > { %v753_v25 = vadd.f32 %v4033_v17, %v713_v21  ;;  %v1172_v26 = vpack.c.b16 %v1148_v23, %v1147_v22  ;;  %v1326_v27 = vunpack.c.l.b16 %v1060_v19 }
 0x13f   : > { %v789_v28 = vmax.f32 %v753_v25, 0.0  ;;  %3462 = vmatmul.msk.bf16.gmra.mxu1 %vm987_vm2, %v1172_v26  ;;  %3483 = vmatmul.msk.bf16.gmra.mxu2 %vm987_vm2, %v1172_v26 }
 0x140   : > { %3503 = vmatmul.msk.bf16.gmra.mxu3 %vm987_vm2, %v1172_v26  ;;  %v1042_v34 = vld [vmem:[#allocation2 + $0xd8] sm:$0xff] }
 0x141   : > { %1007 = vst.msk [vmem:[#allocation2 + $0xe1] sm:$0xff] %vm987_vm2, %v789_v28  ;;  %v1078_v37 = vpack.c.bf16 %v1042_v34, %v1042_v34  ;;  %v1327_v28 = vunpack.c.l.b16 %v1061_v20 }
 0x142   : > { %v650_v31 = vpop.f32.mrf.mxu0 }
 0x143   : > { %v714_v32 = vmul.f32 %v4026_v16, %v650_v31  ;;  %v1149_v44 = vunpack.c.l.b16 %v1078_v37  ;;  %v1328_v30 = vpack.c.b16 %v1327_v28, %v1326_v27  ;;  %v3697_v31 = vld [vmem:[%s5068_s4 + $0x38] sm:$0xff] }
 0x144   : > { %2057 = vmatpush.bf16.msrb.mxu3 %v3697_v31 }
 0x145   : > { %v754_v35 = vadd.f32 %v4033_v17, %v714_v32  ;;  %3455 = vmatmul.msk.bf16.vlgmr.msrb.gmra.mxu0 %vm987_vm2, %v4164_v33 }
 0x146   : > { %1451 = vmatpush.bf16.msrb.mxu0 %v4095_v59  ;;  %v1136_v59 = vunpack.c.l.b16 %v1065_v46 }
 0x147   : > { %v790_v36 = vmax.f32 %v754_v35, 0.0 }
 0x148   : > { %v1043_v38 = vld [vmem:[#allocation2 + $0xe0] sm:$0xff]  ;;  %v4178_v54 = vpack.c.b16 %v1136_v59, %v1135_v51 }
 0x149   : > { %1008 = vst.msk [vmem:[#allocation2 + $0xf1] sm:$0xff] %vm987_vm2, %v790_v36  ;;  %v1079_v40 = vpack.c.bf16 %v1043_v38, %v1043_v38 }
 0x14a   : > { %v652_v41 = vpop.f32.mrf.mxu0 }
 0x14b   : > { %v715_v43 = vmul.f32 %v4026_v16, %v652_v41  ;;  %v1150_v45 = vunpack.c.l.b16 %v1079_v40 }
 0x14d   : > { %v755_v47 = vadd.f32 %v4033_v17, %v715_v43  ;;  %v1173_v48 = vpack.c.b16 %v1150_v45, %v1149_v44 }
 0x14f   : > { %v791_v50 = vmax.f32 %v755_v47, 0.0  ;;  %3463 = vmatmul.msk.bf16.gmra.mxu1 %vm987_vm2, %v1173_v48  ;;  %3484 = vmatmul.msk.bf16.gmra.mxu2 %vm987_vm2, %v1173_v48 }
 0x150   : > { %3504 = vmatmul.msk.bf16.gmra.mxu3 %vm987_vm2, %v1173_v48  ;;  %v1044_v55 = vld [vmem:[#allocation2 + $0xf0] sm:$0xff] }
 0x151   : > { %1009 = vst.msk [vmem:[#allocation2 + $0xf9] sm:$0xff] %vm987_vm2, %v791_v50  ;;  %v1080_v58 = vpack.c.bf16 %v1044_v55, %v1044_v55 }
 0x152   : > { %v655_v52 = vpop.f32.mrf.mxu0 }
 0x153   : > { %v716_v53 = vmul.f32 %v4026_v16, %v655_v52  ;;  %v1151_v1 = vunpack.c.l.b16 %v1080_v58 }
 0x155   : > { %v756_v56 = vadd.f32 %v4033_v17, %v716_v53  ;;  %3456 = vmatmul.msk.bf16.gmra.mxu0 %vm987_vm2, %v4178_v54 }
 0x157   : > { %v792_v57 = vmax.f32 %v756_v56, 0.0 }
 0x158   : > { %v1045_v60 = vld [vmem:[#allocation2 + $0xf8] sm:$0xff] }
 0x159   : > { %1010 = vst.msk [vmem:[#allocation2 + $0x109] sm:$0xff] %vm987_vm2, %v792_v57  ;;  %v1081_v61 = vpack.c.bf16 %v1045_v60, %v1045_v60 }
 0x15a   : > { %v657_v62 = vpop.f32.mrf.mxu0 }
 0x15b   : > { %v717_v63 = vmul.f32 %v4026_v16, %v657_v62  ;;  %v1152_v2 = vunpack.c.l.b16 %v1081_v61 }
 0x15d   : > { %v757_v3 = vadd.f32 %v4033_v17, %v717_v63  ;;  %v1174_v4 = vpack.c.b16 %v1152_v2, %v1151_v1 }
 0x15f   : > { %v793_v5 = vmax.f32 %v757_v3, 0.0  ;;  %3464 = vmatmul.msk.bf16.gmra.mxu1 %vm987_vm2, %v1174_v4  ;;  %3485 = vmatmul.msk.bf16.gmra.mxu2 %vm987_vm2, %v1174_v4 }
 0x160   : > { %3505 = vmatmul.msk.bf16.gmra.mxu3 %vm987_vm2, %v1174_v4  ;;  %v1046_v8 = vld [vmem:[#allocation2 + $0x108] sm:$0xff] }
 0x161   : > { %1011 = vst.msk [vmem:[#allocation2 + $0x111] sm:$0xff] %vm987_vm2, %v793_v5  ;;  %v1082_v13 = vpack.c.bf16 %v1046_v8, %v1046_v8 }
 0x162   : > { %v660_v6 = vpop.f32.mrf.mxu0 }
 0x163   : > { %v718_v7 = vmul.f32 %v4026_v16, %v660_v6  ;;  %v1153_v23 = vunpack.c.l.b16 %v1082_v13 }
 0x165   : > { %v758_v9 = vadd.f32 %v4033_v17, %v718_v7  ;;  %3457 = vmatmul.msk.bf16.gmra.mxu0 %vm987_vm2, %v4100_v0 }
 0x167   : > { %v794_v12 = vmax.f32 %v758_v9, 0.0 }
 0x168   : > { %v1047_v14 = vld [vmem:[#allocation2 + $0x110] sm:$0xff] }
 0x169   : > { %1012 = vst.msk [vmem:[#allocation2 + $0x121] sm:$0xff] %vm987_vm2, %v794_v12  ;;  %v1083_v15 = vpack.c.bf16 %v1047_v14, %v1047_v14 }
 0x16a   : > { %v662_v21 = vpop.f32.mrf.mxu0 }
 0x16b   : > { %v719_v22 = vmul.f32 %v4026_v16, %v662_v21  ;;  %v1154_v24 = vunpack.c.l.b16 %v1083_v15 }
 0x16d   : > { %v759_v25 = vadd.f32 %v4033_v17, %v719_v22  ;;  %v1175_v26 = vpack.c.b16 %v1154_v24, %v1153_v23 }
 0x16f   : > { %v795_v29 = vmax.f32 %v759_v25, 0.0  ;;  %3465 = vmatmul.msk.bf16.gmra.mxu1 %vm987_vm2, %v1175_v26  ;;  %3486 = vmatmul.msk.bf16.gmra.mxu2 %vm987_vm2, %v1175_v26 }
 0x170   : > { %3506 = vmatmul.msk.bf16.gmra.mxu3 %vm987_vm2, %v1175_v26  ;;  %v1048_v36 = vld [vmem:[#allocation2 + $0x120] sm:$0xff] }
 0x171   : > { %1013 = vst.msk [vmem:[#allocation2 + $0x129] sm:$0xff] %vm987_vm2, %v795_v29  ;;  %v1084_v39 = vpack.c.bf16 %v1048_v36, %v1048_v36 }
 0x172   : > { %v665_v32 = vpop.f32.mrf.mxu0  ;;  %v1362_v34 = vpop.f32.mrf.mxu2 }
 0x173   : > { %v720_v35 = vmul.f32 %v4026_v16, %v665_v32  ;;  %v1155_v45 = vunpack.c.l.b16 %v1084_v39 }
 0x175   : > { %v760_v37 = vadd.f32 %v4033_v17, %v720_v35  ;;  %3475 = vmatmul.msk.bf16.vlgmr.msra.gmra.mxu0 %vm987_vm2, %v1328_v30 }
 0x177   : > { %v796_v38 = vmax.f32 %v760_v37, 0.0 }
 0x178   : > { %v1049_v40 = vld [vmem:[#allocation2 + $0x128] sm:$0xff] }
 0x179   : > { %1014 = vst.msk [vmem:[#allocation2 + $0x139] sm:$0xff] %vm987_vm2, %v796_v38  ;;  %v1085_v41 = vpack.c.bf16 %v1049_v40, %v1049_v40 }
 0x17a   : > { %v667_v42 = vpop.f32.mrf.mxu0  ;;  %v1364_v43 = vpop.f32.mrf.mxu2 }
 0x17b   : > { %v721_v44 = vmul.f32 %v4026_v16, %v667_v42  ;;  %v1156_v46 = vunpack.c.l.b16 %v1085_v41 }
 0x17c   : > { %v1259_v47 = vpop.f32.mrf.mxu1 }
 0x17d   : > { %v761_v48 = vadd.f32 %v4033_v17, %v721_v44  ;;  %v1363_v49 = vadd.f32 %v1362_v34, %v1259_v47  ;;  %v1176_v50 = vpack.c.b16 %v1156_v46, %v1155_v45 }
 0x17f   : > { %v797_v59 = vmax.f32 %v761_v48, 0.0  ;;  %3466 = vmatmul.msk.bf16.gmra.mxu1 %vm987_vm2, %v1176_v50  ;;  %3487 = vmatmul.msk.bf16.gmra.mxu2 %vm987_vm2, %v1176_v50 }
 0x180   : > { %3507 = vmatmul.msk.bf16.gmra.mxu3 %vm987_vm2, %v1176_v50  ;;  %v1050_v56 = vld [vmem:[#allocation2 + $0x138] sm:$0xff] }
 0x181   : > { %1015 = vst.msk [vmem:[#allocation2 + $0x141] sm:$0xff] %vm987_vm2, %v797_v59  ;;  %v1086_v61 = vpack.c.bf16 %v1050_v56, %v1050_v56 }
 0x182   : > { %v670_v51 = vpop.f32.mrf.mxu0  ;;  %v1367_v52 = vpop.f32.mrf.mxu2 }
 0x183   : > { %v722_v53 = vmul.f32 %v4026_v16, %v670_v51  ;;  %v1157_v4 = vunpack.c.l.b16 %v1086_v61 }
 0x184   : > { %v1261_v55 = vpop.f32.mrf.mxu1 }
 0x185   : > { %v762_v57 = vadd.f32 %v4033_v17, %v722_v53  ;;  %v1365_v58 = vadd.f32 %v1364_v43, %v1261_v55  ;;  %3476 = vmatmul.msk.bf16.gmra.mxu0 %vm987_vm2, %v4164_v33 }
 0x187   : > { %v798_v60 = vmax.f32 %v762_v57, 0.0 }
 0x188   : > { %v1051_v62 = vld [vmem:[#allocation2 + $0x140] sm:$0xff] }
 0x189   : > { %1016 = vst.msk [vmem:[#allocation2 + $0x151] sm:$0xff] %vm987_vm2, %v798_v60  ;;  %v1087_v63 = vpack.c.bf16 %v1051_v62, %v1051_v62 }
 0x18a   : > { %v672_v1 = vpop.f32.mrf.mxu0  ;;  %v1369_v2 = vpop.f32.mrf.mxu2 }
 0x18b   : > { %v723_v3 = vmul.f32 %v4026_v16, %v672_v1  ;;  %v1158_v5 = vunpack.c.l.b16 %v1087_v63 }
 0x18c   : > { %v1264_v6 = vpop.f32.mrf.mxu1 }
 0x18d   : > { %v763_v7 = vadd.f32 %v4033_v17, %v723_v3  ;;  %v1368_v8 = vadd.f32 %v1367_v52, %v1264_v6  ;;  %v1177_v9 = vpack.c.b16 %v1158_v5, %v1157_v4  ;;  %v1568_v4 = vld [vmem:[#allocation2 + $0x21] sm:$0xff] }
 0x18f   : > { %v799_v10 = vmax.f32 %v763_v7, 0.0  ;;  %3467 = vmatmul.msk.bf16.gmra.mxu1 %vm987_vm2, %v1177_v9  ;;  %3488 = vmatmul.msk.bf16.gmra.mxu2 %vm987_vm2, %v1177_v9 }
 0x190   : > { %3508 = vmatmul.msk.bf16.gmra.mxu3 %vm987_vm2, %v1177_v9  ;;  %v1052_v19 = vld [vmem:[#allocation2 + $0x150] sm:$0xff]  ;;  %v1567_v9 = vld [vmem:[#allocation2 + $0x19] sm:$0xff] }
 0x191   : > { %1017 = vst.msk [vmem:[#allocation2 + $0x159] sm:$0xff] %vm987_vm2, %v799_v10  ;;  %v1088_v23 = vpack.c.bf16 %v1052_v19, %v1052_v19 }
 0x192   : > { %v675_v33 = vpop.f32.mrf.mxu0  ;;  %v1372_v11 = vpop.f32.mrf.mxu2 }
 0x193   : > { %v724_v12 = vmul.f32 %v4026_v16, %v675_v33  ;;  %v1468_v13 = vpop.f32.mrf.mxu3  ;;  %v1159_v30 = vunpack.c.l.b16 %v1088_v23  ;;  %v1604_v33 = vpack.c.bf16 %v1568_v4, %v1568_v4 }
 0x194   : > { %v4226_v14 = vadd.f32 %v1468_v13, %v1363_v49  ;;  %v1266_v15 = vpop.f32.mrf.mxu1 }
 0x195   : > { %v764_v20 = vadd.f32 %v4033_v17, %v724_v12  ;;  %v1370_v21 = vadd.f32 %v1369_v2, %v1266_v15  ;;  %3477 = vmatmul.msk.bf16.gmra.mxu0 %vm987_vm2, %v4178_v54  ;;  %v1603_v12 = vpack.c.bf16 %v1567_v9, %v1567_v9  ;;  %v1675_v19 = vunpack.c.l.b16 %v1604_v33 }
 0x197   : > { %v800_v22 = vmax.f32 %v764_v20, 0.0 }
 0x198   : > { %v1053_v24 = vld [vmem:[#allocation2 + $0x158] sm:$0xff] }
 0x199   : > { %1018 = vst.msk [vmem:[#allocation2 + $0x169] sm:$0xff] %vm987_vm2, %v800_v22  ;;  %v1089_v25 = vpack.c.bf16 %v1053_v24, %v1053_v24 }
 0x19a   : > { %v677_v26 = vpop.f32.mrf.mxu0  ;;  %v1374_v27 = vpop.f32.mrf.mxu2 }
 0x19b   : > { %v725_v28 = vmul.f32 %v4026_v16, %v677_v26  ;;  %v1470_v29 = vpop.f32.mrf.mxu3  ;;  %v1160_v31 = vunpack.c.l.b16 %v1089_v25  ;;  %v1674_v25 = vunpack.c.l.b16 %v1603_v12 }
 0x19c   : > { %v4233_v32 = vadd.f32 %v1470_v29, %v1365_v58  ;;  %v1269_v34 = vpop.f32.mrf.mxu1 }
 0x19d   : > { %v765_v35 = vadd.f32 %v4033_v17, %v725_v28  ;;  %v1373_v36 = vadd.f32 %v1372_v11, %v1269_v34  ;;  %v1178_v37 = vpack.c.b16 %v1160_v31, %v1159_v30  ;;  %v4270_v30 = vpack.c.b16 %v1675_v19, %v1674_v25  ;;  %v1566_v31 = vld [vmem:[#allocation2 + $0x9] sm:$0xff]  ;;  %v1058_v34 = vld [vmem:[#allocation2 + $0x198] sm:$0xff] }
 0x19f   : > { %v801_v38 = vmax.f32 %v765_v35, 0.0  ;;  %3468 = vmatmul.msk.bf16.gmra.mxu1 %vm987_vm2, %v1178_v37  ;;  %3489 = vmatmul.msk.bf16.gmra.mxu2 %vm987_vm2, %v1178_v37  ;;  %v1059_v35 = vld [vmem:[#allocation2 + $0x1a0] sm:$0xff] }
 0x1a0   : > { %3509 = vmatmul.msk.bf16.gmra.mxu3 %vm987_vm2, %v1178_v37  ;;  %v1054_v45 = vld [vmem:[#allocation2 + $0x168] sm:$0xff] }
 0x1a1   : > { %1019 = vst.msk [vmem:[#allocation2 + $0x171] sm:$0xff] %vm987_vm2, %v801_v38  ;;  %v1090_v49 = vpack.c.bf16 %v1054_v45, %v1054_v45  ;;  %v1570_v38 = vld [vmem:[#allocation2 + $0x39] sm:$0xff]  ;;  %v1094_v45 = vpack.c.bf16 %v1058_v34, %v1058_v34 }
 0x1a2   : > { %v680_v39 = vpop.f32.mrf.mxu0  ;;  %v1377_v40 = vpop.f32.mrf.mxu2 }
 0x1a3   : > { %v726_v41 = vmul.f32 %v4026_v16, %v680_v39  ;;  %v1473_v42 = vpop.f32.mrf.mxu3  ;;  %v1161_v56 = vunpack.c.l.b16 %v1090_v49  ;;  %v1606_v49 = vpack.c.bf16 %v1570_v38, %v1570_v38 }
 0x1a4   : > { %v4241_v43 = vadd.f32 %v1473_v42, %v1368_v8  ;;  %v1271_v44 = vpop.f32.mrf.mxu1 }
 0x1a5   : > { %v766_v46 = vadd.f32 %v4033_v17, %v726_v41  ;;  %v1375_v47 = vadd.f32 %v1374_v27, %v1271_v44  ;;  %3497 = vmatmul.msk.bf16.vlgmr.msrb.gmra.mxu0 %vm987_vm2, %v4178_v54  ;;  %v3700_v54 = vld [vmem:[%s5068_s4 + $0x40] sm:$0xff]  ;;  %v1602_v41 = vpack.c.bf16 %v1566_v31, %v1566_v31 }
 0x1a6   : > { %2663 = vmatpush.bf16.msra.mxu2 %v3700_v54 }
 0x1a7   : > { %v802_v48 = vmax.f32 %v766_v46, 0.0  ;;  %v1095_v46 = vpack.c.bf16 %v1059_v35, %v1059_v35 }
 0x1a8   : > { %v1055_v50 = vld [vmem:[#allocation2 + $0x170] sm:$0xff] }
 0x1a9   : > { %1020 = vst.msk [vmem:[#allocation2 + $0x181] sm:$0xff] %vm987_vm2, %v802_v48  ;;  %v1091_v59 = vpack.c.bf16 %v1055_v50, %v1055_v50  ;;  %v2171_v50 = vld [vmem:[#allocation2 + $0x2] sm:$0xff] }
 0x1aa   : > { %v682_v51 = vpop.f32.mrf.mxu0  ;;  %v1379_v52 = vpop.f32.mrf.mxu2 }
 0x1ab   : > { %v727_v53 = vmul.f32 %v4026_v16, %v682_v51  ;;  %v1475_v55 = vpop.f32.mrf.mxu3  ;;  %v1162_v57 = vunpack.c.l.b16 %v1091_v59  ;;  %v3699_v16 = vld [vmem:[%s5068_s4 + $0x28] sm:$0xff] }
 0x1ac   : > { %v4248_v58 = vadd.f32 %v1475_v55, %v1370_v21  ;;  %v1274_v60 = vpop.f32.mrf.mxu1  ;;  %2525 = vmatpush.bf16.msra.mxu1 %v3699_v16  ;;  %v2172_v59 = vld [vmem:[#allocation2 + $0xa] sm:$0xff]  ;;  %v1432_v55 = vunpack.c.l.b16 %v1094_v45 }
 0x1ad   : > { %v767_v61 = vadd.f32 %v4033_v17, %v727_v53  ;;  %v1378_v62 = vadd.f32 %v1377_v40, %v1274_v60  ;;  %v1179_v63 = vpack.c.b16 %v1162_v57, %v1161_v56  ;;  %v3698_v17 = vld [vmem:[%s5068_s4 + $0x10] sm:$0xff]  ;;  %v1433_v56 = vunpack.c.l.b16 %v1095_v46 }
 0x1ae   : > { %2387 = vmatpush.bf16.msra.mxu0 %v3698_v17  ;;  %v1677_v57 = vunpack.c.l.b16 %v1606_v49  ;;  %v2207_v60 = vpack.c.bf16 %v2171_v50, %v2171_v50  ;;  %v2208_v54 = vpack.c.bf16 %v2172_v59, %v2172_v59  ;;  %v1574_v45 = vld [vmem:[#allocation2 + $0x69] sm:$0xff]  ;;  %v1573_v50 = vld [vmem:[#allocation2 + $0x61] sm:$0xff] }
 0x1af   : > { %v803_v1 = vmax.f32 %v767_v61, 0.0  ;;  %3469 = vmatmul.msk.bf16.gmra.mxu1 %vm987_vm2, %v1179_v63  ;;  %3490 = vmatmul.msk.bf16.gmra.mxu2 %vm987_vm2, %v1179_v63 }
 0x1b0   : > { %3510 = vmatmul.msk.bf16.gmra.mxu3 %vm987_vm2, %v1179_v63  ;;  %v1056_v8 = vld [vmem:[#allocation2 + $0x180] sm:$0xff] }
 0x1b1   : > { %1021 = vst.msk [vmem:[#allocation2 + $0x189] sm:$0xff] %vm987_vm2, %v803_v1  ;;  %v1092_v11 = vpack.c.bf16 %v1056_v8, %v1056_v8 }
 0x1b2   : > { %v685_v2 = vpop.f32.mrf.mxu0  ;;  %v1382_v3 = vpop.f32.mrf.mxu2 }
 0x1b3   : > { %v1478_v5 = vpop.f32.mrf.mxu3  ;;  %v1163_v23 = vunpack.c.l.b16 %v1092_v11  ;;  %v1434_v2 = vpack.c.b16 %v1433_v56, %v1432_v55  ;;  %v1572_v11 = vld [vmem:[#allocation2 + $0x51] sm:$0xff] }
 0x1b4   : > { %v4264_v6 = vadd.f32 %v1478_v5, %v1373_v36  ;;  %v1276_v7 = vpop.f32.mrf.mxu1  ;;  %v2278_v5 = vunpack.c.l.b16 %v2207_v60 }
 0x1b5   : > { %v1380_v10 = vadd.f32 %v1379_v52, %v1276_v7  ;;  %3498 = vmatmul.msk.bf16.gmra.mxu0 %vm987_vm2, %v4100_v0  ;;  %v1565_v0 = vld [vmem:[#allocation2 + $0x1] sm:$0xff]  ;;  %v1673_v52 = vunpack.c.l.b16 %v1602_v41  ;;  %v2279_v7 = vunpack.c.l.b16 %v2208_v54 }
 0x1b6   : > { %v1601_v40 = vpack.c.bf16 %v1565_v0, %v1565_v0 }
 0x1b7   : > { %v2310_v8 = vpack.c.b16 %v2279_v7, %v2278_v5 }
 0x1b8   : > { %v1057_v13 = vld [vmem:[#allocation2 + $0x188] sm:$0xff]  ;;  %v1672_v51 = vunpack.c.l.b16 %v1601_v40 }
 0x1b9   : > { %v1093_v15 = vpack.c.bf16 %v1057_v13, %v1057_v13 }
 0x1ba   : > { %v687_v20 = vpop.f32.mrf.mxu0  ;;  %v1384_v21 = vpop.f32.mrf.mxu2  ;;  %v1704_v1 = vpack.c.b16 %v1673_v52, %v1672_v51  ;;  %v1609_v51 = vpack.c.bf16 %v1573_v50, %v1573_v50  ;;  %v2175_v52 = vld [vmem:[#allocation2 + $0x32] sm:$0xff] }
 0x1bb   : > { %v1480_v22 = vpop.f32.mrf.mxu3  ;;  %v1164_v24 = vunpack.c.l.b16 %v1093_v15  ;;  %v1571_v15 = vld [vmem:[#allocation2 + $0x49] sm:$0xff]  ;;  %v1608_v20 = vpack.c.bf16 %v1572_v11, %v1572_v11 }
 0x1bc   : > { %v4268_v26 = vadd.f32 %v1480_v22, %v1375_v47  ;;  %v1279_v27 = vpop.f32.mrf.mxu1  ;;  %v1569_v47 = vld [vmem:[#allocation2 + $0x31] sm:$0xff]  ;;  %v2173_v22 = vld [vmem:[#allocation2 + $0x1a] sm:$0xff]  ;;  %v1680_v54 = vunpack.c.l.b16 %v1609_v51 }
 0x1bd   : > { %v1383_v28 = vadd.f32 %v1382_v3, %v1279_v27  ;;  %v1180_v29 = vpack.c.b16 %v1164_v24, %v1163_v23  ;;  %v1605_v53 = vpack.c.bf16 %v1569_v47, %v1569_v47  ;;  %v2174_v23 = vld [vmem:[#allocation2 + $0x22] sm:$0xff]  ;;  %v1679_v24 = vunpack.c.l.b16 %v1608_v20 }
 0x1be   : > { %v2209_v31 = vpack.c.bf16 %v2173_v22, %v2173_v22  ;;  %v2210_v34 = vpack.c.bf16 %v2174_v23, %v2174_v23  ;;  %v2177_v23 = vld [vmem:[#allocation2 + $0x4a] sm:$0xff] }
 0x1bf   : > { %3470 = vmatmul.msk.bf16.gmra.mxu1 %vm987_vm2, %v1180_v29  ;;  %3541 = vmatmul.msk.bf16.vlgmr.msrb.gmra.mxu2 %vm987_vm2, %v4270_v30  ;;  %v1676_v16 = vunpack.c.l.b16 %v1605_v53  ;;  %v2176_v53 = vld [vmem:[#allocation2 + $0x3a] sm:$0xff] }
 0x1c0   : > { %3511 = vmatmul.msk.bf16.gmra.mxu3 %vm987_vm2, %v1180_v29  ;;  %v2281_v40 = vunpack.c.l.b16 %v2210_v34 }
 0x1c1   : > { %v1706_v4 = vpack.c.b16 %v1677_v57, %v1676_v16 }
 0x1c2   : > { %v4276_v36 = vpop.f32.mrf.mxu0  ;;  %v1387_v37 = vpop.f32.mrf.mxu2 }
 0x1c3   : > { %v1483_v39 = vpop.f32.mrf.mxu3 }
 0x1c4   : > { %v4278_v42 = vadd.f32 %v1483_v39, %v1378_v62  ;;  %v1281_v44 = vpop.f32.mrf.mxu1  ;;  %v2280_v39 = vunpack.c.l.b16 %v2209_v31 }
 0x1c5   : > { %v1385_v48 = vadd.f32 %v1384_v21, %v1281_v44  ;;  %3499 = vmatmul.msk.bf16.gmra.mxu0 %vm987_vm2, %v4112_v18  ;;  %v1607_v21 = vpack.c.bf16 %v1571_v15, %v1571_v15 }
 0x1c6   : > { %v4307_v47 = vpack.c.b16 %v2281_v40, %v2280_v39 }
 0x1c7   : > { %v1678_v0 = vunpack.c.l.b16 %v1607_v21 }
 0x1c9   : > { %v4298_v38 = vpack.c.b16 %v1679_v24, %v1678_v0  ;;  %v2178_v24 = vld [vmem:[#allocation2 + $0x52] sm:$0xff] }
 0x1ca   : > { %v4282_v61 = vpop.f32.mrf.mxu0  ;;  %v1389_v62 = vpop.f32.mrf.mxu2 }
 0x1cb   : > { %v1485_v63 = vpop.f32.mrf.mxu3 }
 0x1cc   : > { %v4284_v17 = vadd.f32 %v1485_v63, %v1380_v10  ;;  %v1284_v18 = vpop.f32.mrf.mxu1  ;;  %v2212_v63 = vpack.c.bf16 %v2176_v53, %v2176_v53 }
 0x1cd   : > { %v1388_v3 = vadd.f32 %v1387_v37, %v1284_v18 }
 0x1ce   : > { %v2283_v5 = vunpack.c.l.b16 %v2212_v63  ;;  %v2180_v63 = vld [vmem:[#allocation2 + $0x6a] sm:$0xff] }
 0x1cf   : > { %3519 = vmatmul.msk.bf16.vlgmr.msrb.gmra.mxu1 %vm987_vm2, %v1704_v1  ;;  %3542 = vmatmul.msk.bf16.gmra.mxu2 %vm987_vm2, %v1706_v4 }
 0x1d0   : > { %3512 = vmatmul.msk.bf16.gmra.mxu3 %vm987_vm2, %v1434_v2 }
 0x1d2   : > { %v4289_v9 = vpop.f32.mrf.mxu0  ;;  %v1392_v33 = vpop.f32.mrf.mxu2 }
 0x1d3   : > { %v1488_v12 = vpop.f32.mrf.mxu3 }
 0x1d4   : > { %v4291_v10 = vadd.f32 %v1488_v12, %v1383_v28  ;;  %v1286_v13 = vpop.f32.mrf.mxu1 }
 0x1d5   : > { %v1390_v19 = vadd.f32 %v1389_v62, %v1286_v13  ;;  %3585 = vmatmul.msk.bf16.vlgmr.msra.gmra.mxu0 %vm987_vm2, %v2310_v8  ;;  %v2211_v62 = vpack.c.bf16 %v2175_v52, %v2175_v52 }
 0x1da   : > { %v4294_v25 = vpop.f32.mrf.mxu0  ;;  %v1394_v27 = vpop.f32.mrf.mxu2 }
 0x1db   : > { %v1490_v29 = vpop.f32.mrf.mxu3 }
 0x1dc   : > { %v4296_v35 = vadd.f32 %v1490_v29, %v1385_v48  ;;  %v1289_v28 = vpop.f32.mrf.mxu1 }
 0x1dd   : > { %v1393_v37 = vadd.f32 %v1392_v33, %v1289_v28  ;;  %v1576_v33 = vld [vmem:[#allocation2 + $0x81] sm:$0xff]  ;;  %v2213_v28 = vpack.c.bf16 %v2177_v23, %v2177_v23 }
 0x1de   : > { %v1612_v21 = vpack.c.bf16 %v1576_v33, %v1576_v33  ;;  %v2216_v33 = vpack.c.bf16 %v2180_v63, %v2180_v63 }
 0x1df   : > { %3520 = vmatmul.msk.bf16.gmra.mxu1 %vm987_vm2, %v4270_v30  ;;  %3543 = vmatmul.msk.bf16.gmra.mxu2 %vm987_vm2, %v4298_v38  ;;  %v1610_v30 = vpack.c.bf16 %v1574_v45, %v1574_v45 }
 0x1e0   : > { %3563 = vmatmul.msk.bf16.vlgmr.msrb.gmra.mxu3 %vm987_vm2, %v1706_v4  ;;  %v2287_v23 = vunpack.c.l.b16 %v2216_v33 }
 0x1e1   : > { %v1681_v55 = vunpack.c.l.b16 %v1610_v30  ;;  %v1578_v30 = vld [vmem:[#allocation2 + $0x99] sm:$0xff] }
 0x1e2   : > { %v4305_v41 = vpop.f32.mrf.mxu0  ;;  %v1397_v44 = vpop.f32.mrf.mxu2 }
 0x1e3   : > { %v1493_v46 = vpop.f32.mrf.mxu3  ;;  %v4317_v2 = vpack.c.b16 %v1681_v55, %v1680_v54  ;;  %v1577_v55 = vld [vmem:[#allocation2 + $0x91] sm:$0xff] }
 0x1e4   : > { %v4309_v48 = vadd.f32 %v1493_v46, %v1388_v3  ;;  %v1291_v49 = vpop.f32.mrf.mxu1  ;;  %v2282_v3 = vunpack.c.l.b16 %v2211_v62  ;;  %v2284_v46 = vunpack.c.l.b16 %v2213_v28  ;;  %v1613_v54 = vpack.c.bf16 %v1577_v55, %v1577_v55  ;;  %v2179_v62 = vld [vmem:[#allocation2 + $0x62] sm:$0xff] }
 0x1e5   : > { %v1395_v59 = vadd.f32 %v1394_v27, %v1291_v49  ;;  %3586 = vmatmul.msk.bf16.gmra.mxu0 %vm987_vm2, %v4307_v47  ;;  %v1683_v27 = vunpack.c.l.b16 %v1612_v21 }
 0x1e6   : > { %v4327_v13 = vpack.c.b16 %v2283_v5, %v2282_v3 }
 0x1ea   : > { %v4313_v56 = vpop.f32.mrf.mxu0  ;;  %v1399_v57 = vpop.f32.mrf.mxu2 }
 0x1eb   : > { %v1495_v60 = vpop.f32.mrf.mxu3 }
 0x1ec   : > { %v4315_v1 = vadd.f32 %v1495_v60, %v1390_v19  ;;  %v1294_v16 = vpop.f32.mrf.mxu1  ;;  %v1575_v19 = vld [vmem:[#allocation2 + $0x79] sm:$0xff]  ;;  %v1614_v60 = vpack.c.bf16 %v1578_v30, %v1578_v30 }
 0x1ed   : > { %v1398_v18 = vadd.f32 %v1397_v44, %v1294_v16  ;;  %v1611_v22 = vpack.c.bf16 %v1575_v19, %v1575_v19 }
 0x1ee   : > { %v1685_v16 = vunpack.c.l.b16 %v1614_v60 }
 0x1ef   : > { %3521 = vmatmul.msk.bf16.gmra.mxu1 %vm987_vm2, %v1706_v4  ;;  %3544 = vmatmul.msk.bf16.gmra.mxu2 %vm987_vm2, %v4317_v2  ;;  %v1682_v34 = vunpack.c.l.b16 %v1611_v22 }
 0x1f0   : > { %3564 = vmatmul.msk.bf16.gmra.mxu3 %vm987_vm2, %v4298_v38 }
 0x1f1   : > { %v4338_v45 = vpack.c.b16 %v1683_v27, %v1682_v34  ;;  %v1580_v27 = vld [vmem:[#allocation2 + $0xb1] sm:$0xff]  ;;  %v1579_v34 = vld [vmem:[#allocation2 + $0xa9] sm:$0xff] }
 0x1f2   : > { %v1347_v7 = vpop.f32.mrf.mxu0  ;;  %v1402_v8 = vpop.f32.mrf.mxu2 }
 0x1f3   : > { %v4325_v11 = vadd.f32 %v1347_v7, %v4276_v36  ;;  %v1498_v12 = vpop.f32.mrf.mxu3 }
 0x1f4   : > { %v4329_v15 = vadd.f32 %v1498_v12, %v1393_v37  ;;  %v1296_v4 = vpop.f32.mrf.mxu1  ;;  %v2214_v37 = vpack.c.bf16 %v2178_v24, %v2178_v24 }
 0x1f5   : > { %v1400_v20 = vadd.f32 %v1399_v57, %v1296_v4  ;;  %3587 = vmatmul.msk.bf16.gmra.mxu0 %vm987_vm2, %v4327_v13 }
 0x1f6   : > { %v2285_v49 = vunpack.c.l.b16 %v2214_v37  ;;  %v1616_v37 = vpack.c.bf16 %v1580_v27, %v1580_v27  ;;  %v2184_v27 = vld [vmem:[#allocation2 + $0x9a] sm:$0xff] }
 0x1f8   : > { %v4349_v52 = vpack.c.b16 %v2285_v49, %v2284_v46  ;;  %v2181_v46 = vld [vmem:[#allocation2 + $0x7a] sm:$0xff]  ;;  %v2182_v49 = vld [vmem:[#allocation2 + $0x82] sm:$0xff] }
 0x1f9   : > { %v2218_v55 = vpack.c.bf16 %v2182_v49, %v2182_v49 }
 0x1fa   : > { %v1349_v29 = vpop.f32.mrf.mxu0  ;;  %v1404_v0 = vpop.f32.mrf.mxu2 }
 0x1fb   : > { %v4334_v36 = vadd.f32 %v1349_v29, %v4282_v61  ;;  %v1500_v31 = vpop.f32.mrf.mxu3 }
 0x1fc   : > { %v4336_v39 = vadd.f32 %v1500_v31, %v1395_v59  ;;  %v1299_v40 = vpop.f32.mrf.mxu1 }
 0x1fd   : > { %v1403_v44 = vadd.f32 %v1402_v8, %v1299_v40  ;;  %v1684_v8 = vunpack.c.l.b16 %v1613_v54  ;;  %v1615_v40 = vpack.c.bf16 %v1579_v34, %v1579_v34 }
 0x1ff   : > { %3522 = vmatmul.msk.bf16.gmra.mxu1 %vm987_vm2, %v4298_v38  ;;  %3545 = vmatmul.msk.bf16.gmra.mxu2 %vm987_vm2, %v4338_v45  ;;  %v4360_v21 = vpack.c.b16 %v1685_v16, %v1684_v8 }
 0x200   : > { %3565 = vmatmul.msk.bf16.gmra.mxu3 %vm987_vm2, %v4317_v2 }
 0x202   : > { %v1352_v61 = vpop.f32.mrf.mxu0  ;;  %v1407_v50 = vpop.f32.mrf.mxu2 }
 0x203   : > { %v4347_v59 = vadd.f32 %v1352_v61, %v4289_v9  ;;  %v1503_v51 = vpop.f32.mrf.mxu3  ;;  %v1687_v61 = vunpack.c.l.b16 %v1616_v37 }
 0x204   : > { %v4351_v53 = vadd.f32 %v1503_v51, %v1398_v18  ;;  %v1301_v38 = vpop.f32.mrf.mxu1  ;;  %v2215_v18 = vpack.c.bf16 %v2179_v62, %v2179_v62 }
 0x205   : > { %v1405_v57 = vadd.f32 %v1404_v0, %v1301_v38  ;;  %3588 = vmatmul.msk.bf16.gmra.mxu0 %vm987_vm2, %v4349_v52  ;;  %v1686_v38 = vunpack.c.l.b16 %v1615_v40 }
 0x206   : > { %v2286_v22 = vunpack.c.l.b16 %v2215_v18 }
 0x207   : > { %v4382_v63 = vpack.c.b16 %v1687_v61, %v1686_v38 }
 0x208   : > { %v4371_v0 = vpack.c.b16 %v2287_v23, %v2286_v22 }
 0x20a   : > { %v1354_v3 = vpop.f32.mrf.mxu0  ;;  %v1409_v5 = vpop.f32.mrf.mxu2 }
 0x20b   : > { %v4356_v9 = vadd.f32 %v1354_v3, %v4294_v25  ;;  %v1505_v7 = vpop.f32.mrf.mxu3  ;;  %v2289_v3 = vunpack.c.l.b16 %v2218_v55  ;;  %v1584_v55 = vld [vmem:[#allocation2 + $0xe1] sm:$0xff] }
 0x20c   : > { %v4358_v12 = vadd.f32 %v1505_v7, %v1400_v20  ;;  %v1304_v4 = vpop.f32.mrf.mxu1  ;;  %v1582_v7 = vld [vmem:[#allocation2 + $0xc9] sm:$0xff] }
 0x20d   : > { %v1408_v19 = vadd.f32 %v1407_v50, %v1304_v4  ;;  %v1581_v4 = vld [vmem:[#allocation2 + $0xc1] sm:$0xff]  ;;  %v1618_v23 = vpack.c.bf16 %v1582_v7, %v1582_v7  ;;  %v1620_v7 = vpack.c.bf16 %v1584_v55, %v1584_v55 }
 0x20f   : > { %3523 = vmatmul.msk.bf16.gmra.mxu1 %vm987_vm2, %v4317_v2  ;;  %3546 = vmatmul.msk.bf16.gmra.mxu2 %vm987_vm2, %v4360_v21 }
 0x210   : > { %3566 = vmatmul.msk.bf16.gmra.mxu3 %vm987_vm2, %v4338_v45 }
 0x212   : > { %v1357_v25 = vpop.f32.mrf.mxu0  ;;  %v1412_v24 = vpop.f32.mrf.mxu2 }
 0x213   : > { %v4369_v20 = vadd.f32 %v1357_v25, %v4305_v41  ;;  %v1508_v29 = vpop.f32.mrf.mxu3  ;;  %v1617_v25 = vpack.c.bf16 %v1581_v4, %v1581_v4  ;;  %v2186_v4 = vld [vmem:[#allocation2 + $0xb2] sm:$0xff] }
 0x214   : > { %v4373_v31 = vadd.f32 %v1508_v29, %v1403_v44  ;;  %v1306_v2 = vpop.f32.mrf.mxu1  ;;  %v2217_v44 = vpack.c.bf16 %v2181_v46, %v2181_v46  ;;  %v1689_v29 = vunpack.c.l.b16 %v1618_v23  ;;  %v2220_v46 = vpack.c.bf16 %v2184_v27, %v2184_v27 }
 0x215   : > { %v1410_v28 = vadd.f32 %v1409_v5, %v1306_v2  ;;  %3589 = vmatmul.msk.bf16.gmra.mxu0 %vm987_vm2, %v4371_v0  ;;  %v1688_v40 = vunpack.c.l.b16 %v1617_v25  ;;  %v1691_v23 = vunpack.c.l.b16 %v1620_v7 }
 0x216   : > { %v2288_v16 = vunpack.c.l.b16 %v2217_v44  ;;  %v2291_v38 = vunpack.c.l.b16 %v2220_v46 }
 0x218   : > { %v4393_v18 = vpack.c.b16 %v2289_v3, %v2288_v16 }
 0x21a   : > { %v1359_v50 = vpop.f32.mrf.mxu0  ;;  %v1414_v30 = vpop.f32.mrf.mxu2 }
 0x21b   : > { %v4378_v41 = vadd.f32 %v1359_v50, %v4313_v56  ;;  %v1510_v51 = vpop.f32.mrf.mxu3 }
 0x21c   : > { %v4380_v60 = vadd.f32 %v1510_v51, %v1405_v57  ;;  %v1309_v54 = vpop.f32.mrf.mxu1 }
 0x21d   : > { %v1413_v62 = vadd.f32 %v1412_v24, %v1309_v54  ;;  %v2183_v24 = vld [vmem:[#allocation2 + $0x92] sm:$0xff] }
 0x21f   : > { %3524 = vmatmul.msk.bf16.gmra.mxu1 %vm987_vm2, %v4338_v45  ;;  %3547 = vmatmul.msk.bf16.gmra.mxu2 %vm987_vm2, %v4382_v63 }
 0x220   : > { %3567 = vmatmul.msk.bf16.gmra.mxu3 %vm987_vm2, %v4360_v21 }
 0x222   : > { %v1417_v56 = vpop.f32.mrf.mxu2  ;;  %v1453_v5 = vpop.f32.mrf.mxu0 }
 0x223   : > { %v4391_v57 = vadd.f32 %v1453_v5, %v4325_v11  ;;  %v1513_v8 = vpop.f32.mrf.mxu3 }
 0x224   : > { %v4395_v33 = vadd.f32 %v1513_v8, %v1408_v19  ;;  %v1311_v45 = vpop.f32.mrf.mxu1  ;;  %v2219_v19 = vpack.c.bf16 %v2183_v24, %v2183_v24 }
 0x225   : > { %v1415_v22 = vadd.f32 %v1414_v30, %v1311_v45  ;;  %3590 = vmatmul.msk.bf16.gmra.mxu0 %vm987_vm2, %v4393_v18  ;;  %v4404_v30 = vpack.c.b16 %v1689_v29, %v1688_v40  ;;  %v2185_v45 = vld [vmem:[#allocation2 + $0xaa] sm:$0xff] }
 0x226   : > { %v2290_v51 = vunpack.c.l.b16 %v2219_v19 }
 0x228   : > { %v4415_v16 = vpack.c.b16 %v2291_v38, %v2290_v51  ;;  %v1586_v38 = vld [vmem:[#allocation2 + $0xf9] sm:$0xff] }
 0x229   : > { %v1622_v7 = vpack.c.bf16 %v1586_v38, %v1586_v38 }
 0x22a   : > { %v1419_v2 = vpop.f32.mrf.mxu2  ;;  %v1455_v34 = vpop.f32.mrf.mxu0 }
 0x22b   : > { %v4400_v11 = vadd.f32 %v1455_v34, %v4334_v36  ;;  %v1515_v37 = vpop.f32.mrf.mxu3  ;;  %v2222_v34 = vpack.c.bf16 %v2186_v4, %v2186_v4  ;;  %v2188_v4 = vld [vmem:[#allocation2 + $0xca] sm:$0xff] }
 0x22c   : > { %v4402_v49 = vadd.f32 %v1515_v37, %v1410_v28  ;;  %v1314_v61 = vpop.f32.mrf.mxu1 }
 0x22d   : > { %v1418_v50 = vadd.f32 %v1417_v56, %v1314_v61  ;;  %v1583_v56 = vld [vmem:[#allocation2 + $0xd9] sm:$0xff]  ;;  %v2293_v61 = vunpack.c.l.b16 %v2222_v34  ;;  %v2224_v34 = vpack.c.bf16 %v2188_v4, %v2188_v4 }
 0x22e   : > { %v1619_v8 = vpack.c.bf16 %v1583_v56, %v1583_v56 }
 0x22f   : > { %3525 = vmatmul.msk.bf16.gmra.mxu1 %vm987_vm2, %v4360_v21  ;;  %3548 = vmatmul.msk.bf16.gmra.mxu2 %vm987_vm2, %v4404_v30 }
 0x230   : > { %3568 = vmatmul.msk.bf16.gmra.mxu3 %vm987_vm2, %v4382_v63  ;;  %v1690_v29 = vunpack.c.l.b16 %v1619_v8 }
 0x232   : > { %v1422_v36 = vpop.f32.mrf.mxu2  ;;  %v1458_v44 = vpop.f32.mrf.mxu0  ;;  %v4426_v19 = vpack.c.b16 %v1691_v23, %v1690_v29  ;;  %v1693_v23 = vunpack.c.l.b16 %v1622_v7  ;;  %v1587_v7 = vld [vmem:[#allocation2 + $0x109] sm:$0xff] }
 0x233   : > { %v4413_v28 = vadd.f32 %v1458_v44, %v4347_v59  ;;  %v1518_v54 = vpop.f32.mrf.mxu3 }
 0x234   : > { %v4417_v3 = vadd.f32 %v1518_v54, %v1413_v62  ;;  %v1316_v21 = vpop.f32.mrf.mxu1  ;;  %v2221_v62 = vpack.c.bf16 %v2185_v45, %v2185_v45  ;;  %v2187_v45 = vld [vmem:[#allocation2 + $0xc2] sm:$0xff] }
 0x235   : > { %v1420_v5 = vadd.f32 %v1419_v2, %v1316_v21  ;;  %3591 = vmatmul.msk.bf16.gmra.mxu0 %vm987_vm2, %v4415_v16  ;;  %v1585_v21 = vld [vmem:[#allocation2 + $0xf1] sm:$0xff] }
 0x236   : > { %v2292_v46 = vunpack.c.l.b16 %v2221_v62  ;;  %v1621_v8 = vpack.c.bf16 %v1585_v21, %v1585_v21 }
 0x238   : > { %v4440_v44 = vpack.c.b16 %v2293_v61, %v2292_v46  ;;  %v1692_v62 = vunpack.c.l.b16 %v1621_v8 }
 0x23a   : > { %v1424_v25 = vpop.f32.mrf.mxu2  ;;  %v1460_v24 = vpop.f32.mrf.mxu0  ;;  %v4452_v61 = vpack.c.b16 %v1693_v23, %v1692_v62  ;;  %v2189_v23 = vld [vmem:[#allocation2 + $0xda] sm:$0xff] }
 0x23b   : > { %v4422_v59 = vadd.f32 %v1460_v24, %v4356_v9  ;;  %v1520_v27 = vpop.f32.mrf.mxu3  ;;  %v3701_v9 = vld [vmem:[%s5071_s7] sm:$0xff] }
 0x23c   : > { %v4424_v37 = vadd.f32 %v1520_v27, %v1415_v22  ;;  %v1319_v2 = vpop.f32.mrf.mxu1  ;;  %2960 = vmatpush.bf16.msra.mxu3 %v3701_v9 }
 0x23d   : > { %v1423_v40 = vadd.f32 %v1422_v36, %v1319_v2 }
 0x23f   : > { %3526 = vmatmul.msk.bf16.gmra.mxu1 %vm987_vm2, %v4382_v63  ;;  %3549 = vmatmul.msk.bf16.gmra.mxu2 %vm987_vm2, %v4426_v19 }
 0x240   : > { %3569 = vmatmul.msk.bf16.gmra.mxu3 %vm987_vm2, %v4404_v30 }
 0x242   : > { %v1463_v22 = vpop.f32.mrf.mxu0  ;;  %v1921_v51 = vpop.f32.mrf.mxu2 }
 0x243   : > { %v4438_v36 = vadd.f32 %v1463_v22, %v4369_v20  ;;  %v1523_v63 = vpop.f32.mrf.mxu3 }
 0x244   : > { %v4442_v55 = vadd.f32 %v1523_v63, %v1418_v50  ;;  %v1321_v54 = vpop.f32.mrf.mxu1  ;;  %v2223_v50 = vpack.c.bf16 %v2187_v45, %v2187_v45 }
 0x245   : > { %v1425_v56 = vadd.f32 %v1424_v25, %v1321_v54  ;;  %3592 = vmatmul.msk.bf16.gmra.mxu0 %vm987_vm2, %v4440_v44 }
 0x246   : > { %v2294_v9 = vunpack.c.l.b16 %v2223_v50 }
 0x24a   : > { %v1465_v24 = vpop.f32.mrf.mxu0  ;;  %v1923_v27 = vpop.f32.mrf.mxu2 }
 0x24b   : > { %v4447_v20 = vadd.f32 %v1465_v24, %v4378_v41  ;;  %v1525_v29 = vpop.f32.mrf.mxu3  ;;  %v2295_v41 = vunpack.c.l.b16 %v2224_v34  ;;  %v2190_v24 = vld [vmem:[#allocation2 + $0xe2] sm:$0xff] }
 0x24c   : > { %v4449_v2 = vadd.f32 %v1525_v29, %v1420_v5  ;;  %v1783_v25 = vpop.f32.mrf.mxu1  ;;  %v1588_v5 = vld [vmem:[#allocation2 + $0x111] sm:$0xff] }
 0x24d   : > { %v1863_v46 = vadd.f32 %v1783_v25, %v4391_v57  ;;  %v4460_v54 = vpack.c.b16 %v2295_v41, %v2294_v9  ;;  %v1624_v8 = vpack.c.bf16 %v1588_v5, %v1588_v5  ;;  %v2225_v25 = vpack.c.bf16 %v2189_v23, %v2189_v23  ;;  %v1589_v23 = vld [vmem:[#allocation2 + $0x121] sm:$0xff] }
 0x24f   : > { %3527 = vmatmul.msk.bf16.gmra.mxu1 %vm987_vm2, %v4404_v30  ;;  %3550 = vmatmul.msk.bf16.gmra.mxu2 %vm987_vm2, %v4452_v61  ;;  %v2001_v22 = vadd.f32 %v1921_v51, %v1863_v46  ;;  %v1623_v51 = vpack.c.bf16 %v1587_v7, %v1587_v7  ;;  %v1695_v29 = vunpack.c.l.b16 %v1624_v8  ;;  %v1590_v7 = vld [vmem:[#allocation2 + $0x129] sm:$0xff] }
 0x250   : > { %3570 = vmatmul.msk.bf16.gmra.mxu3 %vm987_vm2, %v4426_v19 }
 0x251   : > { %v1694_v34 = vunpack.c.l.b16 %v1623_v51 }
 0x252   : > { %v1926_v38 = vpop.f32.mrf.mxu2  ;;  %v2389_v45 = vpop.f32.mrf.mxu0 }
 0x253   : > { %v1528_v63 = vpop.f32.mrf.mxu3  ;;  %v4470_v41 = vpack.c.b16 %v1695_v29, %v1694_v34  ;;  %v2191_v34 = vld [vmem:[#allocation2 + $0xf2] sm:$0xff] }
 0x254   : > { %v4462_v57 = vadd.f32 %v1528_v63, %v1423_v40  ;;  %v1785_v21 = vpop.f32.mrf.mxu1  ;;  %v2226_v40 = vpack.c.bf16 %v2190_v24, %v2190_v24  ;;  %v1626_v24 = vpack.c.bf16 %v1590_v7, %v1590_v7 }
 0x255   : > { %v1864_v30 = vadd.f32 %v1785_v21, %v4400_v11  ;;  %3593 = vmatmul.msk.bf16.gmra.mxu0 %vm987_vm2, %v4460_v54 }
 0x256   : > { %5079 = vst [vmem:[#allocation7_spill] sm:$0xff] %v4462_v57  ;;  %v2297_v5 = vunpack.c.l.b16 %v2226_v40  ;;  %v1697_v40 = vunpack.c.l.b16 %v1626_v24 }
 0x257   : > { %v2002_v4 = vadd.f32 %v1923_v27, %v1864_v30  ;;  %v2296_v27 = vunpack.c.l.b16 %v2225_v25  ;;  %v2192_v25 = vld [vmem:[#allocation2 + $0xfa] sm:$0xff] }
 0x259   : > { %v4478_v8 = vpack.c.b16 %v2297_v5, %v2296_v27 }
 0x25a   : > { %v1928_v62 = vpop.f32.mrf.mxu2  ;;  %v2391_v21 = vpop.f32.mrf.mxu0 }
 0x25b   : > { %v1530_v50 = vpop.f32.mrf.mxu3 }
 0x25c   : > { %v4467_v46 = vadd.f32 %v1530_v50, %v1425_v56  ;;  %v1788_v9 = vpop.f32.mrf.mxu1 }
 0x25d   : > { %v1865_v11 = vadd.f32 %v1788_v9, %v4413_v28 }
 0x25e   : > { %5080 = vst [vmem:[#allocation8_spill] sm:$0xff] %v4467_v46 }
 0x25f   : > { %3528 = vmatmul.msk.bf16.gmra.mxu1 %vm987_vm2, %v4426_v19  ;;  %3551 = vmatmul.msk.bf16.gmra.mxu2 %vm987_vm2, %v4470_v41  ;;  %v2003_v63 = vadd.f32 %v1926_v38, %v1865_v11  ;;  %v1625_v38 = vpack.c.bf16 %v1589_v23, %v1589_v23  ;;  %v1592_v23 = vld [vmem:[#allocation2 + $0x141] sm:$0xff] }
 0x260   : > { %3571 = vmatmul.msk.bf16.gmra.mxu3 %vm987_vm2, %v4452_v61 }
 0x261   : > { %v1696_v5 = vunpack.c.l.b16 %v1625_v38  ;;  %v1628_v38 = vpack.c.bf16 %v1592_v23, %v1592_v23 }
 0x262   : > { %v1931_v56 = vpop.f32.mrf.mxu2  ;;  %v2394_v11 = vpop.f32.mrf.mxu0 }
 0x263   : > { %v2059_v30 = vpop.f32.mrf.mxu3 }
 0x264   : > { %v2139_v28 = vadd.f32 %v2059_v30, %v2001_v22  ;;  %v1790_v51 = vpop.f32.mrf.mxu1  ;;  %v2227_v22 = vpack.c.bf16 %v2191_v34, %v2191_v34  ;;  %v2228_v30 = vpack.c.bf16 %v2192_v25, %v2192_v25 }
 0x265   : > { %v1866_v19 = vadd.f32 %v1790_v51, %v4422_v59  ;;  %3594 = vmatmul.msk.bf16.gmra.mxu0 %vm987_vm2, %v4478_v8  ;;  %v4486_v51 = vpack.c.b16 %v1697_v40, %v1696_v5  ;;  %v2193_v40 = vld [vmem:[#allocation2 + $0x10a] sm:$0xff]  ;;  %v1699_v5 = vunpack.c.l.b16 %v1628_v38 }
 0x266   : > { %v4483_v29 = vadd.f32 %v2389_v45, %v2139_v28  ;;  %v2298_v45 = vunpack.c.l.b16 %v2227_v22 }
 0x267   : > { %v2004_v50 = vadd.f32 %v1928_v62, %v1866_v19  ;;  %v2299_v62 = vunpack.c.l.b16 %v2228_v30 }
 0x26a   : > { %v1933_v9 = vpop.f32.mrf.mxu2  ;;  %v2396_v24 = vpop.f32.mrf.mxu0 }
 0x26b   : > { %v2061_v27 = vpop.f32.mrf.mxu3 }
 0x26c   : > { %v2140_v46 = vadd.f32 %v2061_v27, %v2002_v4  ;;  %v1793_v57 = vpop.f32.mrf.mxu1  ;;  %v2194_v27 = vld [vmem:[#allocation2 + $0x112] sm:$0xff] }
 0x26d   : > { %v1867_v59 = vadd.f32 %v1793_v57, %v4438_v36  ;;  %v4496_v36 = vpack.c.b16 %v2299_v62, %v2298_v45  ;;  %v2230_v45 = vpack.c.bf16 %v2194_v27, %v2194_v27 }
 0x26e   : > { %v4488_v7 = vadd.f32 %v2391_v21, %v2140_v46  ;;  %v1591_v21 = vld [vmem:[#allocation2 + $0x139] sm:$0xff] }
 0x26f   : > { %3529 = vmatmul.msk.bf16.gmra.mxu1 %vm987_vm2, %v4452_v61  ;;  %3552 = vmatmul.msk.bf16.gmra.mxu2 %vm987_vm2, %v4486_v51  ;;  %v2005_v28 = vadd.f32 %v1931_v56, %v1867_v59  ;;  %v1627_v56 = vpack.c.bf16 %v1591_v21, %v1591_v21  ;;  %v2301_v23 = vunpack.c.l.b16 %v2230_v45  ;;  %v1594_v21 = vld [vmem:[#allocation2 + $0x159] sm:$0xff] }
 0x270   : > { %5081 = vst [vmem:[#allocation9_spill] sm:$0xff] %v4488_v7  ;;  %3572 = vmatmul.msk.bf16.gmra.mxu3 %vm987_vm2, %v4470_v41 }
 0x271   : > { %v1698_v59 = vunpack.c.l.b16 %v1627_v56  ;;  %v1593_v56 = vld [vmem:[#allocation2 + $0x151] sm:$0xff] }
 0x272   : > { %v1936_v4 = vpop.f32.mrf.mxu2 }
 0x273   : > { %v2064_v19 = vpop.f32.mrf.mxu3 }
 0x274   : > { %v2141_v57 = vadd.f32 %v2064_v19, %v2003_v63  ;;  %v1795_v46 = vpop.f32.mrf.mxu1  ;;  %v2229_v63 = vpack.c.bf16 %v2193_v40, %v2193_v40 }
 0x275   : > { %v1868_v61 = vadd.f32 %v1795_v46, %v4447_v20  ;;  %3595 = vmatmul.msk.bf16.gmra.mxu0 %vm987_vm2, %v4496_v36  ;;  %v4504_v46 = vpack.c.b16 %v1699_v5, %v1698_v59  ;;  %v2196_v59 = vld [vmem:[#allocation2 + $0x12a] sm:$0xff] }
 0x276   : > { %v4501_v34 = vadd.f32 %v2394_v11, %v2141_v57  ;;  %v2399_v11 = vpop.f32.mrf.mxu0 }
 0x277   : > { %v2006_v25 = vadd.f32 %v1933_v9, %v1868_v61  ;;  %v2300_v9 = vunpack.c.l.b16 %v2229_v63 }
 0x279   : > { %v4514_v61 = vpack.c.b16 %v2301_v23, %v2300_v9  ;;  %v2232_v9 = vpack.c.bf16 %v2196_v59, %v2196_v59  ;;  %v1595_v59 = vld [vmem:[#allocation2 + $0x169] sm:$0xff] }
 0x27a   : > { %v1938_v22 = vpop.f32.mrf.mxu2 }
 0x27b   : > { %v2066_v30 = vpop.f32.mrf.mxu3 }
 0x27c   : > { %v2142_v62 = vadd.f32 %v2066_v30, %v2004_v50  ;;  %v1798_v19 = vpop.f32.mrf.mxu1  ;;  %v2195_v30 = vld [vmem:[#allocation2 + $0x122] sm:$0xff] }
 0x27d   : > { %v1869_v20 = vadd.f32 %v1798_v19, %v4226_v14 }
 0x27e   : > { %v4506_v7 = vadd.f32 %v2396_v24, %v2142_v62  ;;  %v2401_v63 = vpop.f32.mrf.mxu0 }
 0x27f   : > { %3530 = vmatmul.msk.bf16.gmra.mxu1 %vm987_vm2, %v4470_v41  ;;  %3553 = vmatmul.msk.bf16.gmra.mxu2 %vm987_vm2, %v4504_v46  ;;  %v2007_v57 = vadd.f32 %v1936_v4, %v1869_v20  ;;  %v1630_v41 = vpack.c.bf16 %v1594_v21, %v1594_v21  ;;  %v1629_v4 = vpack.c.bf16 %v1593_v56, %v1593_v56  ;;  %v1596_v56 = vld [vmem:[#allocation2 + $0x171] sm:$0xff] }
 0x280   : > { %3573 = vmatmul.msk.bf16.gmra.mxu3 %vm987_vm2, %v4486_v51 }
 0x281   : > { %v1701_v45 = vunpack.c.l.b16 %v1630_v41  ;;  %v1700_v20 = vunpack.c.l.b16 %v1629_v4 }
 0x282   : > { %v1941_v50 = vpop.f32.mrf.mxu2 }
 0x283   : > { %v2069_v14 = vpop.f32.mrf.mxu3 }
 0x284   : > { %v2143_v24 = vadd.f32 %v2069_v14, %v2005_v28  ;;  %v1800_v38 = vpop.f32.mrf.mxu1  ;;  %v2231_v28 = vpack.c.bf16 %v2195_v30, %v2195_v30 }
 0x285   : > { %v1870_v40 = vadd.f32 %v1800_v38, %v4233_v32  ;;  %3596 = vmatmul.msk.bf16.gmra.mxu0 %vm987_vm2, %v4514_v61  ;;  %v4522_v38 = vpack.c.b16 %v1701_v45, %v1700_v20  ;;  %v2197_v20 = vld [vmem:[#allocation2 + $0x13a] sm:$0xff] }
 0x286   : > { %v4519_v27 = vadd.f32 %v2399_v11, %v2143_v24  ;;  %v2303_v11 = vunpack.c.l.b16 %v2232_v9 }
 0x287   : > { %v2008_v5 = vadd.f32 %v1938_v22, %v1870_v40  ;;  %v2302_v22 = vunpack.c.l.b16 %v2231_v28  ;;  %v2404_v40 = vpop.f32.mrf.mxu0  ;;  %v2198_v28 = vld [vmem:[#allocation2 + $0x142] sm:$0xff] }
 0x289   : > { %v4532_v41 = vpack.c.b16 %v2303_v11, %v2302_v22  ;;  %v2234_v22 = vpack.c.bf16 %v2198_v28, %v2198_v28 }
 0x28a   : > { %v1943_v62 = vpop.f32.mrf.mxu2 }
 0x28b   : > { %v2071_v19 = vpop.f32.mrf.mxu3 }
 0x28c   : > { %v2144_v23 = vadd.f32 %v2071_v19, %v2006_v25  ;;  %v1803_v14 = vpop.f32.mrf.mxu1 }
 0x28d   : > { %v1871_v32 = vadd.f32 %v1803_v14, %v4241_v43 }
 0x28e   : > { %v4524_v21 = vadd.f32 %v2401_v63, %v2144_v23  ;;  %v1632_v63 = vpack.c.bf16 %v1596_v56, %v1596_v56 }
 0x28f   : > { %3531 = vmatmul.msk.bf16.gmra.mxu1 %vm987_vm2, %v4486_v51  ;;  %3554 = vmatmul.msk.bf16.gmra.mxu2 %vm987_vm2, %v4522_v38  ;;  %v2009_v24 = vadd.f32 %v1941_v50, %v1871_v32  ;;  %v1631_v50 = vpack.c.bf16 %v1595_v59, %v1595_v59 }
 0x290   : > { %5082 = vst [vmem:[#allocation10_spill] sm:$0xff] %v4524_v21  ;;  %3574 = vmatmul.msk.bf16.gmra.mxu3 %vm987_vm2, %v4504_v46  ;;  %v1703_v9 = vunpack.c.l.b16 %v1632_v63 }
 0x291   : > { %v1702_v32 = vunpack.c.l.b16 %v1631_v50 }
 0x292   : > { %v1946_v25 = vpop.f32.mrf.mxu2 }
 0x293   : > { %v2074_v43 = vpop.f32.mrf.mxu3  ;;  %v1719_v21 = vpack.c.b16 %v1703_v9, %v1702_v32  ;;  %v2200_v32 = vld [vmem:[#allocation2 + $0x15a] sm:$0xff] }
 0x294   : > { %v2145_v4 = vadd.f32 %v2074_v43, %v2007_v57  ;;  %v1805_v30 = vpop.f32.mrf.mxu1  ;;  %v2233_v57 = vpack.c.bf16 %v2197_v20, %v2197_v20  ;;  %v1597_v20 = vld [vmem:[#allocation2 + $0x181] sm:$0xff] }
 0x295   : > { %v1872_v51 = vadd.f32 %v1805_v30, %v4248_v58  ;;  %3597 = vmatmul.msk.bf16.gmra.mxu0 %vm987_vm2, %v4532_v41  ;;  %v2406_v58 = vpop.f32.mrf.mxu0  ;;  %v1633_v9 = vpack.c.bf16 %v1597_v20, %v1597_v20 }
 0x296   : > { %v4537_v45 = vadd.f32 %v2404_v40, %v2145_v4  ;;  %v2305_v40 = vunpack.c.l.b16 %v2234_v22 }
 0x297   : > { %v4539_v19 = vadd.f32 %v1943_v62, %v1872_v51  ;;  %v2304_v62 = vunpack.c.l.b16 %v2233_v57 }
 0x299   : > { %v4549_v63 = vpack.c.b16 %v2305_v40, %v2304_v62 }
 0x29a   : > { %v1948_v23 = vpop.f32.mrf.mxu2 }
 0x29b   : > { %v2076_v14 = vpop.f32.mrf.mxu3 }
 0x29c   : > { %v2146_v11 = vadd.f32 %v2076_v14, %v2008_v5  ;;  %v1808_v43 = vpop.f32.mrf.mxu1  ;;  %v1598_v5 = vld [vmem:[#allocation2 + $0x189] sm:$0xff]  ;;  %v2199_v14 = vld [vmem:[#allocation2 + $0x152] sm:$0xff] }
 0x29d   : > { %v1873_v30 = vadd.f32 %v1808_v43, %v4264_v6  ;;  %v1900_v43 = vunpack.c.l.b16 %v1633_v9  ;;  %v2201_v9 = vld [vmem:[#allocation2 + $0x16a] sm:$0xff] }
 0x29e   : > { %v4542_v56 = vadd.f32 %v2406_v58, %v2146_v11  ;;  %v2236_v58 = vpack.c.bf16 %v2200_v32, %v2200_v32 }
 0x29f   : > { %3532 = vmatmul.msk.bf16.gmra.mxu1 %vm987_vm2, %v4504_v46  ;;  %3555 = vmatmul.msk.bf16.gmra.mxu2 %vm987_vm2, %v1719_v21  ;;  %v2011_v4 = vadd.f32 %v1946_v25, %v1873_v30  ;;  %v1634_v46 = vpack.c.bf16 %v1598_v5, %v1598_v5 }
 0x2a0   : > { %3575 = vmatmul.msk.bf16.gmra.mxu3 %vm987_vm2, %v4522_v38  ;;  %v2307_v40 = vunpack.c.l.b16 %v2236_v58 }
 0x2a1   : > { %v1901_v57 = vunpack.c.l.b16 %v1634_v46 }
 0x2a2   : > { %v1951_v59 = vpop.f32.mrf.mxu2 }
 0x2a3   : > { %v2079_v51 = vpop.f32.mrf.mxu3 }
 0x2a4   : > { %v4551_v6 = vadd.f32 %v2079_v51, %v2009_v24  ;;  %v1810_v50 = vpop.f32.mrf.mxu1  ;;  %v2235_v24 = vpack.c.bf16 %v2199_v14, %v2199_v14  ;;  %v2202_v14 = vld [vmem:[#allocation2 + $0x172] sm:$0xff] }
 0x2a5   : > { %v1874_v28 = vadd.f32 %v1810_v50, %v4268_v26  ;;  %3598 = vmatmul.msk.bf16.gmra.mxu0 %vm987_vm2, %v4549_v63  ;;  %v1902_v26 = vpack.c.b16 %v1901_v57, %v1900_v43  ;;  %v2237_v57 = vpack.c.bf16 %v2201_v9, %v2201_v9  ;;  %v2238_v43 = vpack.c.bf16 %v2202_v14, %v2202_v14 }
 0x2a7   : > { %v4556_v25 = vadd.f32 %v1948_v23, %v1874_v28  ;;  %v2306_v23 = vunpack.c.l.b16 %v2235_v24 }
 0x2a9   : > { %v4565_v20 = vpack.c.b16 %v2307_v40, %v2306_v23 }
 0x2aa   : > { %v1953_v22 = vpop.f32.mrf.mxu2 }
 0x2ab   : > { %v4558_v11 = vpop.f32.mrf.mxu3 }
 0x2ac   : > { %v1813_v30 = vpop.f32.mrf.mxu1 }
 0x2ad   : > { %v1875_v62 = vadd.f32 %v1813_v30, %v4278_v42 }
 0x2af   : > { %3533 = vmatmul.msk.bf16.gmra.mxu1 %vm987_vm2, %v4522_v38  ;;  %3556 = vmatmul.msk.bf16.gmra.mxu2 %vm987_vm2, %v1902_v26  ;;  %v2013_v5 = vadd.f32 %v1951_v59, %v1875_v62  ;;  %v1600_v62 = vld [vmem:[#allocation2 + $0x1a1] sm:$0xff] }
 0x2b0   : > { %3576 = vmatmul.msk.bf16.gmra.mxu3 %vm987_vm2, %v1719_v21  ;;  %v1636_v9 = vpack.c.bf16 %v1600_v62, %v1600_v62 }
 0x2b2   : > { %v1956_v51 = vpop.f32.mrf.mxu2 }
 0x2b3   : > { %v2084_v50 = vpop.f32.mrf.mxu3 }
 0x2b4   : > { %v4567_v28 = vadd.f32 %v2084_v50, %v2011_v4  ;;  %v1815_v46 = vpop.f32.mrf.mxu1  ;;  %v2309_v4 = vunpack.c.l.b16 %v2238_v43 }
 0x2b5   : > { %v1876_v42 = vadd.f32 %v1815_v46, %v4284_v17  ;;  %3599 = vmatmul.msk.bf16.gmra.mxu0 %vm987_vm2, %v4565_v20  ;;  %v2308_v17 = vunpack.c.l.b16 %v2237_v57 }
 0x2b7   : > { %v4572_v38 = vadd.f32 %v1953_v22, %v1876_v42  ;;  %v1599_v22 = vld [vmem:[#allocation2 + $0x199] sm:$0xff]  ;;  %v4581_v50 = vpack.c.b16 %v2309_v4, %v2308_v17 }
 0x2ba   : > { %v1958_v32 = vpop.f32.mrf.mxu2 }
 0x2bb   : > { %v4574_v59 = vpop.f32.mrf.mxu3 }
 0x2bc   : > { %v1818_v24 = vpop.f32.mrf.mxu1 }
 0x2bd   : > { %v1877_v58 = vadd.f32 %v1818_v24, %v4291_v10  ;;  %v1635_v10 = vpack.c.bf16 %v1599_v22, %v1599_v22 }
 0x2bf   : > { %3534 = vmatmul.msk.bf16.gmra.mxu1 %vm987_vm2, %v1719_v21  ;;  %3629 = vmatmul.msk.bf16.vlgmr.msra.gmra.mxu2 %vm987_vm2, %v4327_v13  ;;  %v2015_v30 = vadd.f32 %v1956_v51, %v1877_v58  ;;  %v2038_v51 = vunpack.c.l.b16 %v1635_v10 }
 0x2c0   : > { %3577 = vmatmul.msk.bf16.gmra.mxu3 %vm987_vm2, %v1902_v26  ;;  %v2039_v26 = vunpack.c.l.b16 %v1636_v9 }
 0x2c2   : > { %v1961_v23 = vpop.f32.mrf.mxu2  ;;  %v2040_v58 = vpack.c.b16 %v2039_v26, %v2038_v51 }
 0x2c3   : > { %v2089_v40 = vpop.f32.mrf.mxu3 }
 0x2c4   : > { %v4583_v46 = vadd.f32 %v2089_v40, %v2013_v5  ;;  %v1820_v42 = vpop.f32.mrf.mxu1 }
 0x2c5   : > { %v1878_v21 = vadd.f32 %v1820_v42, %v4296_v35  ;;  %3600 = vmatmul.msk.bf16.gmra.mxu0 %vm987_vm2, %v4581_v50 }
 0x2c7   : > { %v4588_v14 = vadd.f32 %v1958_v32, %v1878_v21 }
 0x2ca   : > { %v1963_v57 = vpop.f32.mrf.mxu2 }
 0x2cb   : > { %v4590_v43 = vpop.f32.mrf.mxu3 }
 0x2cc   : > { %v1823_v24 = vpop.f32.mrf.mxu1 }
 0x2cd   : > { %v1879_v5 = vadd.f32 %v1823_v24, %v4309_v48 }
 0x2cf   : > { %3607 = vmatmul.msk.bf16.vlgmr.msra.gmra.mxu1 %vm987_vm2, %v4307_v47  ;;  %3630 = vmatmul.msk.bf16.gmra.mxu2 %vm987_vm2, %v4349_v52  ;;  %v2017_v35 = vadd.f32 %v1961_v23, %v1879_v5 }
 0x2d0   : > { %3578 = vmatmul.msk.bf16.gmra.mxu3 %vm987_vm2, %v2040_v58 }
 0x2d2   : > { %v1966_v32 = vpop.f32.mrf.mxu2 }
 0x2d3   : > { %v2094_v17 = vpop.f32.mrf.mxu3 }
 0x2d4   : > { %v4598_v4 = vadd.f32 %v2094_v17, %v2015_v30  ;;  %v1825_v22 = vpop.f32.mrf.mxu1 }
 0x2d5   : > { %v1880_v62 = vadd.f32 %v1825_v22, %v4315_v1 }
 0x2d7   : > { %v4601_v40 = vadd.f32 %v1963_v57, %v1880_v62 }
 0x2da   : > { %v1968_v42 = vpop.f32.mrf.mxu2 }
 0x2db   : > { %v4603_v48 = vpop.f32.mrf.mxu3 }
 0x2dc   : > { %v1828_v10 = vpop.f32.mrf.mxu1 }
 0x2dd   : > { %v1881_v47 = vadd.f32 %v1828_v10, %v4329_v15 }
 0x2df   : > { %3608 = vmatmul.msk.bf16.gmra.mxu1 %vm987_vm2, %v4327_v13  ;;  %3631 = vmatmul.msk.bf16.gmra.mxu2 %vm987_vm2, %v4371_v0  ;;  %v2019_v23 = vadd.f32 %v1966_v32, %v1881_v47 }
 0x2e2   : > { %v1971_v30 = vpop.f32.mrf.mxu2 }
 0x2e3   : > { %v2099_v9 = vpop.f32.mrf.mxu3 }
 0x2e4   : > { %v4610_v21 = vadd.f32 %v2099_v9, %v2017_v35  ;;  %v1830_v1 = vpop.f32.mrf.mxu1 }
 0x2e5   : > { %v1882_v51 = vadd.f32 %v1830_v1, %v4336_v39 }
 0x2e7   : > { %v4613_v26 = vadd.f32 %v1968_v42, %v1882_v51 }
 0x2ea   : > { %v1973_v57 = vpop.f32.mrf.mxu2 }
 0x2eb   : > { %v4615_v24 = vpop.f32.mrf.mxu3 }
 0x2ec   : > { %v1833_v15 = vpop.f32.mrf.mxu1 }
 0x2ed   : > { %v1883_v58 = vadd.f32 %v1833_v15, %v4351_v53 }
 0x2ef   : > { %3609 = vmatmul.msk.bf16.gmra.mxu1 %vm987_vm2, %v4349_v52  ;;  %3632 = vmatmul.msk.bf16.gmra.mxu2 %vm987_vm2, %v4393_v18  ;;  %v2021_v13 = vadd.f32 %v1971_v30, %v1883_v58 }
 0x2f2   : > { %v1976_v5 = vpop.f32.mrf.mxu2 }
 0x2f3   : > { %v2104_v35 = vpop.f32.mrf.mxu3 }
 0x2f4   : > { %v4622_v32 = vadd.f32 %v2104_v35, %v2019_v23  ;;  %v1835_v39 = vpop.f32.mrf.mxu1 }
 0x2f5   : > { %v1884_v17 = vadd.f32 %v1835_v39, %v4358_v12 }
 0x2f7   : > { %v4625_v22 = vadd.f32 %v1973_v57, %v1884_v17 }
 0x2fa   : > { %v1978_v62 = vpop.f32.mrf.mxu2 }
 0x2fb   : > { %v4627_v42 = vpop.f32.mrf.mxu3 }
 0x2fc   : > { %v1838_v53 = vpop.f32.mrf.mxu1 }
 0x2fd   : > { %v1885_v10 = vadd.f32 %v1838_v53, %v4373_v31 }
 0x2ff   : > { %3610 = vmatmul.msk.bf16.gmra.mxu1 %vm987_vm2, %v4371_v0  ;;  %3633 = vmatmul.msk.bf16.gmra.mxu2 %vm987_vm2, %v4415_v16  ;;  %v2023_v52 = vadd.f32 %v1976_v5, %v1885_v10 }
 0x302   : > { %v1981_v47 = vpop.f32.mrf.mxu2 }
 0x303   : > { %v2109_v23 = vpop.f32.mrf.mxu3 }
 0x304   : > { %v4634_v30 = vadd.f32 %v2109_v23, %v2021_v13  ;;  %v1840_v12 = vpop.f32.mrf.mxu1 }
 0x305   : > { %v1886_v9 = vadd.f32 %v1840_v12, %v4380_v60 }
 0x307   : > { %v4637_v1 = vadd.f32 %v1978_v62, %v1886_v9 }
 0x30a   : > { %v1983_v51 = vpop.f32.mrf.mxu2 }
 0x30b   : > { %v4639_v57 = vpop.f32.mrf.mxu3 }
 0x30c   : > { %v1843_v31 = vpop.f32.mrf.mxu1 }
 0x30d   : > { %v1887_v15 = vadd.f32 %v1843_v31, %v4395_v33 }
 0x30f   : > { %3611 = vmatmul.msk.bf16.gmra.mxu1 %vm987_vm2, %v4393_v18  ;;  %3634 = vmatmul.msk.bf16.gmra.mxu2 %vm987_vm2, %v4440_v44  ;;  %v2025_v0 = vadd.f32 %v1981_v47, %v1887_v15 }
 0x312   : > { %v1986_v58 = vpop.f32.mrf.mxu2 }
 0x313   : > { %v2114_v13 = vpop.f32.mrf.mxu3 }
 0x314   : > { %v4646_v5 = vadd.f32 %v2114_v13, %v2023_v52  ;;  %v1845_v60 = vpop.f32.mrf.mxu1 }
 0x315   : > { %v1888_v35 = vadd.f32 %v1845_v60, %v4402_v49 }
 0x317   : > { %v4649_v39 = vadd.f32 %v1983_v51, %v1888_v35 }
 0x31a   : > { %v1988_v17 = vpop.f32.mrf.mxu2 }
 0x31b   : > { %v4651_v62 = vpop.f32.mrf.mxu3 }
 0x31c   : > { %v1848_v33 = vpop.f32.mrf.mxu1 }
 0x31d   : > { %v1889_v53 = vadd.f32 %v1848_v33, %v4417_v3  ;;  %v5083_v33 = vld [vmem:[#allocation7_spill] sm:$0xff] }
 0x31f   : > { %3612 = vmatmul.msk.bf16.gmra.mxu1 %vm987_vm2, %v4415_v16  ;;  %3635 = vmatmul.msk.bf16.gmra.mxu2 %vm987_vm2, %v4460_v54  ;;  %v2027_v18 = vadd.f32 %v1986_v58, %v1889_v53 }
 0x322   : > { %v1991_v10 = vpop.f32.mrf.mxu2 }
 0x323   : > { %v2119_v52 = vpop.f32.mrf.mxu3 }
 0x324   : > { %v4658_v47 = vadd.f32 %v2119_v52, %v2025_v0  ;;  %v1850_v49 = vpop.f32.mrf.mxu1 }
 0x325   : > { %v1890_v23 = vadd.f32 %v1850_v49, %v4424_v37  ;;  %v5084_v49 = vld [vmem:[#allocation8_spill] sm:$0xff] }
 0x327   : > { %v4661_v12 = vadd.f32 %v1988_v17, %v1890_v23 }
 0x32a   : > { %v1993_v9 = vpop.f32.mrf.mxu2 }
 0x32b   : > { %v4663_v51 = vpop.f32.mrf.mxu3 }
 0x32c   : > { %v1853_v3 = vpop.f32.mrf.mxu1 }
 0x32d   : > { %v1891_v31 = vadd.f32 %v1853_v3, %v4442_v55 }
 0x32f   : > { %3613 = vmatmul.msk.bf16.gmra.mxu1 %vm987_vm2, %v4440_v44  ;;  %3636 = vmatmul.msk.bf16.gmra.mxu2 %vm987_vm2, %v4478_v8  ;;  %v2029_v16 = vadd.f32 %v1991_v10, %v1891_v31 }
 0x332   : > { %v1996_v15 = vpop.f32.mrf.mxu2 }
 0x333   : > { %v2124_v0 = vpop.f32.mrf.mxu3 }
 0x334   : > { %v4670_v58 = vadd.f32 %v2124_v0, %v2027_v18  ;;  %v1855_v37 = vpop.f32.mrf.mxu1 }
 0x335   : > { %v1892_v13 = vadd.f32 %v1855_v37, %v4449_v2 }
 0x337   : > { %v4673_v60 = vadd.f32 %v1993_v9, %v1892_v13 }
 0x33a   : > { %v1998_v35 = vpop.f32.mrf.mxu2 }
 0x33b   : > { %v4675_v17 = vpop.f32.mrf.mxu3 }
 0x33c   : > { %v1858_v55 = vpop.f32.mrf.mxu1 }
 0x33d   : > { %v1893_v53 = vadd.f32 %v1858_v55, %v5083_v33 }
 0x33f   : > { %3614 = vmatmul.msk.bf16.gmra.mxu1 %vm987_vm2, %v4460_v54  ;;  %3637 = vmatmul.msk.bf16.gmra.mxu2 %vm987_vm2, %v4496_v36  ;;  %v2031_v44 = vadd.f32 %v1996_v15, %v1893_v53 }
 0x342   : > { %v2665_v18 = vpop.f32.mrf.mxu2 }
 0x343   : > { %v2129_v10 = vpop.f32.mrf.mxu3 }
 0x344   : > { %v4682_v52 = vadd.f32 %v2129_v10, %v2029_v16  ;;  %v1860_v2 = vpop.f32.mrf.mxu1  ;;  %v4697_v16 = vld [vmem:[%s5069_s5] ss:$0 sm:$0xff] }
 0x345   : > { %v1894_v23 = vadd.f32 %v1860_v2, %v5084_v49 }
 0x347   : > { %v4685_v9 = vadd.f32 %v1998_v35, %v1894_v23  ;;  %v2409_v23 = vpop.f32.mrf.mxu0 }
 0x349   : > { %5085 = vst [vmem:[#allocation7_spill] sm:$0xff] %v4685_v9 }
 0x34a   : > { %v2667_v3 = vpop.f32.mrf.mxu2 }
 0x34b   : > { %v4687_v31 = vpop.f32.mrf.mxu3 }
 0x34c   : > { %v2527_v0 = vpop.f32.mrf.mxu1 }
 0x34d   : > { %v2607_v37 = vadd.f32 %v2527_v0, %v4483_v29  ;;  %v5086_v29 = vld [vmem:[#allocation9_spill] sm:$0xff] }
 0x34f   : > { %3615 = vmatmul.msk.bf16.gmra.mxu1 %vm987_vm2, %v4478_v8  ;;  %3638 = vmatmul.msk.bf16.gmra.mxu2 %vm987_vm2, %v4514_v61  ;;  %v2745_v54 = vadd.f32 %v2665_v18, %v2607_v37  ;;  %v4705_v8 = vld [vmem:[%s5070_s6] ss:$0 sm:$0xff] }
 0x351   : > { %v2781_v33 = vmul.f32 %v4697_v16, %v2745_v54 }
 0x352   : > { %v2670_v15 = vpop.f32.mrf.mxu2 }
 0x353   : > { %v2134_v13 = vpop.f32.mrf.mxu3  ;;  %v2817_v10 = vadd.f32 %v4705_v8, %v2781_v33 }
 0x354   : > { %v4699_v35 = vadd.f32 %v2134_v13, %v2031_v44  ;;  %v2529_v55 = vpop.f32.mrf.mxu1 }
 0x355   : > { %v2608_v53 = vadd.f32 %v2529_v55, %v5086_v29  ;;  %v2849_v37 = vmax.f32 %v2817_v10, 0.0  ;;  %v2411_v29 = vpop.f32.mrf.mxu0 }
 0x357   : > { %v2746_v18 = vadd.f32 %v2667_v3, %v2608_v53 }
 0x359   : > { %v2782_v2 = vmul.f32 %v4697_v16, %v2746_v18 }
 0x35a   : > { %v2672_v49 = vpop.f32.mrf.mxu2 }
 0x35b   : > { %v2818_v44 = vadd.f32 %v4705_v8, %v2782_v2 }
 0x35c   : > { %v2532_v0 = vpop.f32.mrf.mxu1 }
 0x35d   : > { %v2850_v13 = vmax.f32 %v2818_v44, 0.0  ;;  %v2609_v54 = vadd.f32 %v2532_v0, %v4501_v34 }
 0x35f   : > { %v2881_v9 = vpack.c.bf16 %v2850_v13, %v2849_v37  ;;  %3616 = vmatmul.msk.bf16.gmra.mxu1 %vm987_vm2, %v4496_v36  ;;  %3639 = vmatmul.msk.bf16.gmra.mxu2 %vm987_vm2, %v4532_v41  ;;  %v2747_v3 = vadd.f32 %v2670_v15, %v2609_v54  ;;  %v4723_v13 = vpop.f32.mrf.mxu0 }
 0x361   : > { %3649 = vmatmul.msk.bf16.vlgmr.msra.gmra.mxu3 %vm987_vm2, %v2881_v9  ;;  %v2783_v53 = vmul.f32 %v4697_v16, %v2747_v3 }
 0x362   : > { %v2675_v55 = vpop.f32.mrf.mxu2 }
 0x363   : > { %v2819_v34 = vadd.f32 %v4705_v8, %v2783_v53  ;;  %v5087_v53 = vld [vmem:[#allocation10_spill] sm:$0xff] }
 0x364   : > { %v2534_v33 = vpop.f32.mrf.mxu1 }
 0x365   : > { %v2610_v18 = vadd.f32 %v2534_v33, %v4506_v7  ;;  %v2851_v37 = vmax.f32 %v2819_v34, 0.0 }
 0x367   : > { %v2748_v10 = vadd.f32 %v2672_v49, %v2610_v18 }
 0x369   : > { %v2784_v2 = vmul.f32 %v4697_v16, %v2748_v10 }
 0x36a   : > { %v2677_v44 = vpop.f32.mrf.mxu2 }
 0x36b   : > { %v2820_v36 = vadd.f32 %v4705_v8, %v2784_v2 }
 0x36c   : > { %v2537_v0 = vpop.f32.mrf.mxu1 }
 0x36d   : > { %v2852_v15 = vmax.f32 %v2820_v36, 0.0  ;;  %v2611_v9 = vadd.f32 %v2537_v0, %v4519_v27  ;;  %v4732_v27 = vpop.f32.mrf.mxu0 }
 0x36f   : > { %3617 = vmatmul.msk.bf16.gmra.mxu1 %vm987_vm2, %v4514_v61  ;;  %3640 = vmatmul.msk.bf16.gmra.mxu2 %vm987_vm2, %v4549_v63  ;;  %v2882_v7 = vpack.c.bf16 %v2852_v15, %v2851_v37  ;;  %v2749_v49 = vadd.f32 %v2675_v55, %v2611_v9 }
 0x371   : > { %3650 = vmatmul.msk.bf16.gmra.mxu3 %vm987_vm2, %v2882_v7  ;;  %v2785_v33 = vmul.f32 %v4697_v16, %v2749_v49 }
 0x372   : > { %v2680_v54 = vpop.f32.mrf.mxu2 }
 0x373   : > { %v2821_v34 = vadd.f32 %v4705_v8, %v2785_v33 }
 0x374   : > { %v2539_v3 = vpop.f32.mrf.mxu1 }
 0x375   : > { %v2612_v18 = vadd.f32 %v2539_v3, %v5087_v53  ;;  %v2853_v55 = vmax.f32 %v2821_v34, 0.0  ;;  %v4743_v49 = vpop.f32.mrf.mxu0 }
 0x377   : > { %v2750_v10 = vadd.f32 %v2677_v44, %v2612_v18 }
 0x379   : > { %v2786_v61 = vmul.f32 %v4697_v16, %v2750_v10 }
 0x37a   : > { %v2682_v2 = vpop.f32.mrf.mxu2 }
 0x37b   : > { %v2822_v36 = vadd.f32 %v4705_v8, %v2786_v61 }
 0x37c   : > { %v2542_v0 = vpop.f32.mrf.mxu1 }
 0x37d   : > { %v2854_v37 = vmax.f32 %v2822_v36, 0.0  ;;  %v2613_v15 = vadd.f32 %v2542_v0, %v4537_v45  ;;  %v4751_v36 = vpop.f32.mrf.mxu0 }
 0x37f   : > { %3618 = vmatmul.msk.bf16.gmra.mxu1 %vm987_vm2, %v4532_v41  ;;  %3641 = vmatmul.msk.bf16.gmra.mxu2 %vm987_vm2, %v4565_v20  ;;  %v2883_v44 = vpack.c.bf16 %v2854_v37, %v2853_v55  ;;  %v2751_v9 = vadd.f32 %v2680_v54, %v2613_v15  ;;  %v2477_v54 = vadd.f32 %v2409_v23, %v4551_v6  ;;  %v2203_v23 = vld [vmem:[#allocation2 + $0x182] sm:$0xff] }
 0x380   : > { %v2148_v15 = vadd.f32 %v4558_v11, %v4539_v19 }
 0x381   : > { %3651 = vmatmul.msk.bf16.gmra.mxu3 %vm987_vm2, %v2883_v44  ;;  %v2787_v33 = vmul.f32 %v4697_v16, %v2751_v9  ;;  %v2204_v44 = vld [vmem:[#allocation2 + $0x18a] sm:$0xff] }
 0x382   : > { %v2685_v7 = vpop.f32.mrf.mxu2  ;;  %v2478_v9 = vadd.f32 %v2411_v29, %v2148_v15  ;;  %v2240_v19 = vpack.c.bf16 %v2204_v44, %v2204_v44  ;;  %v2479_v29 = vadd.f32 %v4723_v13, %v4567_v28  ;;  %v2206_v44 = vld [vmem:[#allocation2 + $0x1a2] sm:$0xff] }
 0x383   : > { %v2823_v45 = vadd.f32 %v4705_v8, %v2787_v33 }
 0x384   : > { %v2544_v3 = vpop.f32.mrf.mxu1 }
 0x385   : > { %v2614_v53 = vadd.f32 %v2544_v3, %v4542_v56  ;;  %v2855_v0 = vmax.f32 %v2823_v45, 0.0  ;;  %v2424_v11 = vpop.f32.mrf.mxu0 }
 0x387   : > { %v2752_v18 = vadd.f32 %v2682_v2, %v2614_v53 }
 0x389   : > { %v2788_v41 = vmul.f32 %v4697_v16, %v2752_v18  ;;  %v2239_v18 = vpack.c.bf16 %v2203_v23, %v2203_v23  ;;  %v2205_v23 = vld [vmem:[#allocation2 + $0x19a] sm:$0xff] }
 0x38a   : > { %v2687_v10 = vpop.f32.mrf.mxu2 }
 0x38b   : > { %v2824_v34 = vadd.f32 %v4705_v8, %v2788_v41 }
 0x38c   : > { %v2547_v61 = vpop.f32.mrf.mxu1 }
 0x38d   : > { %v2856_v55 = vmax.f32 %v2824_v34, 0.0  ;;  %v2615_v37 = vadd.f32 %v2547_v61, %v2477_v54  ;;  %v2506_v34 = vunpack.c.l.b16 %v2239_v18 }
 0x38f   : > { %3619 = vmatmul.msk.bf16.gmra.mxu1 %vm987_vm2, %v4549_v63  ;;  %3642 = vmatmul.msk.bf16.gmra.mxu2 %vm987_vm2, %v4581_v50  ;;  %v2884_v56 = vpack.c.bf16 %v2856_v55, %v2855_v0  ;;  %v2753_v2 = vadd.f32 %v2685_v7, %v2615_v37  ;;  %v2507_v7 = vunpack.c.l.b16 %v2240_v19 }
 0x391   : > { %3652 = vmatmul.msk.bf16.gmra.mxu3 %vm987_vm2, %v2884_v56  ;;  %v2789_v33 = vmul.f32 %v4697_v16, %v2753_v2  ;;  %v2508_v56 = vpack.c.b16 %v2507_v7, %v2506_v34 }
 0x392   : > { %v2690_v6 = vpop.f32.mrf.mxu2 }
 0x393   : > { %v2825_v63 = vadd.f32 %v4705_v8, %v2789_v33  ;;  %v2241_v33 = vpack.c.bf16 %v2205_v23, %v2205_v23 }
 0x394   : > { %v2549_v3 = vpop.f32.mrf.mxu1 }
 0x395   : > { %v2616_v53 = vadd.f32 %v2549_v3, %v2478_v9  ;;  %v2857_v55 = vmax.f32 %v2825_v63, 0.0  ;;  %v2426_v9 = vpop.f32.mrf.mxu0 }
 0x397   : > { %v2754_v45 = vadd.f32 %v2687_v10, %v2616_v53  ;;  %v2150_v10 = vadd.f32 %v4574_v59, %v4556_v25  ;;  %v2242_v53 = vpack.c.bf16 %v2206_v44, %v2206_v44 }
 0x399   : > { %v2790_v41 = vmul.f32 %v4697_v16, %v2754_v45  ;;  %v2480_v13 = vadd.f32 %v4732_v27, %v2150_v10  ;;  %v2645_v45 = vunpack.c.l.b16 %v2242_v53  ;;  %v2481_v27 = vadd.f32 %v4743_v49, %v4583_v46 }
 0x39a   : > { %v2692_v54 = vpop.f32.mrf.mxu2 }
 0x39b   : > { %v2826_v61 = vadd.f32 %v4705_v8, %v2790_v41 }
 0x39c   : > { %v2552_v0 = vpop.f32.mrf.mxu1 }
 0x39d   : > { %v2858_v37 = vmax.f32 %v2826_v61, 0.0  ;;  %v2617_v15 = vadd.f32 %v2552_v0, %v2479_v29 }
 0x39f   : > { %3620 = vmatmul.msk.bf16.gmra.mxu1 %vm987_vm2, %v4565_v20  ;;  %3643 = vmatmul.msk.bf16.gmra.mxu2 %vm987_vm2, %v2508_v56  ;;  %v2885_v2 = vpack.c.bf16 %v2858_v37, %v2857_v55  ;;  %v2755_v3 = vadd.f32 %v2690_v6, %v2617_v15  ;;  %v2644_v20 = vunpack.c.l.b16 %v2241_v33  ;;  %v2429_v6 = vpop.f32.mrf.mxu0 }
 0x3a1   : > { %3653 = vmatmul.msk.bf16.gmra.mxu3 %vm987_vm2, %v2885_v2  ;;  %v2791_v25 = vmul.f32 %v4697_v16, %v2755_v3  ;;  %v2646_v61 = vpack.c.b16 %v2645_v45, %v2644_v20 }
 0x3a2   : > { %v2695_v28 = vpop.f32.mrf.mxu2 }
 0x3a3   : > { %v2827_v63 = vadd.f32 %v4705_v8, %v2791_v25 }
 0x3a4   : > { %v2554_v18 = vpop.f32.mrf.mxu1 }
 0x3a5   : > { %v2618_v59 = vadd.f32 %v2554_v18, %v2480_v13  ;;  %v2859_v0 = vmax.f32 %v2827_v63, 0.0 }
 0x3a7   : > { %v2756_v19 = vadd.f32 %v2692_v54, %v2618_v59  ;;  %v2152_v54 = vadd.f32 %v4590_v43, %v4572_v38  ;;  %v2431_v23 = vpop.f32.mrf.mxu0 }
 0x3a9   : > { %v2792_v41 = vmul.f32 %v4697_v16, %v2756_v19  ;;  %v2482_v46 = vadd.f32 %v4751_v36, %v2152_v54  ;;  %v2154_v36 = vadd.f32 %v4603_v48, %v4588_v14 }
 0x3aa   : > { %v2697_v34 = vpop.f32.mrf.mxu2 }
 0x3ab   : > { %v2828_v7 = vadd.f32 %v4705_v8, %v2792_v41  ;;  %v2484_v41 = vadd.f32 %v2426_v9, %v2154_v36  ;;  %v2156_v9 = vadd.f32 %v4615_v24, %v4601_v40 }
 0x3ac   : > { %v2557_v29 = vpop.f32.mrf.mxu1 }
 0x3ad   : > { %v2860_v55 = vmax.f32 %v2828_v7, 0.0  ;;  %v2619_v37 = vadd.f32 %v2557_v29, %v2481_v27 }
 0x3af   : > { %3621 = vmatmul.msk.bf16.gmra.mxu1 %vm987_vm2, %v4581_v50  ;;  %v2886_v15 = vpack.c.bf16 %v2860_v55, %v2859_v0  ;;  %3644 = vmatmul.msk.bf16.gmra.mxu2 %vm987_vm2, %v2646_v61  ;;  %v2757_v10 = vadd.f32 %v2695_v28, %v2619_v37  ;;  %v2483_v28 = vadd.f32 %v2424_v11, %v4598_v4  ;;  %v2434_v19 = vpop.f32.mrf.mxu0 }
 0x3b0   : > { %v2487_v24 = vadd.f32 %v2434_v19, %v4622_v32  ;;  %v4816_v32 = vld [vmem:[%s5072_s8] ss:$0 sm:$0xff] }
 0x3b1   : > { %3654 = vmatmul.msk.bf16.gmra.mxu3 %vm987_vm2, %v2886_v15  ;;  %v2793_v44 = vmul.f32 %v4697_v16, %v2757_v10 }
 0x3b2   : > { %v2700_v2 = vpop.f32.mrf.mxu2 }
 0x3b3   : > { %v2829_v38 = vadd.f32 %v4705_v8, %v2793_v44 }
 0x3b4   : > { %v2559_v49 = vpop.f32.mrf.mxu1 }
 0x3b5   : > { %v2620_v3 = vadd.f32 %v2559_v49, %v2482_v46  ;;  %v2861_v18 = vmax.f32 %v2829_v38, 0.0  ;;  %v2486_v49 = vadd.f32 %v2431_v23, %v2156_v9 }
 0x3b7   : > { %v2758_v13 = vadd.f32 %v2697_v34, %v2620_v3  ;;  %v2436_v27 = vpop.f32.mrf.mxu0 }
 0x3b9   : > { %v2794_v43 = vmul.f32 %v4697_v16, %v2758_v13 }
 0x3ba   : > { %v2702_v50 = vpop.f32.mrf.mxu2 }
 0x3bb   : > { %v2830_v33 = vadd.f32 %v4705_v8, %v2794_v43 }
 0x3bc   : > { %v2562_v53 = vpop.f32.mrf.mxu1 }
 0x3bd   : > { %v2862_v25 = vmax.f32 %v2830_v33, 0.0  ;;  %v2621_v59 = vadd.f32 %v2562_v53, %v2483_v28 }
 0x3bf   : > { %3622 = vmatmul.msk.bf16.gmra.mxu1 %vm987_vm2, %v2508_v56  ;;  %v2887_v20 = vpack.c.bf16 %v2862_v25, %v2861_v18  ;;  %v2759_v45 = vadd.f32 %v2700_v2, %v2621_v59  ;;  %v2485_v56 = vadd.f32 %v2429_v6, %v4610_v21  ;;  %v2439_v46 = vpop.f32.mrf.mxu0  ;;  %v2158_v25 = vadd.f32 %v4627_v42, %v4613_v26 }
 0x3c1   : > { %3655 = vmatmul.msk.bf16.gmra.mxu3 %vm987_vm2, %v2887_v20  ;;  %v2795_v7 = vmul.f32 %v4697_v16, %v2759_v45  ;;  %v380_v20 = vld [vmem:[%s3981_s21 + $0x8] sm:$0xff]   ;;  %v2488_v45 = vadd.f32 %v2436_v27, %v2158_v25 }
 0x3c2   : > { %v2705_v63 = vpop.f32.mrf.mxu2 }
 0x3c3   : > { %v2831_v61 = vadd.f32 %v4705_v8, %v2795_v7  ;;  %v3042_v7 = vunpack.c.l.bf16 %v380_v20 }
 0x3c4   : > { %v2564_v34 = vpop.f32.mrf.mxu1 }
 0x3c5   : > { %v2622_v4 = vadd.f32 %v2564_v34, %v2484_v41  ;;  %v2863_v55 = vmax.f32 %v2831_v61, 0.0 }
 0x3c7   : > { %v2760_v11 = vadd.f32 %v2702_v50, %v2622_v4  ;;  %v4808_v50 = vpop.f32.mrf.mxu3  ;;  %v2441_v23 = vpop.f32.mrf.mxu0 }
 0x3c9   : > { %v2796_v29 = vmul.f32 %v4697_v16, %v2760_v11 }
 0x3ca   : > { %v2707_v14 = vpop.f32.mrf.mxu2 }
 0x3cb   : > { %v2832_v48 = vadd.f32 %v4705_v8, %v2796_v29 }
 0x3cc   : > { %v2567_v0 = vpop.f32.mrf.mxu1 }
 0x3cd   : > { %v2864_v37 = vmax.f32 %v2832_v48, 0.0  ;;  %v2623_v54 = vadd.f32 %v2567_v0, %v2485_v56 }
 0x3cf   : > { %v2888_v15 = vpack.c.bf16 %v2864_v37, %v2863_v55  ;;  %v2761_v10 = vadd.f32 %v2705_v63, %v2623_v54  ;;  %v4822_v63 = vld [vmem:[%s5073_s9] ss:$0 sm:$0xff]  ;;  %v2444_v11 = vpop.f32.mrf.mxu0  ;;  %v2489_v37 = vadd.f32 %v2439_v46, %v4634_v30 }
 0x3d1   : > { %3656 = vmatmul.msk.bf16.gmra.mxu3 %vm987_vm2, %v2888_v15  ;;  %v2797_v3 = vmul.f32 %v4697_v16, %v2761_v10  ;;  %v3043_v15 = vunpack.c.h.bf16 %v380_v20 }
 0x3d2   : > { %v2710_v2 = vpop.f32.mrf.mxu2 }
 0x3d3   : > { %v2833_v21 = vadd.f32 %v4705_v8, %v2797_v3  ;;  %v2160_v3 = vadd.f32 %v4639_v57, %v4625_v22 }
 0x3d4   : > { %v2569_v44 = vpop.f32.mrf.mxu1 }
 0x3d5   : > { %v2624_v13 = vadd.f32 %v2569_v44, %v2486_v49  ;;  %v2865_v28 = vmax.f32 %v2833_v21, 0.0 }
 0x3d7   : > { %v2762_v38 = vadd.f32 %v2707_v14, %v2624_v13  ;;  %v2446_v13 = vpop.f32.mrf.mxu0 }
 0x3d9   : > { %v2798_v6 = vmul.f32 %v4697_v16, %v2762_v38 }
 0x3da   : > { %v2712_v43 = vpop.f32.mrf.mxu2 }
 0x3db   : > { %v2834_v40 = vadd.f32 %v4705_v8, %v2798_v6 }
 0x3dc   : > { %v2572_v33 = vpop.f32.mrf.mxu1 }
 0x3dd   : > { %v2866_v53 = vmax.f32 %v2834_v40, 0.0  ;;  %v2625_v18 = vadd.f32 %v2572_v33, %v2487_v24  ;;  %v2490_v24 = vadd.f32 %v2441_v23, %v2160_v3 }
 0x3df   : > { %v2889_v59 = vpack.c.bf16 %v2866_v53, %v2865_v28  ;;  %v2763_v36 = vadd.f32 %v2710_v2, %v2625_v18 }
 0x3e1   : > { %3657 = vmatmul.msk.bf16.gmra.mxu3 %vm987_vm2, %v2889_v59  ;;  %v2799_v42 = vmul.f32 %v4697_v16, %v2763_v36 }
 0x3e2   : > { %v2715_v19 = vpop.f32.mrf.mxu2 }
 0x3e3   : > { %v2835_v29 = vadd.f32 %v4705_v8, %v2799_v42  ;;  %v2491_v42 = vadd.f32 %v2444_v11, %v4646_v5 }
 0x3e4   : > { %v2574_v41 = vpop.f32.mrf.mxu1  ;;  %v2962_v26 = vpop.f32.mrf.mxu3 }
 0x3e5   : > { %v2626_v34 = vadd.f32 %v2574_v41, %v2488_v45  ;;  %v3078_v4 = vmul.f32 %v4816_v32, %v2962_v26  ;;  %v2867_v10 = vmax.f32 %v2835_v29, 0.0  ;;  %v2449_v45 = vpop.f32.mrf.mxu0 }
 0x3e7   : > { %v2764_v61 = vadd.f32 %v2712_v43, %v2626_v34  ;;  %v3114_v27 = vadd.f32 %v4822_v63, %v3078_v4  ;;  %v382_v43 = vld [vmem:[%s3981_s21 + $0x10] sm:$0xff]  }
 0x3e8   : > { %v3044_v22 = vunpack.c.l.bf16 %v382_v43  ;;  %v3045_v4 = vunpack.c.h.bf16 %v382_v43 }
 0x3e9   : > { %v2800_v14 = vmul.f32 %v4697_v16, %v2764_v61  ;;  %v3146_v48 = vadd.f32 %v3114_v27, %v3042_v7 }
 0x3ea   : > { %v2717_v56 = vpop.f32.mrf.mxu2 }
 0x3eb   : > { %v2836_v0 = vadd.f32 %v4705_v8, %v2800_v14  ;;  %v3178_v55 = vmax.f32 %v3146_v48, 0.0  ;;  %v2162_v48 = vadd.f32 %v4651_v62, %v4637_v1 }
 0x3ec   : > { %v2577_v54 = vpop.f32.mrf.mxu1  ;;  %v2964_v9 = vpop.f32.mrf.mxu3 }
 0x3ed   : > { %v2868_v2 = vmax.f32 %v2836_v0, 0.0  ;;  %3210 = vst.msk [vmem:[%s4834_s19] sm:$0xff] %vm536_vm0, %v3178_v55  ;;  %v2627_v49 = vadd.f32 %v2577_v54, %v2489_v37  ;;  %v3079_v44 = vmul.f32 %v4816_v32, %v2964_v9  ;;  %v384_v37 = vld [vmem:[%s3981_s21 + $0x18] sm:$0xff]   ;;  %v2492_v9 = vadd.f32 %v2446_v13, %v2162_v48 }
 0x3ee   : > { %v3046_v1 = vunpack.c.l.bf16 %v384_v37 }
 0x3ef   : > { %v3115_v30 = vadd.f32 %v4822_v63, %v3079_v44  ;;  %v2890_v46 = vpack.c.bf16 %v2868_v2, %v2867_v10  ;;  %v2765_v38 = vadd.f32 %v2715_v19, %v2627_v49  ;;  %v2451_v2 = vpop.f32.mrf.mxu0 }
 0x3f1   : > { %v3147_v21 = vadd.f32 %v3115_v30, %v3043_v15  ;;  %3658 = vmatmul.msk.bf16.gmra.mxu3 %vm987_vm2, %v2890_v46  ;;  %v2801_v53 = vmul.f32 %v4697_v16, %v2765_v38 }
 0x3f2   : > { %v2720_v6 = vpop.f32.mrf.mxu2 }
 0x3f3   : > { %v3179_v40 = vmax.f32 %v3147_v21, 0.0  ;;  %v2837_v36 = vadd.f32 %v4705_v8, %v2801_v53 }
 0x3f4   : > { %v2579_v33 = vpop.f32.mrf.mxu1  ;;  %v2967_v28 = vpop.f32.mrf.mxu3 }
 0x3f5   : > { %3211 = vst.msk [vmem:[%s4834_s19 + $0x8] sm:$0xff] %vm536_vm0, %v3179_v40  ;;  %v2628_v18 = vadd.f32 %v2579_v33, %v2490_v24  ;;  %v3080_v57 = vmul.f32 %v4816_v32, %v2967_v28  ;;  %v2869_v61 = vmax.f32 %v2837_v36, 0.0  ;;  %v2493_v40 = vadd.f32 %v2449_v45, %v4658_v47 }
 0x3f6   : > { %v3047_v28 = vunpack.c.h.bf16 %v384_v37 }
 0x3f7   : > { %v2766_v25 = vadd.f32 %v2717_v56, %v2628_v18  ;;  %v3116_v59 = vadd.f32 %v4822_v63, %v3080_v57 }
 0x3f9   : > { %v2802_v19 = vmul.f32 %v4697_v16, %v2766_v25  ;;  %v3148_v20 = vadd.f32 %v3116_v59, %v3044_v22  ;;  %v2454_v25 = vpop.f32.mrf.mxu0  ;;  %v2164_v59 = vadd.f32 %v4663_v51, %v4649_v39 }
 0x3fa   : > { %v2722_v23 = vpop.f32.mrf.mxu2 }
 0x3fb   : > { %v2838_v41 = vadd.f32 %v4705_v8, %v2802_v19  ;;  %v3180_v26 = vmax.f32 %v3148_v20, 0.0 }
 0x3fc   : > { %v2582_v34 = vpop.f32.mrf.mxu1  ;;  %v2969_v7 = vpop.f32.mrf.mxu3 }
 0x3fd   : > { %v2870_v27 = vmax.f32 %v2838_v41, 0.0  ;;  %3212 = vst.msk [vmem:[%s4834_s19 + $0x10] sm:$0xff] %vm536_vm0, %v3180_v26  ;;  %v2629_v29 = vadd.f32 %v2582_v34, %v2491_v42  ;;  %v3081_v14 = vmul.f32 %v4816_v32, %v2969_v7  ;;  %v2494_v41 = vadd.f32 %v2451_v2, %v2164_v59 }
 0x3ff   : > { %v3117_v56 = vadd.f32 %v4822_v63, %v3081_v14  ;;  %v2891_v0 = vpack.c.bf16 %v2870_v27, %v2869_v61  ;;  %v2767_v55 = vadd.f32 %v2720_v6, %v2629_v29 }
 0x401   : > { %v3149_v5 = vadd.f32 %v3117_v56, %v3045_v4  ;;  %3659 = vmatmul.msk.bf16.gmra.mxu3 %vm987_vm2, %v2891_v0  ;;  %v2803_v49 = vmul.f32 %v4697_v16, %v2767_v55  ;;  %v2456_v29 = vpop.f32.mrf.mxu0 }
 0x402   : > { %v2725_v11 = vpop.f32.mrf.mxu2 }
 0x403   : > { %v3181_v54 = vmax.f32 %v3149_v5, 0.0  ;;  %v2839_v46 = vadd.f32 %v4705_v8, %v2803_v49  ;;  %v2495_v5 = vadd.f32 %v2454_v25, %v4670_v58  ;;  %v2166_v49 = vadd.f32 %v4675_v17, %v4661_v12 }
 0x404   : > { %v2584_v15 = vpop.f32.mrf.mxu1  ;;  %v2972_v10 = vpop.f32.mrf.mxu3 }
 0x405   : > { %3213 = vst.msk [vmem:[%s4834_s19 + $0x18] sm:$0xff] %vm536_vm0, %v3181_v54  ;;  %v2630_v44 = vadd.f32 %v2584_v15, %v2492_v9  ;;  %v3082_v62 = vmul.f32 %v4816_v32, %v2972_v10  ;;  %v2871_v53 = vmax.f32 %v2839_v46, 0.0 }
 0x407   : > { %v2768_v3 = vadd.f32 %v2722_v23, %v2630_v44  ;;  %v3118_v30 = vadd.f32 %v4822_v63, %v3082_v62  ;;  %v386_v23 = vld [vmem:[%s3981_s21 + $0x20] sm:$0xff]  }
 0x408   : > { %v3048_v61 = vunpack.c.l.bf16 %v386_v23  ;;  %v3049_v54 = vunpack.c.h.bf16 %v386_v23 }
 0x409   : > { %v2804_v38 = vmul.f32 %v4697_v16, %v2768_v3  ;;  %v3150_v13 = vadd.f32 %v3118_v30, %v3046_v1  ;;  %v388_v30 = vld [vmem:[%s3981_s21 + $0x28] sm:$0xff]   ;;  %v2459_v46 = vpop.f32.mrf.mxu0 }
 0x40a   : > { %v2727_v43 = vpop.f32.mrf.mxu2  ;;  %v3050_v12 = vunpack.c.l.bf16 %v388_v30  ;;  %v2497_v59 = vadd.f32 %v2459_v46, %v4682_v52  ;;  %v5088_v46 = vld [vmem:[#allocation7_spill] sm:$0xff] }
 0x40b   : > { %v2840_v21 = vadd.f32 %v4705_v8, %v2804_v38  ;;  %v3182_v6 = vmax.f32 %v3150_v13, 0.0  ;;  %v2496_v13 = vadd.f32 %v2456_v29, %v2166_v49 }
 0x40c   : > { %v2587_v24 = vpop.f32.mrf.mxu1  ;;  %v2974_v33 = vpop.f32.mrf.mxu3 }
 0x40d   : > { %v2872_v18 = vmax.f32 %v2840_v21, 0.0  ;;  %3214 = vst.msk [vmem:[%s4834_s19 + $0x20] sm:$0xff] %vm536_vm0, %v3182_v6  ;;  %v2631_v22 = vadd.f32 %v2587_v24, %v2493_v40  ;;  %v3083_v57 = vmul.f32 %v4816_v32, %v2974_v33 }
 0x40f   : > { %v3119_v36 = vadd.f32 %v4822_v63, %v3083_v57  ;;  %v2892_v19 = vpack.c.bf16 %v2872_v18, %v2871_v53  ;;  %v2769_v47 = vadd.f32 %v2725_v11, %v2631_v22 }
 0x411   : > { %v3151_v20 = vadd.f32 %v3119_v36, %v3047_v28  ;;  %3660 = vmatmul.msk.bf16.gmra.mxu3 %vm987_vm2, %v2892_v19  ;;  %v2805_v34 = vmul.f32 %v4697_v16, %v2769_v47  ;;  %v3051_v47 = vunpack.c.h.bf16 %v388_v30 }
 0x412   : > { %v2730_v7 = vpop.f32.mrf.mxu2 }
 0x413   : > { %v3183_v45 = vmax.f32 %v3151_v20, 0.0  ;;  %v2841_v14 = vadd.f32 %v4705_v8, %v2805_v34 }
 0x414   : > { %v2589_v26 = vpop.f32.mrf.mxu1  ;;  %v2977_v42 = vpop.f32.mrf.mxu3 }
 0x415   : > { %3215 = vst.msk [vmem:[%s4834_s19 + $0x28] sm:$0xff] %vm536_vm0, %v3183_v45  ;;  %v2632_v4 = vadd.f32 %v2589_v26, %v2494_v41  ;;  %v3084_v39 = vmul.f32 %v4816_v32, %v2977_v42  ;;  %v2873_v9 = vmax.f32 %v2841_v14, 0.0  ;;  %v2461_v26 = vpop.f32.mrf.mxu0  ;;  %v2168_v42 = vadd.f32 %v4687_v31, %v4673_v60 }
 0x417   : > { %v2770_v51 = vadd.f32 %v2727_v43, %v2632_v4  ;;  %v3120_v27 = vadd.f32 %v4822_v63, %v3084_v39 }
 0x419   : > { %v2806_v48 = vmul.f32 %v4697_v16, %v2770_v51  ;;  %v3152_v56 = vadd.f32 %v3120_v27, %v3048_v61  ;;  %v390_v61 = vld [vmem:[%s3981_s21 + $0x30] sm:$0xff]   ;;  %v2498_v27 = vadd.f32 %v2461_v26, %v2168_v42 }
 0x41a   : > { %v2732_v44 = vpop.f32.mrf.mxu2 }
 0x41b   : > { %v2842_v0 = vadd.f32 %v4705_v8, %v2806_v48  ;;  %v3184_v55 = vmax.f32 %v3152_v56, 0.0 }
 0x41c   : > { %v2592_v11 = vpop.f32.mrf.mxu1  ;;  %v2979_v37 = vpop.f32.mrf.mxu3 }
 0x41d   : > { %v2874_v15 = vmax.f32 %v2842_v0, 0.0  ;;  %3216 = vst.msk [vmem:[%s4834_s19 + $0x30] sm:$0xff] %vm536_vm0, %v3184_v55  ;;  %v2633_v10 = vadd.f32 %v2592_v11, %v2495_v5  ;;  %v3085_v2 = vmul.f32 %v4816_v32, %v2979_v37  ;;  %v3052_v0 = vunpack.c.l.bf16 %v390_v61  ;;  %v2464_v5 = vpop.f32.mrf.mxu0 }
 0x41f   : > { %v3121_v1 = vadd.f32 %v4822_v63, %v3085_v2  ;;  %v2893_v62 = vpack.c.bf16 %v2874_v15, %v2873_v9  ;;  %v2771_v58 = vadd.f32 %v2730_v7, %v2633_v10  ;;  %v2499_v2 = vadd.f32 %v2464_v5, %v4699_v35 }
 0x421   : > { %v3153_v3 = vadd.f32 %v3121_v1, %v3049_v54  ;;  %3661 = vmatmul.msk.bf16.gmra.mxu3 %vm987_vm2, %v2893_v62  ;;  %v2807_v43 = vmul.f32 %v4697_v16, %v2771_v58  ;;  %v3053_v1 = vunpack.c.h.bf16 %v390_v61 }
 0x422   : > { %v2735_v53 = vpop.f32.mrf.mxu2 }
 0x423   : > { %v3185_v38 = vmax.f32 %v3153_v3, 0.0  ;;  %v2843_v28 = vadd.f32 %v4705_v8, %v2807_v43 }
 0x424   : > { %v2594_v21 = vpop.f32.mrf.mxu1  ;;  %v2982_v6 = vpop.f32.mrf.mxu3 }
 0x425   : > { %3217 = vst.msk [vmem:[%s4834_s19 + $0x38] sm:$0xff] %vm536_vm0, %v3185_v38  ;;  %v2634_v40 = vadd.f32 %v2594_v21, %v2496_v13  ;;  %v3086_v17 = vmul.f32 %v4816_v32, %v2982_v6  ;;  %v2875_v20 = vmax.f32 %v2843_v28, 0.0  ;;  %v2170_v38 = vadd.f32 %v4808_v50, %v5088_v46  ;;  %v2466_v43 = vpop.f32.mrf.mxu0 }
 0x427   : > { %v2772_v24 = vadd.f32 %v2732_v44, %v2634_v40  ;;  %v3122_v33 = vadd.f32 %v4822_v63, %v3086_v17  ;;  %v392_v40 = vld [vmem:[%s3981_s21 + $0x38] sm:$0xff]   ;;  %v2500_v17 = vadd.f32 %v2466_v43, %v2170_v38 }
 0x428   : > { %v3054_v50 = vunpack.c.l.bf16 %v392_v40  ;;  %v3055_v26 = vunpack.c.h.bf16 %v392_v40 }
 0x429   : > { %v2808_v18 = vmul.f32 %v4697_v16, %v2772_v24  ;;  %v3154_v22 = vadd.f32 %v3122_v33, %v3050_v12 }
 0x42a   : > { %v2737_v39 = vpop.f32.mrf.mxu2 }
 0x42b   : > { %v2844_v57 = vadd.f32 %v4705_v8, %v2808_v18  ;;  %v3186_v25 = vmax.f32 %v3154_v22, 0.0 }
 0x42c   : > { %v2597_v36 = vpop.f32.mrf.mxu1  ;;  %v2984_v19 = vpop.f32.mrf.mxu3 }
 0x42d   : > { %v2876_v23 = vmax.f32 %v2844_v57, 0.0  ;;  %3218 = vst.msk [vmem:[%s4834_s19 + $0x40] sm:$0xff] %vm536_vm0, %v3186_v25  ;;  %v2635_v45 = vadd.f32 %v2597_v36, %v2497_v59  ;;  %v3087_v41 = vmul.f32 %v4816_v32, %v2984_v19 }
 0x42f   : > { %v3123_v34 = vadd.f32 %v4822_v63, %v3087_v41  ;;  %v2894_v7 = vpack.c.bf16 %v2876_v23, %v2875_v20  ;;  %v2773_v52 = vadd.f32 %v2735_v53, %v2635_v45 }
 0x431   : > { %v3155_v4 = vadd.f32 %v3123_v34, %v3051_v47  ;;  %3662 = vmatmul.msk.bf16.gmra.mxu3 %vm987_vm2, %v2894_v7  ;;  %v2809_v48 = vmul.f32 %v4697_v16, %v2773_v52 }
 0x432   : > { %v2740_v10 = vpop.f32.mrf.mxu2 }
 0x433   : > { %v3187_v51 = vmax.f32 %v3155_v4, 0.0  ;;  %v2845_v11 = vadd.f32 %v4705_v8, %v2809_v48 }
 0x434   : > { %v2599_v29 = vpop.f32.mrf.mxu1  ;;  %v2987_v14 = vpop.f32.mrf.mxu3 }
 0x435   : > { %3219 = vst.msk [vmem:[%s4834_s19 + $0x48] sm:$0xff] %vm536_vm0, %v3187_v51  ;;  %v2636_v56 = vadd.f32 %v2599_v29, %v2498_v27  ;;  %v3088_v60 = vmul.f32 %v4816_v32, %v2987_v14  ;;  %v2877_v62 = vmax.f32 %v2845_v11, 0.0 }
 0x437   : > { %v2774_v31 = vadd.f32 %v2737_v39, %v2636_v56  ;;  %v3124_v55 = vadd.f32 %v4822_v63, %v3088_v60 }
 0x439   : > { %v2810_v37 = vmul.f32 %v4697_v16, %v2774_v31  ;;  %v3156_v54 = vadd.f32 %v3124_v55, %v3052_v0  ;;  %v396_v31 = vld [vmem:[%s3981_s21 + $0x48] sm:$0xff]  }
 0x43a   : > { %v2742_v22 = vpop.f32.mrf.mxu2  ;;  %v3058_v11 = vunpack.c.l.bf16 %v396_v31 }
 0x43b   : > { %v2846_v9 = vadd.f32 %v4705_v8, %v2810_v37  ;;  %v3188_v15 = vmax.f32 %v3156_v54, 0.0 }
 0x43c   : > { %v2602_v49 = vpop.f32.mrf.mxu1  ;;  %v2989_v44 = vpop.f32.mrf.mxu3 }
 0x43d   : > { %v2878_v58 = vmax.f32 %v2846_v9, 0.0  ;;  %3220 = vst.msk [vmem:[%s4834_s19 + $0x50] sm:$0xff] %vm536_vm0, %v3188_v15  ;;  %v2637_v3 = vadd.f32 %v2602_v49, %v2499_v2  ;;  %v3089_v30 = vmul.f32 %v4816_v32, %v2989_v44  ;;  %v3059_v2 = vunpack.c.h.bf16 %v396_v31 }
 0x43f   : > { %v3125_v13 = vadd.f32 %v4822_v63, %v3089_v30  ;;  %v2895_v21 = vpack.c.bf16 %v2878_v58, %v2877_v62  ;;  %v2775_v6 = vadd.f32 %v2740_v10, %v2637_v3  ;;  %v398_v62 = vld [vmem:[%s3981_s21 + $0x50] sm:$0xff]  }
 0x440   : > { %v3060_v30 = vunpack.c.l.bf16 %v398_v62 }
 0x441   : > { %v3157_v35 = vadd.f32 %v3125_v13, %v3053_v1  ;;  %3663 = vmatmul.msk.bf16.gmra.mxu3 %vm987_vm2, %v2895_v21  ;;  %v2811_v28 = vmul.f32 %v4697_v16, %v2775_v6 }
 0x443   : > { %v3189_v12 = vmax.f32 %v3157_v35, 0.0  ;;  %v2847_v59 = vadd.f32 %v4705_v8, %v2811_v28  ;;  %v3061_v35 = vunpack.c.h.bf16 %v398_v62 }
 0x444   : > { %v2604_v24 = vpop.f32.mrf.mxu1  ;;  %v2992_v33 = vpop.f32.mrf.mxu3 }
 0x445   : > { %3221 = vst.msk [vmem:[%s4834_s19 + $0x58] sm:$0xff] %vm536_vm0, %v3189_v12  ;;  %v2638_v53 = vadd.f32 %v2604_v24, %v2500_v17  ;;  %v3090_v18 = vmul.f32 %v4816_v32, %v2992_v33  ;;  %v2879_v45 = vmax.f32 %v2847_v59, 0.0  ;;  %v400_v17 = vld [vmem:[%s3981_s21 + $0x58] sm:$0xff]  }
 0x446   : > { %v3062_v28 = vunpack.c.l.bf16 %v400_v17 }
 0x447   : > { %v2776_v57 = vadd.f32 %v2742_v22, %v2638_v53  ;;  %v3126_v25 = vadd.f32 %v4822_v63, %v3090_v18 }
 0x449   : > { %v2812_v36 = vmul.f32 %v4697_v16, %v2776_v57  ;;  %v3158_v19 = vadd.f32 %v3126_v25, %v3054_v50  ;;  %v394_v16 = vld [vmem:[%s3981_s21 + $0x40] sm:$0xff]   ;;  %v3063_v25 = vunpack.c.h.bf16 %v400_v17 }
 0x44a   : > { %v3056_v61 = vunpack.c.l.bf16 %v394_v16  ;;  %v3057_v48 = vunpack.c.h.bf16 %v394_v16 }
 0x44b   : > { %v2848_v47 = vadd.f32 %v4705_v8, %v2812_v36  ;;  %v3190_v20 = vmax.f32 %v3158_v19, 0.0 }
 0x44c   : > { %v2994_v23 = vpop.f32.mrf.mxu3 }
 0x44d   : > { %v2880_v41 = vmax.f32 %v2848_v47, 0.0  ;;  %3222 = vst.msk [vmem:[%s4834_s19 + $0x60] sm:$0xff] %vm536_vm0, %v3190_v20  ;;  %v3091_v42 = vmul.f32 %v4816_v32, %v2994_v23  ;;  %v402_v47 = vld [vmem:[%s3981_s21 + $0x60] sm:$0xff]  }
 0x44f   : > { %v3127_v34 = vadd.f32 %v4822_v63, %v3091_v42  ;;  %v2896_v7 = vpack.c.bf16 %v2880_v41, %v2879_v45  ;;  %v3064_v45 = vunpack.c.l.bf16 %v402_v47 }
 0x451   : > { %v3159_v52 = vadd.f32 %v3127_v34, %v3055_v26  ;;  %3664 = vmatmul.msk.bf16.gmra.mxu3 %vm987_vm2, %v2896_v7 }
 0x453   : > { %v3191_v4 = vmax.f32 %v3159_v52, 0.0  ;;  %v3065_v52 = vunpack.c.h.bf16 %v402_v47 }
 0x454   : > { %v2997_v8 = vpop.f32.mrf.mxu3 }
 0x455   : > { %3223 = vst.msk [vmem:[%s4834_s19 + $0x68] sm:$0xff] %vm536_vm0, %v3191_v4  ;;  %v3092_v39 = vmul.f32 %v4816_v32, %v2997_v8 }
 0x457   : > { %v3128_v51 = vadd.f32 %v4822_v63, %v3092_v39 }
 0x459   : > { %v3160_v27 = vadd.f32 %v3128_v51, %v3056_v61  ;;  %v404_v61 = vld [vmem:[%s3981_s21 + $0x68] sm:$0xff]  }
 0x45b   : > { %v3192_v29 = vmax.f32 %v3160_v27, 0.0  ;;  %v3066_v27 = vunpack.c.l.bf16 %v404_v61 }
 0x45c   : > { %v2999_v14 = vpop.f32.mrf.mxu3 }
 0x45d   : > { %3224 = vst.msk [vmem:[%s4834_s19 + $0x70] sm:$0xff] %vm536_vm0, %v3192_v29  ;;  %v3093_v56 = vmul.f32 %v4816_v32, %v2999_v14 }
 0x45f   : > { %v3129_v0 = vadd.f32 %v4822_v63, %v3093_v56 }
 0x461   : > { %v3161_v60 = vadd.f32 %v3129_v0, %v3057_v48 }
 0x463   : > { %v3193_v55 = vmax.f32 %v3161_v60, 0.0  ;;  %v3067_v60 = vunpack.c.h.bf16 %v404_v61 }
 0x464   : > { %v3002_v5 = vpop.f32.mrf.mxu3 }
 0x465   : > { %3225 = vst.msk [vmem:[%s4834_s19 + $0x78] sm:$0xff] %vm536_vm0, %v3193_v55  ;;  %v3094_v37 = vmul.f32 %v4816_v32, %v3002_v5 }
 0x467   : > { %v3130_v54 = vadd.f32 %v4822_v63, %v3094_v37 }
 0x469   : > { %v3162_v9 = vadd.f32 %v3130_v54, %v3058_v11  ;;  %v406_v11 = vld [vmem:[%s3981_s21 + $0x70] sm:$0xff]  }
 0x46b   : > { %v3194_v15 = vmax.f32 %v3162_v9, 0.0  ;;  %v3068_v9 = vunpack.c.l.bf16 %v406_v11 }
 0x46c   : > { %v3004_v10 = vpop.f32.mrf.mxu3 }
 0x46d   : > { %3226 = vst.msk [vmem:[%s4834_s19 + $0x80] sm:$0xff] %vm536_vm0, %v3194_v15  ;;  %v3095_v49 = vmul.f32 %v4816_v32, %v3004_v10 }
 0x46f   : > { %v3131_v44 = vadd.f32 %v4822_v63, %v3095_v49 }
 0x471   : > { %v3163_v1 = vadd.f32 %v3131_v44, %v3059_v2 }
 0x473   : > { %v3195_v58 = vmax.f32 %v3163_v1, 0.0  ;;  %v3069_v1 = vunpack.c.h.bf16 %v406_v11 }
 0x474   : > { %v3007_v3 = vpop.f32.mrf.mxu3 }
 0x475   : > { %3227 = vst.msk [vmem:[%s4834_s19 + $0x88] sm:$0xff] %vm536_vm0, %v3195_v58  ;;  %v3096_v46 = vmul.f32 %v4816_v32, %v3007_v3 }
 0x477   : > { %v3132_v38 = vadd.f32 %v4822_v63, %v3096_v46 }
 0x479   : > { %v3164_v13 = vadd.f32 %v3132_v38, %v3060_v30  ;;  %v408_v30 = vld [vmem:[%s3981_s21 + $0x78] sm:$0xff]  }
 0x47b   : > { %v3196_v21 = vmax.f32 %v3164_v13, 0.0  ;;  %v3070_v13 = vunpack.c.l.bf16 %v408_v30 }
 0x47c   : > { %v3009_v6 = vpop.f32.mrf.mxu3 }
 0x47d   : > { %3228 = vst.msk [vmem:[%s4834_s19 + $0x90] sm:$0xff] %vm536_vm0, %v3196_v21  ;;  %v3097_v43 = vmul.f32 %v4816_v32, %v3009_v6 }
 0x47f   : > { %v3133_v40 = vadd.f32 %v4822_v63, %v3097_v43 }
 0x481   : > { %v3165_v12 = vadd.f32 %v3133_v40, %v3061_v35 }
 0x483   : > { %v3197_v24 = vmax.f32 %v3165_v12, 0.0  ;;  %v3071_v12 = vunpack.c.h.bf16 %v408_v30 }
 0x484   : > { %v3012_v33 = vpop.f32.mrf.mxu3 }
 0x485   : > { %3229 = vst.msk [vmem:[%s4834_s19 + $0x98] sm:$0xff] %vm536_vm0, %v3197_v24  ;;  %v3098_v53 = vmul.f32 %v4816_v32, %v3012_v33 }
 0x487   : > { %v3134_v50 = vadd.f32 %v4822_v63, %v3098_v53 }
 0x489   : > { %v3166_v18 = vadd.f32 %v3134_v50, %v3062_v28  ;;  %v410_v28 = vld [vmem:[%s3981_s21 + $0x80] sm:$0xff]   ;;  %s3257_s21 = scalar_lea.hbm %s5074_s10, %s3702_s20 }
 0x48a   : > { %s3260_s28 = sshll.u32 %s3257_s21, 4  ;;  %s3261_s28 = int_to_ptr.hbm [resolvable:$true] %s3260_s28 }
 0x48b   : > { %v3198_v22 = vmax.f32 %v3166_v18, 0.0  ;;  %v3072_v18 = vunpack.c.l.bf16 %v410_v28  ;;  %s3785_s29 = sshra.s32 %s3261_s28, 4  ;;  %s3786_s29 = int_to_ptr.hbm [resolvable:$true] %s3785_s29 }
 0x48c   : > { %v3014_v57 = vpop.f32.mrf.mxu3  ;;  %s3787_s30 = scalar_lea.hbm %s3786_s29, 256  ;;  %p3792_p1 = scmp.lt.s32.totalorder %s3786_s29, %s5074_s10 }
 0x48d   : > { %3230 = vst.msk [vmem:[%s4834_s19 + $0xa0] sm:$0xff] %vm536_vm0, %v3198_v22  ;;  %v3099_v59 = vmul.f32 %v4816_v32, %v3014_v57  ;;  %p3788_p12 = scmp.ne.s32.totalorder %s3786_s29, %s3787_s30  ;;  %p3793_p2 = scmp.lt.s32.totalorder %s3791_s22, %s3787_s30 }
 0x48f   : > { %v3135_v36 = vadd.f32 %v4822_v63, %v3099_v59  ;;  %p3789_p13 = pnand %p3788_p12, %p3949_p4  ;;  %p3794_p3 = por %p3793_p2, %p3792_p1 }
 0x491   : > { %v3167_v19 = vadd.f32 %v3135_v36, %v3063_v25  ;;  %p3790_p0 = pneg %p3789_p13 }
 0x493   : > { %v3199_v20 = vmax.f32 %v3167_v19, 0.0  ;;  %v3073_v19 = vunpack.c.h.bf16 %v410_v28  ;;  %p3795_p5 = pnand %p3794_p3, %p3790_p0 }
 0x494   : > { %v3017_v23 = vpop.f32.mrf.mxu3 }
 0x495   : > { %3231 = vst.msk [vmem:[%s4834_s19 + $0xa8] sm:$0xff] %vm536_vm0, %v3199_v20  ;;  %v3100_v41 = vmul.f32 %v4816_v32, %v3017_v23 }
 0x497   : > { %v3136_v26 = vadd.f32 %v4822_v63, %v3100_v41 }
 0x499   : > { %v3168_v42 = vadd.f32 %v3136_v26, %v3064_v45 }
 0x49b   : > { %v3200_v34 = vmax.f32 %v3168_v42, 0.0 }
 0x49c   : > { %v3019_v7 = vpop.f32.mrf.mxu3 }
 0x49d   : > { %3232 = vst.msk [vmem:[%s4834_s19 + $0xb0] sm:$0xff] %vm536_vm0, %v3200_v34  ;;  %v3101_v16 = vmul.f32 %v4816_v32, %v3019_v7 }
 0x49f   : > { %v3137_v4 = vadd.f32 %v4822_v63, %v3101_v16 }
 0x4a1   : > { %v3169_v8 = vadd.f32 %v3137_v4, %v3065_v52 }
 0x4a3   : > { %v3201_v39 = vmax.f32 %v3169_v8, 0.0 }
 0x4a4   : > { %v3022_v51 = vpop.f32.mrf.mxu3 }
 0x4a5   : > { %3233 = vst.msk [vmem:[%s4834_s19 + $0xb8] sm:$0xff] %vm536_vm0, %v3201_v39  ;;  %v3102_v29 = vmul.f32 %v4816_v32, %v3022_v51 }
 0x4a7   : > { %v3138_v14 = vadd.f32 %v4822_v63, %v3102_v29 }
 0x4a9   : > { %v3170_v48 = vadd.f32 %v3138_v14, %v3066_v27 }
 0x4ab   : > { %v3202_v56 = vmax.f32 %v3170_v48, 0.0 }
 0x4ac   : > { %v3024_v0 = vpop.f32.mrf.mxu3 }
 0x4ad   : > { %3234 = vst.msk [vmem:[%s4834_s19 + $0xc0] sm:$0xff] %vm536_vm0, %v3202_v56  ;;  %v3103_v31 = vmul.f32 %v4816_v32, %v3024_v0 }
 0x4af   : > { %v3139_v55 = vadd.f32 %v4822_v63, %v3103_v31 }
 0x4b1   : > { %v3171_v5 = vadd.f32 %v3139_v55, %v3067_v60 }
 0x4b3   : > { %v3203_v37 = vmax.f32 %v3171_v5, 0.0 }
 0x4b4   : > { %v3027_v54 = vpop.f32.mrf.mxu3 }
 0x4b5   : > { %3235 = vst.msk [vmem:[%s4834_s19 + $0xc8] sm:$0xff] %vm536_vm0, %v3203_v37  ;;  %v3104_v15 = vmul.f32 %v4816_v32, %v3027_v54 }
 0x4b7   : > { %v3140_v10 = vadd.f32 %v4822_v63, %v3104_v15 }
 0x4b9   : > { %v3172_v2 = vadd.f32 %v3140_v10, %v3068_v9 }
 0x4bb   : > { %v3204_v49 = vmax.f32 %v3172_v2, 0.0 }
 0x4bc   : > { %v3029_v44 = vpop.f32.mrf.mxu3 }
 0x4bd   : > { %3236 = vst.msk [vmem:[%s4834_s19 + $0xd0] sm:$0xff] %vm536_vm0, %v3204_v49  ;;  %v3105_v62 = vmul.f32 %v4816_v32, %v3029_v44 }
 0x4bf   : > { %v3141_v58 = vadd.f32 %v4822_v63, %v3105_v62 }
 0x4c1   : > { %v3173_v3 = vadd.f32 %v3141_v58, %v3069_v1 }
 0x4c3   : > { %v3205_v46 = vmax.f32 %v3173_v3, 0.0 }
 0x4c4   : > { %v3032_v38 = vpop.f32.mrf.mxu3 }
 0x4c5   : > { %3237 = vst.msk [vmem:[%s4834_s19 + $0xd8] sm:$0xff] %vm536_vm0, %v3205_v46  ;;  %v3106_v21 = vmul.f32 %v4816_v32, %v3032_v38 }
 0x4c7   : > { %v3142_v6 = vadd.f32 %v4822_v63, %v3106_v21 }
 0x4c9   : > { %v3174_v35 = vadd.f32 %v3142_v6, %v3070_v13 }
 0x4cb   : > { %v3206_v43 = vmax.f32 %v3174_v35, 0.0 }
 0x4cc   : > { %v3034_v40 = vpop.f32.mrf.mxu3 }
 0x4cd   : > { %3238 = vst.msk [vmem:[%s4834_s19 + $0xe0] sm:$0xff] %vm536_vm0, %v3206_v43  ;;  %v3107_v17 = vmul.f32 %v4816_v32, %v3034_v40 }
 0x4cf   : > { %v3143_v24 = vadd.f32 %v4822_v63, %v3107_v17 }
 0x4d1   : > { %v3175_v33 = vadd.f32 %v3143_v24, %v3071_v12 }
 0x4d3   : > { %v3207_v53 = vmax.f32 %v3175_v33, 0.0 }
 0x4d4   : > { %v3037_v50 = vpop.f32.mrf.mxu3 }
 0x4d5   : > { %3239 = vst.msk [vmem:[%s4834_s19 + $0xe8] sm:$0xff] %vm536_vm0, %v3207_v53  ;;  %v3108_v22 = vmul.f32 %v4816_v32, %v3037_v50 }
 0x4d7   : > { %v3144_v57 = vadd.f32 %v4822_v63, %v3108_v22 }
 0x4d9   : > { %v3176_v25 = vadd.f32 %v3144_v57, %v3072_v18 }
 0x4db   : > { %v3208_v59 = vmax.f32 %v3176_v25, 0.0 }
 0x4dc   : > { %v3039_v36 = vpop.f32.mrf.mxu3 }
 0x4dd   : > { %3240 = vst.msk [vmem:[%s4834_s19 + $0xf0] sm:$0xff] %vm536_vm0, %v3208_v59  ;;  %v3109_v47 = vmul.f32 %v4816_v32, %v3039_v36 }
 0x4df   : > { %v3145_v20 = vadd.f32 %v4822_v63, %v3109_v47 }
 0x4e1   : > { %v3177_v23 = vadd.f32 %v3145_v20, %v3073_v19 }
 0x4e3   : > { %v3209_v45 = vmax.f32 %v3177_v23, 0.0 }
 0x4e5   : > { %3241 = vst.msk [vmem:[%s4834_s19 + $0xf8] sm:$0xff] %vm536_vm0, %v3209_v45 }
 0x4e6   : > { %3798 = shalt.err (!%p3795_p5)
}
 0x4e7   : > { %s3852_s11 = smov 128   ;;  %s3853_s19 = smov 8  }
 0x4e8   : > { %3707 = dma.vmem_to_hbm [thread:$0]  (%p3949_p4), %s3259_s27, 4096, %s3261_s28, %s3243_s16, %s3852_s11, %s3852_s11, %s3853_s19  }
 0x4e9 PF: > { %p3713_p6 = scmp.ge.s32.totalorder %s3849_s18, 2  ;;  %s3275_s12 = sand.u32 1, %s3829_s13  }
 0x4ea   : > { %s3276_s20 = scalar_lea.sflag [#allocation4], %s3275_s12 }
 0x4eb   : > { %p3710_p7 = pnand %p3713_p6, %p3956_p8 }
 0x4ed   : > { %p3711_p9 = pneg %p3710_p7 }
 0x4ef   : > { %3824 = dma.done.wait (%p3711_p9), %s3276_s20, 4096  }
 0x4f0   : > { %3826 = vsyncadd (%p3711_p9), %s3276_s20, 4294963200  ;;  %s23_s18 = sadd.s32 1, %s3849_s18   ;;  %s5089_s23 = sld [smem:[#allocation6_spill]] }
 0x4f1   : > { %p20_p10 = scmp.ge.s32.totalorder %s23_s18, 4   ;;  %s5090_s13 = smov %s3833_s14 }
 0x4f2   : > { %s5091_s14 = smov %s3837_s15  ;;  %s5092_s15 = smov %s3962_s26 }
 0x4f3   : > { %s5093_s16 = smov %s3845_s17  ;;  %22 = sbr.rel (!%p20_p10) target bundleno = 4 (0x4), region = 104 }
 0x4f6   : > { %s5094_s17 = smov %s5089_s23 }
 0x4f8   :  { %3282 = vsyncpa [#allocation4], 1 }
 0x4f9   :  { %3284 = vsyncpa [#allocation4 + $0x1], 1 }

</bundles_post_ra>
